<compile_context>
chip_gen: v6e
topology: v6e:2x2x1
jax: 0.10.0
libtpu: 0.0.40
codegen_flags: <defaults>
</compile_context>

<pallas_src>
import jax
import jax.numpy as jnp
from jax.experimental import pallas as pl
from jax.experimental.pallas import tpu as pltpu


C_OUT = 16          # conv output channels
TAPS = 16           # 4x4 stride-2 taps of the pool-folded conv
P = 14 * 14         # pooled spatial positions per channel
N_OUT = 500         # fc output features
N_PAD = 512         # lane-padded fc output width
TN = 256            # fc N tile (grid of 2 -> v7x megacore splits the weight DMA)


# ---------------------------------------------------------------------------
# Fused Pallas kernel: conv(3x3,p1)+avgpool(2x2)+lif1 + fc(3136->500)+lif2
# ---------------------------------------------------------------------------

def fused_net_kernel(pt_ref, wc_ref, cb_ref, fw_ref, fb_ref, spk_ref, mem_ref):
    # pt_ref: (B, 16, 196) f32   im2col patches (tap on sublanes, pooled pos on lanes)
    # wc_ref: (16, 16, 1)  f32   pool-folded conv weight (cout, tap, 1)
    # cb_ref: (16, 1, 1)   f32   conv bias
    # fw_ref: (16, 196, TN) bf16 fc weight tile (channel, position, out-feature)
    # fb_ref: (1, TN)      f32   fc bias tile
    # spk_ref / mem_ref: (B, TN) f32   lif2 spikes / membrane
    pt = pt_ref[...]            # (B, 16, 196)
    wc = wc_ref[...]            # (16, 16, 1)
    cb = cb_ref[...]            # (16, 1, 1)

    acc = None
    for c in range(C_OUT):      # static unroll over the 16 conv channels
        # Pooled conv for channel c: VPU broadcast-mul over the 16 taps + sublane
        # reduction.  Trivially cheap, recomputed per N-tile so the grid stays
        # fully parallel (v7x megacore) and no scratch state is carried.
        pre_c = jnp.sum(pt * wc[c], axis=1) + cb[c]            # (B, 196) f32
        # lif1 (zero initial membrane): mem = pre ; spk = (mem > 1)
        spk_c = (pre_c > 1.0).astype(jnp.bfloat16)             # exact 0/1 in bf16
        # fc contribution of channel c on the MXU: (B,196) @ (196,TN), f32 acc
        term = jnp.dot(spk_c, fw_ref[c], preferred_element_type=jnp.float32)
        acc = term if acc is None else acc + term

    z = acc + fb_ref[...]                                      # (B, TN) f32
    mem_ref[...] = z                                           # lif2 membrane
    spk_ref[...] = (z > 1.0).astype(spk_ref.dtype)             # lif2 spikes


# ---------------------------------------------------------------------------
# One-time parameter preparation (call OUTSIDE the jitted forward)
# ---------------------------------------------------------------------------

def prepare_params(conv_w, conv_b, fc_w, fc_b):
    # Fold the 2x2/stride-2 average pool into the 3x3/pad-1 conv -> an effective
    # 4x4/stride-2 conv on the zero-padded 30x30 image.
    w = conv_w[:, 0]                                           # (16, 3, 3)
    w_eff = 0.25 * (
        jnp.pad(w, ((0, 0), (0, 1), (0, 1)))
        + jnp.pad(w, ((0, 0), (0, 1), (1, 0)))
        + jnp.pad(w, ((0, 0), (1, 0), (0, 1)))
        + jnp.pad(w, ((0, 0), (1, 0), (1, 0)))
    )                                                          # (16, 4, 4)
    conv_w_prep = w_eff.reshape(C_OUT, TAPS, 1).astype(jnp.float32)
    conv_b_prep = conv_b.reshape(C_OUT, 1, 1).astype(jnp.float32)

    # PyTorch's NCHW flatten is channel-major (c, h, w), which matches the
    # kernel's per-channel (B,196) activation blocks directly: reshape fc_w^T to
    # (16, 196, 500), pad N 500->512 for lane-dense tiles, cast to bf16.
    W3 = fc_w.T.reshape(C_OUT, P, N_OUT)
    W3 = jnp.pad(W3, ((0, 0), (0, 0), (0, N_PAD - N_OUT))).astype(jnp.bfloat16)
    b = jnp.pad(fc_b, (0, N_PAD - N_OUT)).reshape(1, N_PAD).astype(jnp.float32)
    return conv_w_prep, conv_b_prep, W3, b


# ---------------------------------------------------------------------------
# Forward
# ---------------------------------------------------------------------------

def net_with_avg_pool_forward(x, conv_w_prep, conv_b_prep, fc_w_prep, fc_b_prep):
    B = x.shape[0]

    # XLA glue: zero-pad + stride-2 4x4 im2col (pool already folded into the conv
    # weight).  <10 KB of data, fused by XLA into a couple of tiny ops.
    # TODO(synk): could be built in-kernel from the padded (B,30,30) image with
    # strided reads to drop this glue entirely; kept in XLA to avoid in-kernel
    # relayouts.
    xp = jnp.pad(x[:, 0], ((0, 0), (1, 1), (1, 1)))            # (B, 30, 30)
    taps = [xp[:, u:u + 28:2, v:v + 28:2] for u in range(4) for v in range(4)]
    patches = jnp.stack(taps, axis=1).reshape(B, TAPS, P)      # (B, 16, 196)

    spk2p, mem2p = pl.pallas_call(
        fused_net_kernel,
        out_shape=(
            jax.ShapeDtypeStruct((B, N_PAD), jnp.float32),
            jax.ShapeDtypeStruct((B, N_PAD), jnp.float32),
        ),
        grid=(N_PAD // TN,),
        in_specs=[
            pl.BlockSpec((B, TAPS, P), lambda j: (0, 0, 0)),       # patches
            pl.BlockSpec((C_OUT, TAPS, 1), lambda j: (0, 0, 0)),   # conv weight
            pl.BlockSpec((C_OUT, 1, 1), lambda j: (0, 0, 0)),      # conv bias
            pl.BlockSpec((C_OUT, P, TN), lambda j: (0, 0, j)),     # fc weight tile
            pl.BlockSpec((1, TN), lambda j: (0, j)),               # fc bias tile
        ],
        out_specs=(
            pl.BlockSpec((B, TN), lambda j: (0, j)),
            pl.BlockSpec((B, TN), lambda j: (0, j)),
        ),
        compiler_params=pltpu.CompilerParams(dimension_semantics=("parallel",)),
    )(patches, conv_w_prep, conv_b_prep, fc_w_prep, fc_b_prep)

    # Slice padded lanes back to the real 500 outputs.
    return spk2p[:, :N_OUT], mem2p[:, :N_OUT]


# ---------------------------------------------------------------------------
# Pure-JAX reference (sanity check only)
# ---------------------------------------------------------------------------

def reference_forward(x, conv_w, conv_b, fc_w, fc_b):
    y = jax.lax.conv_general_dilated(
        x, conv_w, window_strides=(1, 1), padding=((1, 1), (1, 1)),
        dimension_numbers=("NCHW", "OIHW", "NCHW"),
    ) + conv_b[None, :, None, None]
    B = x.shape[0]
    y = y.reshape(B, 16, 14, 2, 14, 2).mean(axis=(3, 5))
    flat = y.reshape(B, 16 * 14 * 14)
    spk1 = (flat > 1.0).astype(jnp.float32)
    z = spk1 @ fc_w.T + fc_b
    return (z > 1.0).astype(jnp.float32), z


# ---------------------------------------------------------------------------
# Main
# ---------------------------------------------------------------------------

if __name__ == "__main__":
    key = jax.random.PRNGKey(0)
    k1, k2, k3, k4, k5 = jax.random.split(key, 5)

    # Deterministic synthetic parameters (PyTorch-style uniform fan-in bounds).
    conv_w = jax.random.uniform(k1, (16, 1, 3, 3), jnp.float32, -1.0 / 3.0, 1.0 / 3.0)
    conv_b = jax.random.uniform(k2, (16,), jnp.float32, -1.0 / 3.0, 1.0 / 3.0)
    fc_bound = 1.0 / jnp.sqrt(3136.0)
    fc_w = jax.random.uniform(k3, (500, 3136), jnp.float32, -fc_bound, fc_bound)
    fc_b = jax.random.uniform(k4, (500,), jnp.float32, -fc_bound, fc_bound)

    # Input: NCHW [batch=2, 1, 28, 28] (fc in-features 3136 = 16*14*14 forces 28x28).
    x = 3.0 * jax.random.normal(k5, (2, 1, 28, 28), jnp.float32)

    # One-time weight preparation outside the jitted forward.
    conv_w_prep, conv_b_prep, fc_w_prep, fc_b_prep = prepare_params(
        conv_w, conv_b, fc_w, fc_b
    )
    jax.block_until_ready((conv_w_prep, conv_b_prep, fc_w_prep, fc_b_prep))

    fwd = jax.jit(net_with_avg_pool_forward)
    spk2, mem2 = fwd(x, conv_w_prep, conv_b_prep, fc_w_prep, fc_b_prep)
    jax.block_until_ready((spk2, mem2))

    # Sanity check vs. the pure-JAX f32 reference (tolerant: bf16 fc weights + MXU).
    ref_spk2, ref_mem2 = reference_forward(x, conv_w, conv_b, fc_w, fc_b)
    assert jnp.allclose(mem2, ref_mem2, rtol=3e-2, atol=3e-2), "membrane mismatch"
    mismatch_frac = jnp.mean(jnp.abs(spk2 - ref_spk2))
    assert mismatch_frac < 0.01, f"spike mismatch fraction {mismatch_frac}"

    print("KERNEL_OK")
</pallas_src>

<mosaic_0001>
module attributes {stable_mosaic.version = 11 : i64} {
  func.func @fused_net_kernel(%arg0: i32, %arg1: memref<2x16x196xf32, #tpu.memory_space<vmem>>, %arg2: memref<16x16x1xf32, #tpu.memory_space<vmem>>, %arg3: memref<16x1x1xf32, #tpu.memory_space<vmem>>, %arg4: memref<16x196x256xbf16, #tpu.memory_space<vmem>>, %arg5: memref<1x256xf32, #tpu.memory_space<vmem>>, %arg6: memref<2x256xf32, #tpu.memory_space<vmem>>, %arg7: memref<2x256xf32, #tpu.memory_space<vmem>>) attributes {dimension_semantics = [#tpu.dimension_semantics<parallel>], iteration_bounds = array<i64: 2>, scalar_prefetch = 0 : i64, scratch_operands = 0 : i64, tpu.core_type = #tpu.core_type<tc>, window_params = [{pipeline_mode = #tpu.pipeline_mode<synchronous>, transform_indices = @transform_0, window_bounds = array<i64: 2, 16, 196>}, {pipeline_mode = #tpu.pipeline_mode<synchronous>, transform_indices = @transform_1, window_bounds = array<i64: 16, 16, 1>}, {pipeline_mode = #tpu.pipeline_mode<synchronous>, transform_indices = @transform_2, window_bounds = array<i64: 16, 1, 1>}, {transform_indices = @transform_3, window_bounds = array<i64: 16, 196, 256>}, {transform_indices = @transform_4, window_bounds = array<i64: 1, 256>}, {transform_indices = @transform_5, window_bounds = array<i64: 2, 256>}, {transform_indices = @transform_6, window_bounds = array<i64: 2, 256>}]} {
    %c0 = arith.constant 0 : index
    %c0_0 = arith.constant 0 : index
    %c0_1 = arith.constant 0 : index
    %0 = vector.load %arg1[%c0, %c0_0, %c0_1] : memref<2x16x196xf32, #tpu.memory_space<vmem>>, vector<2x16x196xf32>
    %c0_2 = arith.constant 0 : index
    %c0_3 = arith.constant 0 : index
    %c0_4 = arith.constant 0 : index
    %1 = vector.load %arg2[%c0_2, %c0_3, %c0_4] : memref<16x16x1xf32, #tpu.memory_space<vmem>>, vector<16x16x1xf32>
    %c0_5 = arith.constant 0 : index
    %c0_6 = arith.constant 0 : index
    %c0_7 = arith.constant 0 : index
    %2 = vector.load %arg3[%c0_5, %c0_6, %c0_7] : memref<16x1x1xf32, #tpu.memory_space<vmem>>, vector<16x1x1xf32>
    %3 = vector.extract_strided_slice %1 {offsets = [0, 0, 0], sizes = [1, 16, 1], strides = [1, 1, 1]} : vector<16x16x1xf32> to vector<1x16x1xf32>
    %4 = vector.shape_cast %3 : vector<1x16x1xf32> to vector<16x1xf32>
    %5 = vector.shape_cast %4 : vector<16x1xf32> to vector<1x16x1xf32>
    %6 = vector.broadcast %5 : vector<1x16x1xf32> to vector<2x16x196xf32>
    %7 = arith.mulf %0, %6 : vector<2x16x196xf32>
    %cst = arith.constant dense<0.000000e+00> : vector<2x196xf32>
    %8 = vector.multi_reduction <add>, %7, %cst [1] : vector<2x16x196xf32> to vector<2x196xf32>
    %9 = vector.extract_strided_slice %2 {offsets = [0, 0, 0], sizes = [1, 1, 1], strides = [1, 1, 1]} : vector<16x1x1xf32> to vector<1x1x1xf32>
    %10 = vector.shape_cast %9 : vector<1x1x1xf32> to vector<1x1xf32>
    %11 = vector.broadcast %10 : vector<1x1xf32> to vector<2x196xf32>
    %12 = arith.addf %8, %11 : vector<2x196xf32>
    %cst_8 = arith.constant 1.000000e+00 : f32
    %13 = vector.broadcast %cst_8 : f32 to vector<2x196xf32>
    %14 = arith.cmpf ogt, %12, %13 : vector<2x196xf32>
    %15 = arith.extui %14 : vector<2x196xi1> to vector<2x196xi32>
    %16 = arith.sitofp %15 : vector<2x196xi32> to vector<2x196xf32>
    %17 = arith.truncf %16 : vector<2x196xf32> to vector<2x196xbf16>
    %c0_9 = arith.constant 0 : index
    %c0_10 = arith.constant 0 : index
    %c0_11 = arith.constant 0 : index
    %18 = vector.load %arg4[%c0_9, %c0_10, %c0_11] : memref<16x196x256xbf16, #tpu.memory_space<vmem>>, vector<1x196x256xbf16>
    %19 = vector.shape_cast %18 : vector<1x196x256xbf16> to vector<196x256xbf16>
    %cst_12 = arith.constant dense<0.000000e+00> : vector<2x256xf32>
    %20 = tpu.matmul %17, %19, %cst_12 {dimension_numbers = #tpu.dot_dimension_numbers<[1], [0], [0], [1], [0, 0, 1, 1], [], []>} : vector<2x196xbf16>, vector<196x256xbf16>, vector<2x256xf32> -> vector<2x256xf32>
    %21 = vector.extract_strided_slice %1 {offsets = [1, 0, 0], sizes = [1, 16, 1], strides = [1, 1, 1]} : vector<16x16x1xf32> to vector<1x16x1xf32>
    %22 = vector.shape_cast %21 : vector<1x16x1xf32> to vector<16x1xf32>
    %23 = vector.shape_cast %22 : vector<16x1xf32> to vector<1x16x1xf32>
    %24 = vector.broadcast %23 : vector<1x16x1xf32> to vector<2x16x196xf32>
    %25 = arith.mulf %0, %24 : vector<2x16x196xf32>
    %cst_13 = arith.constant dense<0.000000e+00> : vector<2x196xf32>
    %26 = vector.multi_reduction <add>, %25, %cst_13 [1] : vector<2x16x196xf32> to vector<2x196xf32>
    %27 = vector.extract_strided_slice %2 {offsets = [1, 0, 0], sizes = [1, 1, 1], strides = [1, 1, 1]} : vector<16x1x1xf32> to vector<1x1x1xf32>
    %28 = vector.shape_cast %27 : vector<1x1x1xf32> to vector<1x1xf32>
    %29 = vector.broadcast %28 : vector<1x1xf32> to vector<2x196xf32>
    %30 = arith.addf %26, %29 : vector<2x196xf32>
    %cst_14 = arith.constant 1.000000e+00 : f32
    %31 = vector.broadcast %cst_14 : f32 to vector<2x196xf32>
    %32 = arith.cmpf ogt, %30, %31 : vector<2x196xf32>
    %33 = arith.extui %32 : vector<2x196xi1> to vector<2x196xi32>
    %34 = arith.sitofp %33 : vector<2x196xi32> to vector<2x196xf32>
    %35 = arith.truncf %34 : vector<2x196xf32> to vector<2x196xbf16>
    %c1 = arith.constant 1 : index
    %c0_15 = arith.constant 0 : index
    %c0_16 = arith.constant 0 : index
    %36 = vector.load %arg4[%c1, %c0_15, %c0_16] : memref<16x196x256xbf16, #tpu.memory_space<vmem>>, vector<1x196x256xbf16>
    %37 = vector.shape_cast %36 : vector<1x196x256xbf16> to vector<196x256xbf16>
    %cst_17 = arith.constant dense<0.000000e+00> : vector<2x256xf32>
    %38 = tpu.matmul %35, %37, %cst_17 {dimension_numbers = #tpu.dot_dimension_numbers<[1], [0], [0], [1], [0, 0, 1, 1], [], []>} : vector<2x196xbf16>, vector<196x256xbf16>, vector<2x256xf32> -> vector<2x256xf32>
    %39 = arith.addf %20, %38 : vector<2x256xf32>
    %40 = vector.extract_strided_slice %1 {offsets = [2, 0, 0], sizes = [1, 16, 1], strides = [1, 1, 1]} : vector<16x16x1xf32> to vector<1x16x1xf32>
    %41 = vector.shape_cast %40 : vector<1x16x1xf32> to vector<16x1xf32>
    %42 = vector.shape_cast %41 : vector<16x1xf32> to vector<1x16x1xf32>
    %43 = vector.broadcast %42 : vector<1x16x1xf32> to vector<2x16x196xf32>
    %44 = arith.mulf %0, %43 : vector<2x16x196xf32>
    %cst_18 = arith.constant dense<0.000000e+00> : vector<2x196xf32>
    %45 = vector.multi_reduction <add>, %44, %cst_18 [1] : vector<2x16x196xf32> to vector<2x196xf32>
    %46 = vector.extract_strided_slice %2 {offsets = [2, 0, 0], sizes = [1, 1, 1], strides = [1, 1, 1]} : vector<16x1x1xf32> to vector<1x1x1xf32>
    %47 = vector.shape_cast %46 : vector<1x1x1xf32> to vector<1x1xf32>
    %48 = vector.broadcast %47 : vector<1x1xf32> to vector<2x196xf32>
    %49 = arith.addf %45, %48 : vector<2x196xf32>
    %cst_19 = arith.constant 1.000000e+00 : f32
    %50 = vector.broadcast %cst_19 : f32 to vector<2x196xf32>
    %51 = arith.cmpf ogt, %49, %50 : vector<2x196xf32>
    %52 = arith.extui %51 : vector<2x196xi1> to vector<2x196xi32>
    %53 = arith.sitofp %52 : vector<2x196xi32> to vector<2x196xf32>
    %54 = arith.truncf %53 : vector<2x196xf32> to vector<2x196xbf16>
    %c2 = arith.constant 2 : index
    %c0_20 = arith.constant 0 : index
    %c0_21 = arith.constant 0 : index
    %55 = vector.load %arg4[%c2, %c0_20, %c0_21] : memref<16x196x256xbf16, #tpu.memory_space<vmem>>, vector<1x196x256xbf16>
    %56 = vector.shape_cast %55 : vector<1x196x256xbf16> to vector<196x256xbf16>
    %cst_22 = arith.constant dense<0.000000e+00> : vector<2x256xf32>
    %57 = tpu.matmul %54, %56, %cst_22 {dimension_numbers = #tpu.dot_dimension_numbers<[1], [0], [0], [1], [0, 0, 1, 1], [], []>} : vector<2x196xbf16>, vector<196x256xbf16>, vector<2x256xf32> -> vector<2x256xf32>
    %58 = arith.addf %39, %57 : vector<2x256xf32>
    %59 = vector.extract_strided_slice %1 {offsets = [3, 0, 0], sizes = [1, 16, 1], strides = [1, 1, 1]} : vector<16x16x1xf32> to vector<1x16x1xf32>
    %60 = vector.shape_cast %59 : vector<1x16x1xf32> to vector<16x1xf32>
    %61 = vector.shape_cast %60 : vector<16x1xf32> to vector<1x16x1xf32>
    %62 = vector.broadcast %61 : vector<1x16x1xf32> to vector<2x16x196xf32>
    %63 = arith.mulf %0, %62 : vector<2x16x196xf32>
    %cst_23 = arith.constant dense<0.000000e+00> : vector<2x196xf32>
    %64 = vector.multi_reduction <add>, %63, %cst_23 [1] : vector<2x16x196xf32> to vector<2x196xf32>
    %65 = vector.extract_strided_slice %2 {offsets = [3, 0, 0], sizes = [1, 1, 1], strides = [1, 1, 1]} : vector<16x1x1xf32> to vector<1x1x1xf32>
    %66 = vector.shape_cast %65 : vector<1x1x1xf32> to vector<1x1xf32>
    %67 = vector.broadcast %66 : vector<1x1xf32> to vector<2x196xf32>
    %68 = arith.addf %64, %67 : vector<2x196xf32>
    %cst_24 = arith.constant 1.000000e+00 : f32
    %69 = vector.broadcast %cst_24 : f32 to vector<2x196xf32>
    %70 = arith.cmpf ogt, %68, %69 : vector<2x196xf32>
    %71 = arith.extui %70 : vector<2x196xi1> to vector<2x196xi32>
    %72 = arith.sitofp %71 : vector<2x196xi32> to vector<2x196xf32>
    %73 = arith.truncf %72 : vector<2x196xf32> to vector<2x196xbf16>
    %c3 = arith.constant 3 : index
    %c0_25 = arith.constant 0 : index
    %c0_26 = arith.constant 0 : index
    %74 = vector.load %arg4[%c3, %c0_25, %c0_26] : memref<16x196x256xbf16, #tpu.memory_space<vmem>>, vector<1x196x256xbf16>
    %75 = vector.shape_cast %74 : vector<1x196x256xbf16> to vector<196x256xbf16>
    %cst_27 = arith.constant dense<0.000000e+00> : vector<2x256xf32>
    %76 = tpu.matmul %73, %75, %cst_27 {dimension_numbers = #tpu.dot_dimension_numbers<[1], [0], [0], [1], [0, 0, 1, 1], [], []>} : vector<2x196xbf16>, vector<196x256xbf16>, vector<2x256xf32> -> vector<2x256xf32>
    %77 = arith.addf %58, %76 : vector<2x256xf32>
    %78 = vector.extract_strided_slice %1 {offsets = [4, 0, 0], sizes = [1, 16, 1], strides = [1, 1, 1]} : vector<16x16x1xf32> to vector<1x16x1xf32>
    %79 = vector.shape_cast %78 : vector<1x16x1xf32> to vector<16x1xf32>
    %80 = vector.shape_cast %79 : vector<16x1xf32> to vector<1x16x1xf32>
    %81 = vector.broadcast %80 : vector<1x16x1xf32> to vector<2x16x196xf32>
    %82 = arith.mulf %0, %81 : vector<2x16x196xf32>
    %cst_28 = arith.constant dense<0.000000e+00> : vector<2x196xf32>
    %83 = vector.multi_reduction <add>, %82, %cst_28 [1] : vector<2x16x196xf32> to vector<2x196xf32>
    %84 = vector.extract_strided_slice %2 {offsets = [4, 0, 0], sizes = [1, 1, 1], strides = [1, 1, 1]} : vector<16x1x1xf32> to vector<1x1x1xf32>
    %85 = vector.shape_cast %84 : vector<1x1x1xf32> to vector<1x1xf32>
    %86 = vector.broadcast %85 : vector<1x1xf32> to vector<2x196xf32>
    %87 = arith.addf %83, %86 : vector<2x196xf32>
    %cst_29 = arith.constant 1.000000e+00 : f32
    %88 = vector.broadcast %cst_29 : f32 to vector<2x196xf32>
    %89 = arith.cmpf ogt, %87, %88 : vector<2x196xf32>
    %90 = arith.extui %89 : vector<2x196xi1> to vector<2x196xi32>
    %91 = arith.sitofp %90 : vector<2x196xi32> to vector<2x196xf32>
    %92 = arith.truncf %91 : vector<2x196xf32> to vector<2x196xbf16>
    %c4 = arith.constant 4 : index
    %c0_30 = arith.constant 0 : index
    %c0_31 = arith.constant 0 : index
    %93 = vector.load %arg4[%c4, %c0_30, %c0_31] : memref<16x196x256xbf16, #tpu.memory_space<vmem>>, vector<1x196x256xbf16>
    %94 = vector.shape_cast %93 : vector<1x196x256xbf16> to vector<196x256xbf16>
    %cst_32 = arith.constant dense<0.000000e+00> : vector<2x256xf32>
    %95 = tpu.matmul %92, %94, %cst_32 {dimension_numbers = #tpu.dot_dimension_numbers<[1], [0], [0], [1], [0, 0, 1, 1], [], []>} : vector<2x196xbf16>, vector<196x256xbf16>, vector<2x256xf32> -> vector<2x256xf32>
    %96 = arith.addf %77, %95 : vector<2x256xf32>
    %97 = vector.extract_strided_slice %1 {offsets = [5, 0, 0], sizes = [1, 16, 1], strides = [1, 1, 1]} : vector<16x16x1xf32> to vector<1x16x1xf32>
    %98 = vector.shape_cast %97 : vector<1x16x1xf32> to vector<16x1xf32>
    %99 = vector.shape_cast %98 : vector<16x1xf32> to vector<1x16x1xf32>
    %100 = vector.broadcast %99 : vector<1x16x1xf32> to vector<2x16x196xf32>
    %101 = arith.mulf %0, %100 : vector<2x16x196xf32>
    %cst_33 = arith.constant dense<0.000000e+00> : vector<2x196xf32>
    %102 = vector.multi_reduction <add>, %101, %cst_33 [1] : vector<2x16x196xf32> to vector<2x196xf32>
    %103 = vector.extract_strided_slice %2 {offsets = [5, 0, 0], sizes = [1, 1, 1], strides = [1, 1, 1]} : vector<16x1x1xf32> to vector<1x1x1xf32>
    %104 = vector.shape_cast %103 : vector<1x1x1xf32> to vector<1x1xf32>
    %105 = vector.broadcast %104 : vector<1x1xf32> to vector<2x196xf32>
    %106 = arith.addf %102, %105 : vector<2x196xf32>
    %cst_34 = arith.constant 1.000000e+00 : f32
    %107 = vector.broadcast %cst_34 : f32 to vector<2x196xf32>
    %108 = arith.cmpf ogt, %106, %107 : vector<2x196xf32>
    %109 = arith.extui %108 : vector<2x196xi1> to vector<2x196xi32>
    %110 = arith.sitofp %109 : vector<2x196xi32> to vector<2x196xf32>
    %111 = arith.truncf %110 : vector<2x196xf32> to vector<2x196xbf16>
    %c5 = arith.constant 5 : index
    %c0_35 = arith.constant 0 : index
    %c0_36 = arith.constant 0 : index
    %112 = vector.load %arg4[%c5, %c0_35, %c0_36] : memref<16x196x256xbf16, #tpu.memory_space<vmem>>, vector<1x196x256xbf16>
    %113 = vector.shape_cast %112 : vector<1x196x256xbf16> to vector<196x256xbf16>
    %cst_37 = arith.constant dense<0.000000e+00> : vector<2x256xf32>
    %114 = tpu.matmul %111, %113, %cst_37 {dimension_numbers = #tpu.dot_dimension_numbers<[1], [0], [0], [1], [0, 0, 1, 1], [], []>} : vector<2x196xbf16>, vector<196x256xbf16>, vector<2x256xf32> -> vector<2x256xf32>
    %115 = arith.addf %96, %114 : vector<2x256xf32>
    %116 = vector.extract_strided_slice %1 {offsets = [6, 0, 0], sizes = [1, 16, 1], strides = [1, 1, 1]} : vector<16x16x1xf32> to vector<1x16x1xf32>
    %117 = vector.shape_cast %116 : vector<1x16x1xf32> to vector<16x1xf32>
    %118 = vector.shape_cast %117 : vector<16x1xf32> to vector<1x16x1xf32>
    %119 = vector.broadcast %118 : vector<1x16x1xf32> to vector<2x16x196xf32>
    %120 = arith.mulf %0, %119 : vector<2x16x196xf32>
    %cst_38 = arith.constant dense<0.000000e+00> : vector<2x196xf32>
    %121 = vector.multi_reduction <add>, %120, %cst_38 [1] : vector<2x16x196xf32> to vector<2x196xf32>
    %122 = vector.extract_strided_slice %2 {offsets = [6, 0, 0], sizes = [1, 1, 1], strides = [1, 1, 1]} : vector<16x1x1xf32> to vector<1x1x1xf32>
    %123 = vector.shape_cast %122 : vector<1x1x1xf32> to vector<1x1xf32>
    %124 = vector.broadcast %123 : vector<1x1xf32> to vector<2x196xf32>
    %125 = arith.addf %121, %124 : vector<2x196xf32>
    %cst_39 = arith.constant 1.000000e+00 : f32
    %126 = vector.broadcast %cst_39 : f32 to vector<2x196xf32>
    %127 = arith.cmpf ogt, %125, %126 : vector<2x196xf32>
    %128 = arith.extui %127 : vector<2x196xi1> to vector<2x196xi32>
    %129 = arith.sitofp %128 : vector<2x196xi32> to vector<2x196xf32>
    %130 = arith.truncf %129 : vector<2x196xf32> to vector<2x196xbf16>
    %c6 = arith.constant 6 : index
    %c0_40 = arith.constant 0 : index
    %c0_41 = arith.constant 0 : index
    %131 = vector.load %arg4[%c6, %c0_40, %c0_41] : memref<16x196x256xbf16, #tpu.memory_space<vmem>>, vector<1x196x256xbf16>
    %132 = vector.shape_cast %131 : vector<1x196x256xbf16> to vector<196x256xbf16>
    %cst_42 = arith.constant dense<0.000000e+00> : vector<2x256xf32>
    %133 = tpu.matmul %130, %132, %cst_42 {dimension_numbers = #tpu.dot_dimension_numbers<[1], [0], [0], [1], [0, 0, 1, 1], [], []>} : vector<2x196xbf16>, vector<196x256xbf16>, vector<2x256xf32> -> vector<2x256xf32>
    %134 = arith.addf %115, %133 : vector<2x256xf32>
    %135 = vector.extract_strided_slice %1 {offsets = [7, 0, 0], sizes = [1, 16, 1], strides = [1, 1, 1]} : vector<16x16x1xf32> to vector<1x16x1xf32>
    %136 = vector.shape_cast %135 : vector<1x16x1xf32> to vector<16x1xf32>
    %137 = vector.shape_cast %136 : vector<16x1xf32> to vector<1x16x1xf32>
    %138 = vector.broadcast %137 : vector<1x16x1xf32> to vector<2x16x196xf32>
    %139 = arith.mulf %0, %138 : vector<2x16x196xf32>
    %cst_43 = arith.constant dense<0.000000e+00> : vector<2x196xf32>
    %140 = vector.multi_reduction <add>, %139, %cst_43 [1] : vector<2x16x196xf32> to vector<2x196xf32>
    %141 = vector.extract_strided_slice %2 {offsets = [7, 0, 0], sizes = [1, 1, 1], strides = [1, 1, 1]} : vector<16x1x1xf32> to vector<1x1x1xf32>
    %142 = vector.shape_cast %141 : vector<1x1x1xf32> to vector<1x1xf32>
    %143 = vector.broadcast %142 : vector<1x1xf32> to vector<2x196xf32>
    %144 = arith.addf %140, %143 : vector<2x196xf32>
    %cst_44 = arith.constant 1.000000e+00 : f32
    %145 = vector.broadcast %cst_44 : f32 to vector<2x196xf32>
    %146 = arith.cmpf ogt, %144, %145 : vector<2x196xf32>
    %147 = arith.extui %146 : vector<2x196xi1> to vector<2x196xi32>
    %148 = arith.sitofp %147 : vector<2x196xi32> to vector<2x196xf32>
    %149 = arith.truncf %148 : vector<2x196xf32> to vector<2x196xbf16>
    %c7 = arith.constant 7 : index
    %c0_45 = arith.constant 0 : index
    %c0_46 = arith.constant 0 : index
    %150 = vector.load %arg4[%c7, %c0_45, %c0_46] : memref<16x196x256xbf16, #tpu.memory_space<vmem>>, vector<1x196x256xbf16>
    %151 = vector.shape_cast %150 : vector<1x196x256xbf16> to vector<196x256xbf16>
    %cst_47 = arith.constant dense<0.000000e+00> : vector<2x256xf32>
    %152 = tpu.matmul %149, %151, %cst_47 {dimension_numbers = #tpu.dot_dimension_numbers<[1], [0], [0], [1], [0, 0, 1, 1], [], []>} : vector<2x196xbf16>, vector<196x256xbf16>, vector<2x256xf32> -> vector<2x256xf32>
    %153 = arith.addf %134, %152 : vector<2x256xf32>
    %154 = vector.extract_strided_slice %1 {offsets = [8, 0, 0], sizes = [1, 16, 1], strides = [1, 1, 1]} : vector<16x16x1xf32> to vector<1x16x1xf32>
    %155 = vector.shape_cast %154 : vector<1x16x1xf32> to vector<16x1xf32>
    %156 = vector.shape_cast %155 : vector<16x1xf32> to vector<1x16x1xf32>
    %157 = vector.broadcast %156 : vector<1x16x1xf32> to vector<2x16x196xf32>
    %158 = arith.mulf %0, %157 : vector<2x16x196xf32>
    %cst_48 = arith.constant dense<0.000000e+00> : vector<2x196xf32>
    %159 = vector.multi_reduction <add>, %158, %cst_48 [1] : vector<2x16x196xf32> to vector<2x196xf32>
    %160 = vector.extract_strided_slice %2 {offsets = [8, 0, 0], sizes = [1, 1, 1], strides = [1, 1, 1]} : vector<16x1x1xf32> to vector<1x1x1xf32>
    %161 = vector.shape_cast %160 : vector<1x1x1xf32> to vector<1x1xf32>
    %162 = vector.broadcast %161 : vector<1x1xf32> to vector<2x196xf32>
    %163 = arith.addf %159, %162 : vector<2x196xf32>
    %cst_49 = arith.constant 1.000000e+00 : f32
    %164 = vector.broadcast %cst_49 : f32 to vector<2x196xf32>
    %165 = arith.cmpf ogt, %163, %164 : vector<2x196xf32>
    %166 = arith.extui %165 : vector<2x196xi1> to vector<2x196xi32>
    %167 = arith.sitofp %166 : vector<2x196xi32> to vector<2x196xf32>
    %168 = arith.truncf %167 : vector<2x196xf32> to vector<2x196xbf16>
    %c8 = arith.constant 8 : index
    %c0_50 = arith.constant 0 : index
    %c0_51 = arith.constant 0 : index
    %169 = vector.load %arg4[%c8, %c0_50, %c0_51] : memref<16x196x256xbf16, #tpu.memory_space<vmem>>, vector<1x196x256xbf16>
    %170 = vector.shape_cast %169 : vector<1x196x256xbf16> to vector<196x256xbf16>
    %cst_52 = arith.constant dense<0.000000e+00> : vector<2x256xf32>
    %171 = tpu.matmul %168, %170, %cst_52 {dimension_numbers = #tpu.dot_dimension_numbers<[1], [0], [0], [1], [0, 0, 1, 1], [], []>} : vector<2x196xbf16>, vector<196x256xbf16>, vector<2x256xf32> -> vector<2x256xf32>
    %172 = arith.addf %153, %171 : vector<2x256xf32>
    %173 = vector.extract_strided_slice %1 {offsets = [9, 0, 0], sizes = [1, 16, 1], strides = [1, 1, 1]} : vector<16x16x1xf32> to vector<1x16x1xf32>
    %174 = vector.shape_cast %173 : vector<1x16x1xf32> to vector<16x1xf32>
    %175 = vector.shape_cast %174 : vector<16x1xf32> to vector<1x16x1xf32>
    %176 = vector.broadcast %175 : vector<1x16x1xf32> to vector<2x16x196xf32>
    %177 = arith.mulf %0, %176 : vector<2x16x196xf32>
    %cst_53 = arith.constant dense<0.000000e+00> : vector<2x196xf32>
    %178 = vector.multi_reduction <add>, %177, %cst_53 [1] : vector<2x16x196xf32> to vector<2x196xf32>
    %179 = vector.extract_strided_slice %2 {offsets = [9, 0, 0], sizes = [1, 1, 1], strides = [1, 1, 1]} : vector<16x1x1xf32> to vector<1x1x1xf32>
    %180 = vector.shape_cast %179 : vector<1x1x1xf32> to vector<1x1xf32>
    %181 = vector.broadcast %180 : vector<1x1xf32> to vector<2x196xf32>
    %182 = arith.addf %178, %181 : vector<2x196xf32>
    %cst_54 = arith.constant 1.000000e+00 : f32
    %183 = vector.broadcast %cst_54 : f32 to vector<2x196xf32>
    %184 = arith.cmpf ogt, %182, %183 : vector<2x196xf32>
    %185 = arith.extui %184 : vector<2x196xi1> to vector<2x196xi32>
    %186 = arith.sitofp %185 : vector<2x196xi32> to vector<2x196xf32>
    %187 = arith.truncf %186 : vector<2x196xf32> to vector<2x196xbf16>
    %c9 = arith.constant 9 : index
    %c0_55 = arith.constant 0 : index
    %c0_56 = arith.constant 0 : index
    %188 = vector.load %arg4[%c9, %c0_55, %c0_56] : memref<16x196x256xbf16, #tpu.memory_space<vmem>>, vector<1x196x256xbf16>
    %189 = vector.shape_cast %188 : vector<1x196x256xbf16> to vector<196x256xbf16>
    %cst_57 = arith.constant dense<0.000000e+00> : vector<2x256xf32>
    %190 = tpu.matmul %187, %189, %cst_57 {dimension_numbers = #tpu.dot_dimension_numbers<[1], [0], [0], [1], [0, 0, 1, 1], [], []>} : vector<2x196xbf16>, vector<196x256xbf16>, vector<2x256xf32> -> vector<2x256xf32>
    %191 = arith.addf %172, %190 : vector<2x256xf32>
    %192 = vector.extract_strided_slice %1 {offsets = [10, 0, 0], sizes = [1, 16, 1], strides = [1, 1, 1]} : vector<16x16x1xf32> to vector<1x16x1xf32>
    %193 = vector.shape_cast %192 : vector<1x16x1xf32> to vector<16x1xf32>
    %194 = vector.shape_cast %193 : vector<16x1xf32> to vector<1x16x1xf32>
    %195 = vector.broadcast %194 : vector<1x16x1xf32> to vector<2x16x196xf32>
    %196 = arith.mulf %0, %195 : vector<2x16x196xf32>
    %cst_58 = arith.constant dense<0.000000e+00> : vector<2x196xf32>
    %197 = vector.multi_reduction <add>, %196, %cst_58 [1] : vector<2x16x196xf32> to vector<2x196xf32>
    %198 = vector.extract_strided_slice %2 {offsets = [10, 0, 0], sizes = [1, 1, 1], strides = [1, 1, 1]} : vector<16x1x1xf32> to vector<1x1x1xf32>
    %199 = vector.shape_cast %198 : vector<1x1x1xf32> to vector<1x1xf32>
    %200 = vector.broadcast %199 : vector<1x1xf32> to vector<2x196xf32>
    %201 = arith.addf %197, %200 : vector<2x196xf32>
    %cst_59 = arith.constant 1.000000e+00 : f32
    %202 = vector.broadcast %cst_59 : f32 to vector<2x196xf32>
    %203 = arith.cmpf ogt, %201, %202 : vector<2x196xf32>
    %204 = arith.extui %203 : vector<2x196xi1> to vector<2x196xi32>
    %205 = arith.sitofp %204 : vector<2x196xi32> to vector<2x196xf32>
    %206 = arith.truncf %205 : vector<2x196xf32> to vector<2x196xbf16>
    %c10 = arith.constant 10 : index
    %c0_60 = arith.constant 0 : index
    %c0_61 = arith.constant 0 : index
    %207 = vector.load %arg4[%c10, %c0_60, %c0_61] : memref<16x196x256xbf16, #tpu.memory_space<vmem>>, vector<1x196x256xbf16>
    %208 = vector.shape_cast %207 : vector<1x196x256xbf16> to vector<196x256xbf16>
    %cst_62 = arith.constant dense<0.000000e+00> : vector<2x256xf32>
    %209 = tpu.matmul %206, %208, %cst_62 {dimension_numbers = #tpu.dot_dimension_numbers<[1], [0], [0], [1], [0, 0, 1, 1], [], []>} : vector<2x196xbf16>, vector<196x256xbf16>, vector<2x256xf32> -> vector<2x256xf32>
    %210 = arith.addf %191, %209 : vector<2x256xf32>
    %211 = vector.extract_strided_slice %1 {offsets = [11, 0, 0], sizes = [1, 16, 1], strides = [1, 1, 1]} : vector<16x16x1xf32> to vector<1x16x1xf32>
    %212 = vector.shape_cast %211 : vector<1x16x1xf32> to vector<16x1xf32>
    %213 = vector.shape_cast %212 : vector<16x1xf32> to vector<1x16x1xf32>
    %214 = vector.broadcast %213 : vector<1x16x1xf32> to vector<2x16x196xf32>
    %215 = arith.mulf %0, %214 : vector<2x16x196xf32>
    %cst_63 = arith.constant dense<0.000000e+00> : vector<2x196xf32>
    %216 = vector.multi_reduction <add>, %215, %cst_63 [1] : vector<2x16x196xf32> to vector<2x196xf32>
    %217 = vector.extract_strided_slice %2 {offsets = [11, 0, 0], sizes = [1, 1, 1], strides = [1, 1, 1]} : vector<16x1x1xf32> to vector<1x1x1xf32>
    %218 = vector.shape_cast %217 : vector<1x1x1xf32> to vector<1x1xf32>
    %219 = vector.broadcast %218 : vector<1x1xf32> to vector<2x196xf32>
    %220 = arith.addf %216, %219 : vector<2x196xf32>
    %cst_64 = arith.constant 1.000000e+00 : f32
    %221 = vector.broadcast %cst_64 : f32 to vector<2x196xf32>
    %222 = arith.cmpf ogt, %220, %221 : vector<2x196xf32>
    %223 = arith.extui %222 : vector<2x196xi1> to vector<2x196xi32>
    %224 = arith.sitofp %223 : vector<2x196xi32> to vector<2x196xf32>
    %225 = arith.truncf %224 : vector<2x196xf32> to vector<2x196xbf16>
    %c11 = arith.constant 11 : index
    %c0_65 = arith.constant 0 : index
    %c0_66 = arith.constant 0 : index
    %226 = vector.load %arg4[%c11, %c0_65, %c0_66] : memref<16x196x256xbf16, #tpu.memory_space<vmem>>, vector<1x196x256xbf16>
    %227 = vector.shape_cast %226 : vector<1x196x256xbf16> to vector<196x256xbf16>
    %cst_67 = arith.constant dense<0.000000e+00> : vector<2x256xf32>
    %228 = tpu.matmul %225, %227, %cst_67 {dimension_numbers = #tpu.dot_dimension_numbers<[1], [0], [0], [1], [0, 0, 1, 1], [], []>} : vector<2x196xbf16>, vector<196x256xbf16>, vector<2x256xf32> -> vector<2x256xf32>
    %229 = arith.addf %210, %228 : vector<2x256xf32>
    %230 = vector.extract_strided_slice %1 {offsets = [12, 0, 0], sizes = [1, 16, 1], strides = [1, 1, 1]} : vector<16x16x1xf32> to vector<1x16x1xf32>
    %231 = vector.shape_cast %230 : vector<1x16x1xf32> to vector<16x1xf32>
    %232 = vector.shape_cast %231 : vector<16x1xf32> to vector<1x16x1xf32>
    %233 = vector.broadcast %232 : vector<1x16x1xf32> to vector<2x16x196xf32>
    %234 = arith.mulf %0, %233 : vector<2x16x196xf32>
    %cst_68 = arith.constant dense<0.000000e+00> : vector<2x196xf32>
    %235 = vector.multi_reduction <add>, %234, %cst_68 [1] : vector<2x16x196xf32> to vector<2x196xf32>
    %236 = vector.extract_strided_slice %2 {offsets = [12, 0, 0], sizes = [1, 1, 1], strides = [1, 1, 1]} : vector<16x1x1xf32> to vector<1x1x1xf32>
    %237 = vector.shape_cast %236 : vector<1x1x1xf32> to vector<1x1xf32>
    %238 = vector.broadcast %237 : vector<1x1xf32> to vector<2x196xf32>
    %239 = arith.addf %235, %238 : vector<2x196xf32>
    %cst_69 = arith.constant 1.000000e+00 : f32
    %240 = vector.broadcast %cst_69 : f32 to vector<2x196xf32>
    %241 = arith.cmpf ogt, %239, %240 : vector<2x196xf32>
    %242 = arith.extui %241 : vector<2x196xi1> to vector<2x196xi32>
    %243 = arith.sitofp %242 : vector<2x196xi32> to vector<2x196xf32>
    %244 = arith.truncf %243 : vector<2x196xf32> to vector<2x196xbf16>
    %c12 = arith.constant 12 : index
    %c0_70 = arith.constant 0 : index
    %c0_71 = arith.constant 0 : index
    %245 = vector.load %arg4[%c12, %c0_70, %c0_71] : memref<16x196x256xbf16, #tpu.memory_space<vmem>>, vector<1x196x256xbf16>
    %246 = vector.shape_cast %245 : vector<1x196x256xbf16> to vector<196x256xbf16>
    %cst_72 = arith.constant dense<0.000000e+00> : vector<2x256xf32>
    %247 = tpu.matmul %244, %246, %cst_72 {dimension_numbers = #tpu.dot_dimension_numbers<[1], [0], [0], [1], [0, 0, 1, 1], [], []>} : vector<2x196xbf16>, vector<196x256xbf16>, vector<2x256xf32> -> vector<2x256xf32>
    %248 = arith.addf %229, %247 : vector<2x256xf32>
    %249 = vector.extract_strided_slice %1 {offsets = [13, 0, 0], sizes = [1, 16, 1], strides = [1, 1, 1]} : vector<16x16x1xf32> to vector<1x16x1xf32>
    %250 = vector.shape_cast %249 : vector<1x16x1xf32> to vector<16x1xf32>
    %251 = vector.shape_cast %250 : vector<16x1xf32> to vector<1x16x1xf32>
    %252 = vector.broadcast %251 : vector<1x16x1xf32> to vector<2x16x196xf32>
    %253 = arith.mulf %0, %252 : vector<2x16x196xf32>
    %cst_73 = arith.constant dense<0.000000e+00> : vector<2x196xf32>
    %254 = vector.multi_reduction <add>, %253, %cst_73 [1] : vector<2x16x196xf32> to vector<2x196xf32>
    %255 = vector.extract_strided_slice %2 {offsets = [13, 0, 0], sizes = [1, 1, 1], strides = [1, 1, 1]} : vector<16x1x1xf32> to vector<1x1x1xf32>
    %256 = vector.shape_cast %255 : vector<1x1x1xf32> to vector<1x1xf32>
    %257 = vector.broadcast %256 : vector<1x1xf32> to vector<2x196xf32>
    %258 = arith.addf %254, %257 : vector<2x196xf32>
    %cst_74 = arith.constant 1.000000e+00 : f32
    %259 = vector.broadcast %cst_74 : f32 to vector<2x196xf32>
    %260 = arith.cmpf ogt, %258, %259 : vector<2x196xf32>
    %261 = arith.extui %260 : vector<2x196xi1> to vector<2x196xi32>
    %262 = arith.sitofp %261 : vector<2x196xi32> to vector<2x196xf32>
    %263 = arith.truncf %262 : vector<2x196xf32> to vector<2x196xbf16>
    %c13 = arith.constant 13 : index
    %c0_75 = arith.constant 0 : index
    %c0_76 = arith.constant 0 : index
    %264 = vector.load %arg4[%c13, %c0_75, %c0_76] : memref<16x196x256xbf16, #tpu.memory_space<vmem>>, vector<1x196x256xbf16>
    %265 = vector.shape_cast %264 : vector<1x196x256xbf16> to vector<196x256xbf16>
    %cst_77 = arith.constant dense<0.000000e+00> : vector<2x256xf32>
    %266 = tpu.matmul %263, %265, %cst_77 {dimension_numbers = #tpu.dot_dimension_numbers<[1], [0], [0], [1], [0, 0, 1, 1], [], []>} : vector<2x196xbf16>, vector<196x256xbf16>, vector<2x256xf32> -> vector<2x256xf32>
    %267 = arith.addf %248, %266 : vector<2x256xf32>
    %268 = vector.extract_strided_slice %1 {offsets = [14, 0, 0], sizes = [1, 16, 1], strides = [1, 1, 1]} : vector<16x16x1xf32> to vector<1x16x1xf32>
    %269 = vector.shape_cast %268 : vector<1x16x1xf32> to vector<16x1xf32>
    %270 = vector.shape_cast %269 : vector<16x1xf32> to vector<1x16x1xf32>
    %271 = vector.broadcast %270 : vector<1x16x1xf32> to vector<2x16x196xf32>
    %272 = arith.mulf %0, %271 : vector<2x16x196xf32>
    %cst_78 = arith.constant dense<0.000000e+00> : vector<2x196xf32>
    %273 = vector.multi_reduction <add>, %272, %cst_78 [1] : vector<2x16x196xf32> to vector<2x196xf32>
    %274 = vector.extract_strided_slice %2 {offsets = [14, 0, 0], sizes = [1, 1, 1], strides = [1, 1, 1]} : vector<16x1x1xf32> to vector<1x1x1xf32>
    %275 = vector.shape_cast %274 : vector<1x1x1xf32> to vector<1x1xf32>
    %276 = vector.broadcast %275 : vector<1x1xf32> to vector<2x196xf32>
    %277 = arith.addf %273, %276 : vector<2x196xf32>
    %cst_79 = arith.constant 1.000000e+00 : f32
    %278 = vector.broadcast %cst_79 : f32 to vector<2x196xf32>
    %279 = arith.cmpf ogt, %277, %278 : vector<2x196xf32>
    %280 = arith.extui %279 : vector<2x196xi1> to vector<2x196xi32>
    %281 = arith.sitofp %280 : vector<2x196xi32> to vector<2x196xf32>
    %282 = arith.truncf %281 : vector<2x196xf32> to vector<2x196xbf16>
    %c14 = arith.constant 14 : index
    %c0_80 = arith.constant 0 : index
    %c0_81 = arith.constant 0 : index
    %283 = vector.load %arg4[%c14, %c0_80, %c0_81] : memref<16x196x256xbf16, #tpu.memory_space<vmem>>, vector<1x196x256xbf16>
    %284 = vector.shape_cast %283 : vector<1x196x256xbf16> to vector<196x256xbf16>
    %cst_82 = arith.constant dense<0.000000e+00> : vector<2x256xf32>
    %285 = tpu.matmul %282, %284, %cst_82 {dimension_numbers = #tpu.dot_dimension_numbers<[1], [0], [0], [1], [0, 0, 1, 1], [], []>} : vector<2x196xbf16>, vector<196x256xbf16>, vector<2x256xf32> -> vector<2x256xf32>
    %286 = arith.addf %267, %285 : vector<2x256xf32>
    %287 = vector.extract_strided_slice %1 {offsets = [15, 0, 0], sizes = [1, 16, 1], strides = [1, 1, 1]} : vector<16x16x1xf32> to vector<1x16x1xf32>
    %288 = vector.shape_cast %287 : vector<1x16x1xf32> to vector<16x1xf32>
    %289 = vector.shape_cast %288 : vector<16x1xf32> to vector<1x16x1xf32>
    %290 = vector.broadcast %289 : vector<1x16x1xf32> to vector<2x16x196xf32>
    %291 = arith.mulf %0, %290 : vector<2x16x196xf32>
    %cst_83 = arith.constant dense<0.000000e+00> : vector<2x196xf32>
    %292 = vector.multi_reduction <add>, %291, %cst_83 [1] : vector<2x16x196xf32> to vector<2x196xf32>
    %293 = vector.extract_strided_slice %2 {offsets = [15, 0, 0], sizes = [1, 1, 1], strides = [1, 1, 1]} : vector<16x1x1xf32> to vector<1x1x1xf32>
    %294 = vector.shape_cast %293 : vector<1x1x1xf32> to vector<1x1xf32>
    %295 = vector.broadcast %294 : vector<1x1xf32> to vector<2x196xf32>
    %296 = arith.addf %292, %295 : vector<2x196xf32>
    %cst_84 = arith.constant 1.000000e+00 : f32
    %297 = vector.broadcast %cst_84 : f32 to vector<2x196xf32>
    %298 = arith.cmpf ogt, %296, %297 : vector<2x196xf32>
    %299 = arith.extui %298 : vector<2x196xi1> to vector<2x196xi32>
    %300 = arith.sitofp %299 : vector<2x196xi32> to vector<2x196xf32>
    %301 = arith.truncf %300 : vector<2x196xf32> to vector<2x196xbf16>
    %c15 = arith.constant 15 : index
    %c0_85 = arith.constant 0 : index
    %c0_86 = arith.constant 0 : index
    %302 = vector.load %arg4[%c15, %c0_85, %c0_86] : memref<16x196x256xbf16, #tpu.memory_space<vmem>>, vector<1x196x256xbf16>
    %303 = vector.shape_cast %302 : vector<1x196x256xbf16> to vector<196x256xbf16>
    %cst_87 = arith.constant dense<0.000000e+00> : vector<2x256xf32>
    %304 = tpu.matmul %301, %303, %cst_87 {dimension_numbers = #tpu.dot_dimension_numbers<[1], [0], [0], [1], [0, 0, 1, 1], [], []>} : vector<2x196xbf16>, vector<196x256xbf16>, vector<2x256xf32> -> vector<2x256xf32>
    %305 = arith.addf %286, %304 : vector<2x256xf32>
    %c0_88 = arith.constant 0 : index
    %c0_89 = arith.constant 0 : index
    %306 = vector.load %arg5[%c0_88, %c0_89] : memref<1x256xf32, #tpu.memory_space<vmem>>, vector<1x256xf32>
    %307 = vector.broadcast %306 : vector<1x256xf32> to vector<2x256xf32>
    %308 = arith.addf %305, %307 : vector<2x256xf32>
    %c0_90 = arith.constant 0 : index
    %c0_91 = arith.constant 0 : index
    %309 = vector.load %arg7[%c0_90, %c0_91] : memref<2x256xf32, #tpu.memory_space<vmem>>, vector<2x256xf32>
    tpu.vector_store %arg7[%c0_90, %c0_91], %308 {strides = array<i32>} : memref<2x256xf32, #tpu.memory_space<vmem>>, vector<2x256xf32>,
    %cst_92 = arith.constant 1.000000e+00 : f32
    %310 = vector.broadcast %cst_92 : f32 to vector<2x256xf32>
    %311 = arith.cmpf ogt, %308, %310 : vector<2x256xf32>
    %312 = arith.extui %311 : vector<2x256xi1> to vector<2x256xi32>
    %313 = arith.sitofp %312 : vector<2x256xi32> to vector<2x256xf32>
    %c0_93 = arith.constant 0 : index
    %c0_94 = arith.constant 0 : index
    %314 = vector.load %arg6[%c0_93, %c0_94] : memref<2x256xf32, #tpu.memory_space<vmem>>, vector<2x256xf32>
    tpu.vector_store %arg6[%c0_93, %c0_94], %313 {strides = array<i32>} : memref<2x256xf32, #tpu.memory_space<vmem>>, vector<2x256xf32>,
    return
  }
  func.func @transform_0(%arg0: i32) -> (i32, i32, i32) {
    %c0_i32 = arith.constant 0 : i32
    %c0_i32_0 = arith.constant 0 : i32
    %c0_i32_1 = arith.constant 0 : i32
    %c0_i32_2 = arith.constant 0 : i32
    return %c0_i32, %c0_i32_0, %c0_i32_1 : i32, i32, i32
  }
  func.func @transform_1(%arg0: i32) -> (i32, i32, i32) {
    %c0_i32 = arith.constant 0 : i32
    %c0_i32_0 = arith.constant 0 : i32
    %c0_i32_1 = arith.constant 0 : i32
    %c0_i32_2 = arith.constant 0 : i32
    return %c0_i32, %c0_i32_0, %c0_i32_1 : i32, i32, i32
  }
  func.func @transform_2(%arg0: i32) -> (i32, i32, i32) {
    %c0_i32 = arith.constant 0 : i32
    %c0_i32_0 = arith.constant 0 : i32
    %c0_i32_1 = arith.constant 0 : i32
    %c0_i32_2 = arith.constant 0 : i32
    return %c0_i32, %c0_i32_0, %c0_i32_1 : i32, i32, i32
  }
  func.func @transform_3(%arg0: i32) -> (i32, i32, i32) {
    %c0_i32 = arith.constant 0 : i32
    %c0_i32_0 = arith.constant 0 : i32
    %c0_i32_1 = arith.constant 0 : i32
    return %c0_i32, %c0_i32_0, %arg0 : i32, i32, i32
  }
  func.func @transform_4(%arg0: i32) -> (i32, i32) {
    %c0_i32 = arith.constant 0 : i32
    %c0_i32_0 = arith.constant 0 : i32
    return %c0_i32, %arg0 : i32, i32
  }
  func.func @transform_5(%arg0: i32) -> (i32, i32) {
    %c0_i32 = arith.constant 0 : i32
    %c0_i32_0 = arith.constant 0 : i32
    return %c0_i32, %arg0 : i32, i32
  }
  func.func @transform_6(%arg0: i32) -> (i32, i32) {
    %c0_i32 = arith.constant 0 : i32
    %c0_i32_0 = arith.constant 0 : i32
    return %c0_i32, %arg0 : i32, i32
  }
}

</mosaic_0001>

<bundles_post_ra>
// kernel: net_with_avg_pool_forward.1
= control target key start
LH: loop header
LB: loop body
LE: loop exit
PB: predicated region body
PF: predicated region fallthrough
CT: control target
= control target key end

     0   :  { %12 = vsyncpa [#allocation4], 0  ;;  %s10890_s0 = inlined_call_operand.vmem [shape: f32[2,16,196], index: 0, kind: input, shape index: {}]   ;;  %s10891_s1 = inlined_call_operand.vmem [shape: f32[16,16,1], index: 1, kind: input, shape index: {}]   ;;  %s10892_s2 = inlined_call_operand.vmem [shape: f32[16,1,1], index: 2, kind: input, shape index: {}]   ;;  %s10893_s3 = inlined_call_operand.vmem [shape: bf16[16,196,512], index: 3, kind: input, shape index: {}]   ;;  %s10894_s4 = inlined_call_operand.vmem [shape: f32[1,512], index: 4, kind: input, shape index: {}]   ;;  %s10895_s5 = inlined_call_operand.hbm [shape: f32[2,512], index: 5, kind: output, shape index: {0}]   ;;  %s10896_s6 = inlined_call_operand.hbm [shape: f32[2,512], index: 6, kind: output, shape index: {1}]  }
   0x1   :  { %14 = vsyncpa [#allocation4 + $0x1], 0 }
   0x2   :  { %15 = vsyncpa [#allocation6], 0 }
   0x3   :  { %17 = vsyncpa [#allocation6 + $0x1], 0  ;;  %s8610_s21 = smov 0   ;;  %s8612_s22 = smov 0  }
   0x4   :  { %s8614_s23 = smov 0   ;;  %s8616_s24 = smov 0  }
   0x5 LB: > { %s8631_s25 = sadd.s32 4294967295, %s8569_s24   ;;  %s6874_s26 = sadd.s32 4294967294, %s8569_s24   ;;  %s8569_s24 = sphi %s8616_s24, %s10902_s24   ;;  %s8565_s23 = sphi %s8614_s23, %s10901_s23   ;;  %s8561_s22 = sphi %s8612_s22, %s10900_s22   ;;  %s8557_s21 = sphi %s8610_s21, %s10899_s21  }
   0x6   : > { %s8635_s27 = sadd.s32 1, %s8569_s24   ;;  %s93_s28 = sadd.s32 1, %s8565_s23 }
   0x7   : > { %s90_s29 = ssub.s32 %s8569_s24, %s8635_s27  ;;  %p100_p0 = scmp.ne.s32.totalorder %s8565_s23, %s8561_s22 }
   0x8   : > { %p91_p1 = scmp.eq.s32.totalorder %s90_s29, 0  ;;  %p101_p2 = scmp.eq.s32.totalorder %s8569_s24, 0 }
   0x9   : > { %p156_p3 = scmp.eq.s32.totalorder %s8631_s25, 1  ;;  %p161_p4 = scmp.ne.s32.totalorder %s8561_s22, %s8557_s21 }
   0xa   : > { %s8647_s30 = scalar_select %p91_p1, %s8565_s23, %s93_s28  }
   0xb   : > { %p102_p5 = por %p101_p2, %p100_p0  ;;  %p8649_p6 = por %p156_p3, %p100_p0 }
   0xc   : > { %p162_p7 = scmp.eq.s32.totalorder %s6874_s26, 1  ;;  %p6876_p9 = scmp.ge.s32.totalorder %s8569_s24, 2 }
   0xe   : > { %p8653_p8 = por %p162_p7, %p161_p4  ;;  %213 = sbr.rel (%p6876_p9) target bundleno = 223 (0xdf), region = 28 }
  0x13   : > { %216 = sbr.rel (!%p102_p5) target bundleno = 223 (0xdf), region = 32  ;;  %s218_s9 = sand.u32 (%p102_p5), 1, %s8565_s23  }
  0x14   : > { %s7798_s10 = sshll.u32 (%p102_p5), %s8569_s24, 3  ;;  %s7801_s11 = smul.u32 (%p102_p5), 3200, %s218_s9 }
  0x15   : > { %s8665_s14 = scalar_lea.vmem (%p102_p5), %s10893_s3, %s7798_s10 }
  0x16   : > { %v1050_v0 = vld [vmem:[%s8665_s14] sm:$0xff] (%p102_p5)  ;;  %v1052_v1 = vld [vmem:[%s8665_s14 + $0x10] sm:$0xff] (%p102_p5)  ;;  %s8673_s15 = scalar_lea.vmem (%p102_p5), [#allocation2], %s7801_s11 }
  0x17   : > { %v1054_v2 = vld [vmem:[%s8665_s14 + $0x20] sm:$0xff] (%p102_p5)  ;;  %v1056_v3 = vld [vmem:[%s8665_s14 + $0x30] sm:$0xff] (%p102_p5)  ;;  %1051 = vst [vmem:[%s8673_s15] sm:$0xff] (%p102_p5), %v1050_v0  ;;  %1053 = vst [vmem:[%s8673_s15 + $0x8] sm:$0xff] (%p102_p5), %v1052_v1 }
  0x18   : > { %v1058_v4 = vld [vmem:[%s8665_s14 + $0x40] sm:$0xff]  ;;  %v1060_v5 = vld [vmem:[%s8665_s14 + $0x50] sm:$0xff]  ;;  %1055 = vst [vmem:[%s8673_s15 + $0x10] sm:$0xff] %v1054_v2  ;;  %1057 = vst [vmem:[%s8673_s15 + $0x18] sm:$0xff] %v1056_v3 }
  0x19   : > { %1059 = vst [vmem:[%s8673_s15 + $0x20] sm:$0xff] %v1058_v4  ;;  %1061 = vst [vmem:[%s8673_s15 + $0x28] sm:$0xff] %v1060_v5  ;;  %v1062_v6 = vld [vmem:[%s8665_s14 + $0x60] sm:$0xff]  ;;  %v1064_v7 = vld [vmem:[%s8665_s14 + $0x70] sm:$0xff] }
  0x1a   : > { %v1066_v8 = vld [vmem:[%s8665_s14 + $0x80] sm:$0xff]  ;;  %1063 = vst [vmem:[%s8673_s15 + $0x30] sm:$0xff] %v1062_v6  ;;  %1065 = vst [vmem:[%s8673_s15 + $0x38] sm:$0xff] %v1064_v7  ;;  %v1068_v9 = vld [vmem:[%s8665_s14 + $0x90] sm:$0xff] }
  0x1b   : > { %1067 = vst [vmem:[%s8673_s15 + $0x40] sm:$0xff] %v1066_v8  ;;  %v1070_v10 = vld [vmem:[%s8665_s14 + $0xa0] sm:$0xff]  ;;  %v1072_v11 = vld [vmem:[%s8665_s14 + $0xb0] sm:$0xff]  ;;  %1069 = vst [vmem:[%s8673_s15 + $0x48] sm:$0xff] %v1068_v9 }
  0x1c   : > { %1071 = vst [vmem:[%s8673_s15 + $0x50] sm:$0xff] %v1070_v10  ;;  %1073 = vst [vmem:[%s8673_s15 + $0x58] sm:$0xff] %v1072_v11  ;;  %v1074_v12 = vld [vmem:[%s8665_s14 + $0xc0] sm:$0xff]  ;;  %v1076_v13 = vld [vmem:[%s8665_s14 + $0xd0] sm:$0xff] }
  0x1d   : > { %v1078_v14 = vld [vmem:[%s8665_s14 + $0xe0] sm:$0xff]  ;;  %1075 = vst [vmem:[%s8673_s15 + $0x60] sm:$0xff] %v1074_v12  ;;  %1077 = vst [vmem:[%s8673_s15 + $0x68] sm:$0xff] %v1076_v13  ;;  %v1080_v15 = vld [vmem:[%s8665_s14 + $0xf0] sm:$0xff] }
  0x1e   : > { %1079 = vst [vmem:[%s8673_s15 + $0x70] sm:$0xff] %v1078_v14  ;;  %v1082_v16 = vld [vmem:[%s8665_s14 + $0x100] sm:$0xff]  ;;  %v1084_v17 = vld [vmem:[%s8665_s14 + $0x110] sm:$0xff]  ;;  %1081 = vst [vmem:[%s8673_s15 + $0x78] sm:$0xff] %v1080_v15 }
  0x1f   : > { %1083 = vst [vmem:[%s8673_s15 + $0x80] sm:$0xff] %v1082_v16  ;;  %1085 = vst [vmem:[%s8673_s15 + $0x88] sm:$0xff] %v1084_v17  ;;  %v1086_v18 = vld [vmem:[%s8665_s14 + $0x120] sm:$0xff]  ;;  %v1088_v19 = vld [vmem:[%s8665_s14 + $0x130] sm:$0xff] }
  0x20   : > { %v1090_v20 = vld [vmem:[%s8665_s14 + $0x140] sm:$0xff]  ;;  %1087 = vst [vmem:[%s8673_s15 + $0x90] sm:$0xff] %v1086_v18  ;;  %1089 = vst [vmem:[%s8673_s15 + $0x98] sm:$0xff] %v1088_v19  ;;  %v1092_v21 = vld [vmem:[%s8665_s14 + $0x150] sm:$0xff] }
  0x21   : > { %1091 = vst [vmem:[%s8673_s15 + $0xa0] sm:$0xff] %v1090_v20  ;;  %v1094_v22 = vld [vmem:[%s8665_s14 + $0x160] sm:$0xff]  ;;  %v1096_v23 = vld [vmem:[%s8665_s14 + $0x170] sm:$0xff]  ;;  %1093 = vst [vmem:[%s8673_s15 + $0xa8] sm:$0xff] %v1092_v21 }
  0x22   : > { %1095 = vst [vmem:[%s8673_s15 + $0xb0] sm:$0xff] %v1094_v22  ;;  %1097 = vst [vmem:[%s8673_s15 + $0xb8] sm:$0xff] %v1096_v23  ;;  %v1098_v24 = vld [vmem:[%s8665_s14 + $0x180] sm:$0xff]  ;;  %v1100_v25 = vld [vmem:[%s8665_s14 + $0x190] sm:$0xff] }
  0x23   : > { %v1102_v26 = vld [vmem:[%s8665_s14 + $0x1a0] sm:$0xff]  ;;  %1099 = vst [vmem:[%s8673_s15 + $0xc0] sm:$0xff] %v1098_v24  ;;  %1101 = vst [vmem:[%s8673_s15 + $0xc8] sm:$0xff] %v1100_v25  ;;  %v1104_v27 = vld [vmem:[%s8665_s14 + $0x1b0] sm:$0xff] }
  0x24   : > { %1103 = vst [vmem:[%s8673_s15 + $0xd0] sm:$0xff] %v1102_v26  ;;  %v1106_v28 = vld [vmem:[%s8665_s14 + $0x1c0] sm:$0xff]  ;;  %v1108_v29 = vld [vmem:[%s8665_s14 + $0x1d0] sm:$0xff]  ;;  %1105 = vst [vmem:[%s8673_s15 + $0xd8] sm:$0xff] %v1104_v27 }
  0x25   : > { %1107 = vst [vmem:[%s8673_s15 + $0xe0] sm:$0xff] %v1106_v28  ;;  %1109 = vst [vmem:[%s8673_s15 + $0xe8] sm:$0xff] %v1108_v29  ;;  %v1110_v30 = vld [vmem:[%s8665_s14 + $0x1e0] sm:$0xff]  ;;  %v1112_v31 = vld [vmem:[%s8665_s14 + $0x1f0] sm:$0xff] }
  0x26   : > { %v1114_v32 = vld [vmem:[%s8665_s14 + $0x200] sm:$0xff]  ;;  %1111 = vst [vmem:[%s8673_s15 + $0xf0] sm:$0xff] %v1110_v30  ;;  %1113 = vst [vmem:[%s8673_s15 + $0xf8] sm:$0xff] %v1112_v31  ;;  %v1116_v33 = vld [vmem:[%s8665_s14 + $0x210] sm:$0xff] }
  0x27   : > { %1115 = vst [vmem:[%s8673_s15 + $0x100] sm:$0xff] %v1114_v32  ;;  %v1118_v34 = vld [vmem:[%s8665_s14 + $0x220] sm:$0xff]  ;;  %v1120_v35 = vld [vmem:[%s8665_s14 + $0x230] sm:$0xff]  ;;  %1117 = vst [vmem:[%s8673_s15 + $0x108] sm:$0xff] %v1116_v33 }
  0x28   : > { %1119 = vst [vmem:[%s8673_s15 + $0x110] sm:$0xff] %v1118_v34  ;;  %1121 = vst [vmem:[%s8673_s15 + $0x118] sm:$0xff] %v1120_v35  ;;  %v1122_v36 = vld [vmem:[%s8665_s14 + $0x240] sm:$0xff]  ;;  %v1124_v37 = vld [vmem:[%s8665_s14 + $0x250] sm:$0xff] }
  0x29   : > { %v1126_v38 = vld [vmem:[%s8665_s14 + $0x260] sm:$0xff]  ;;  %1123 = vst [vmem:[%s8673_s15 + $0x120] sm:$0xff] %v1122_v36  ;;  %1125 = vst [vmem:[%s8673_s15 + $0x128] sm:$0xff] %v1124_v37  ;;  %v1128_v39 = vld [vmem:[%s8665_s14 + $0x270] sm:$0xff] }
  0x2a   : > { %1127 = vst [vmem:[%s8673_s15 + $0x130] sm:$0xff] %v1126_v38  ;;  %v1130_v40 = vld [vmem:[%s8665_s14 + $0x280] sm:$0xff]  ;;  %v1132_v41 = vld [vmem:[%s8665_s14 + $0x290] sm:$0xff]  ;;  %1129 = vst [vmem:[%s8673_s15 + $0x138] sm:$0xff] %v1128_v39 }
  0x2b   : > { %1131 = vst [vmem:[%s8673_s15 + $0x140] sm:$0xff] %v1130_v40  ;;  %1133 = vst [vmem:[%s8673_s15 + $0x148] sm:$0xff] %v1132_v41  ;;  %v1134_v42 = vld [vmem:[%s8665_s14 + $0x2a0] sm:$0xff]  ;;  %v1136_v43 = vld [vmem:[%s8665_s14 + $0x2b0] sm:$0xff] }
  0x2c   : > { %v1138_v44 = vld [vmem:[%s8665_s14 + $0x2c0] sm:$0xff]  ;;  %1135 = vst [vmem:[%s8673_s15 + $0x150] sm:$0xff] %v1134_v42  ;;  %1137 = vst [vmem:[%s8673_s15 + $0x158] sm:$0xff] %v1136_v43  ;;  %v1140_v45 = vld [vmem:[%s8665_s14 + $0x2d0] sm:$0xff] }
  0x2d   : > { %1139 = vst [vmem:[%s8673_s15 + $0x160] sm:$0xff] %v1138_v44  ;;  %v1142_v46 = vld [vmem:[%s8665_s14 + $0x2e0] sm:$0xff]  ;;  %v1144_v47 = vld [vmem:[%s8665_s14 + $0x2f0] sm:$0xff]  ;;  %1141 = vst [vmem:[%s8673_s15 + $0x168] sm:$0xff] %v1140_v45 }
  0x2e   : > { %1143 = vst [vmem:[%s8673_s15 + $0x170] sm:$0xff] %v1142_v46  ;;  %1145 = vst [vmem:[%s8673_s15 + $0x178] sm:$0xff] %v1144_v47  ;;  %v1146_v48 = vld [vmem:[%s8665_s14 + $0x300] sm:$0xff]  ;;  %v1148_v49 = vld [vmem:[%s8665_s14 + $0x310] sm:$0xff] }
  0x2f   : > { %v1150_v50 = vld [vmem:[%s8665_s14 + $0x320] sm:$0xff]  ;;  %1147 = vst [vmem:[%s8673_s15 + $0x180] sm:$0xff] %v1146_v48  ;;  %1149 = vst [vmem:[%s8673_s15 + $0x188] sm:$0xff] %v1148_v49  ;;  %v1152_v51 = vld [vmem:[%s8665_s14 + $0x330] sm:$0xff] }
  0x30   : > { %1151 = vst [vmem:[%s8673_s15 + $0x190] sm:$0xff] %v1150_v50  ;;  %v1154_v52 = vld [vmem:[%s8665_s14 + $0x340] sm:$0xff]  ;;  %v1156_v53 = vld [vmem:[%s8665_s14 + $0x350] sm:$0xff]  ;;  %1153 = vst [vmem:[%s8673_s15 + $0x198] sm:$0xff] %v1152_v51 }
  0x31   : > { %1155 = vst [vmem:[%s8673_s15 + $0x1a0] sm:$0xff] %v1154_v52  ;;  %1157 = vst [vmem:[%s8673_s15 + $0x1a8] sm:$0xff] %v1156_v53  ;;  %v1158_v54 = vld [vmem:[%s8665_s14 + $0x360] sm:$0xff]  ;;  %v1160_v55 = vld [vmem:[%s8665_s14 + $0x370] sm:$0xff] }
  0x32   : > { %v1162_v56 = vld [vmem:[%s8665_s14 + $0x380] sm:$0xff]  ;;  %1159 = vst [vmem:[%s8673_s15 + $0x1b0] sm:$0xff] %v1158_v54  ;;  %1161 = vst [vmem:[%s8673_s15 + $0x1b8] sm:$0xff] %v1160_v55  ;;  %v1164_v57 = vld [vmem:[%s8665_s14 + $0x390] sm:$0xff] }
  0x33   : > { %1163 = vst [vmem:[%s8673_s15 + $0x1c0] sm:$0xff] %v1162_v56  ;;  %v1166_v58 = vld [vmem:[%s8665_s14 + $0x3a0] sm:$0xff]  ;;  %v1168_v59 = vld [vmem:[%s8665_s14 + $0x3b0] sm:$0xff]  ;;  %1165 = vst [vmem:[%s8673_s15 + $0x1c8] sm:$0xff] %v1164_v57 }
  0x34   : > { %1167 = vst [vmem:[%s8673_s15 + $0x1d0] sm:$0xff] %v1166_v58  ;;  %1169 = vst [vmem:[%s8673_s15 + $0x1d8] sm:$0xff] %v1168_v59  ;;  %v1170_v60 = vld [vmem:[%s8665_s14 + $0x3c0] sm:$0xff]  ;;  %v1172_v61 = vld [vmem:[%s8665_s14 + $0x3d0] sm:$0xff] }
  0x35   : > { %v1174_v62 = vld [vmem:[%s8665_s14 + $0x3e0] sm:$0xff]  ;;  %1171 = vst [vmem:[%s8673_s15 + $0x1e0] sm:$0xff] %v1170_v60  ;;  %1173 = vst [vmem:[%s8673_s15 + $0x1e8] sm:$0xff] %v1172_v61  ;;  %v1176_v63 = vld [vmem:[%s8665_s14 + $0x3f0] sm:$0xff] }
  0x36   : > { %1175 = vst [vmem:[%s8673_s15 + $0x1f0] sm:$0xff] %v1174_v62  ;;  %v1178_v0 = vld [vmem:[%s8665_s14 + $0x400] sm:$0xff]  ;;  %v1180_v1 = vld [vmem:[%s8665_s14 + $0x410] sm:$0xff]  ;;  %1177 = vst [vmem:[%s8673_s15 + $0x1f8] sm:$0xff] %v1176_v63 }
  0x37   : > { %1179 = vst [vmem:[%s8673_s15 + $0x200] sm:$0xff] %v1178_v0  ;;  %1181 = vst [vmem:[%s8673_s15 + $0x208] sm:$0xff] %v1180_v1  ;;  %v1182_v2 = vld [vmem:[%s8665_s14 + $0x420] sm:$0xff]  ;;  %v1184_v3 = vld [vmem:[%s8665_s14 + $0x430] sm:$0xff] }
  0x38   : > { %v1186_v4 = vld [vmem:[%s8665_s14 + $0x440] sm:$0xff]  ;;  %1183 = vst [vmem:[%s8673_s15 + $0x210] sm:$0xff] %v1182_v2  ;;  %1185 = vst [vmem:[%s8673_s15 + $0x218] sm:$0xff] %v1184_v3  ;;  %v1188_v5 = vld [vmem:[%s8665_s14 + $0x450] sm:$0xff] }
  0x39   : > { %1187 = vst [vmem:[%s8673_s15 + $0x220] sm:$0xff] %v1186_v4  ;;  %v1190_v6 = vld [vmem:[%s8665_s14 + $0x460] sm:$0xff]  ;;  %v1192_v7 = vld [vmem:[%s8665_s14 + $0x470] sm:$0xff]  ;;  %1189 = vst [vmem:[%s8673_s15 + $0x228] sm:$0xff] %v1188_v5 }
  0x3a   : > { %1191 = vst [vmem:[%s8673_s15 + $0x230] sm:$0xff] %v1190_v6  ;;  %1193 = vst [vmem:[%s8673_s15 + $0x238] sm:$0xff] %v1192_v7  ;;  %v1194_v8 = vld [vmem:[%s8665_s14 + $0x480] sm:$0xff]  ;;  %v1196_v9 = vld [vmem:[%s8665_s14 + $0x490] sm:$0xff] }
  0x3b   : > { %v1198_v10 = vld [vmem:[%s8665_s14 + $0x4a0] sm:$0xff]  ;;  %1195 = vst [vmem:[%s8673_s15 + $0x240] sm:$0xff] %v1194_v8  ;;  %1197 = vst [vmem:[%s8673_s15 + $0x248] sm:$0xff] %v1196_v9  ;;  %v1200_v11 = vld [vmem:[%s8665_s14 + $0x4b0] sm:$0xff] }
  0x3c   : > { %1199 = vst [vmem:[%s8673_s15 + $0x250] sm:$0xff] %v1198_v10  ;;  %v1202_v12 = vld [vmem:[%s8665_s14 + $0x4c0] sm:$0xff]  ;;  %v1204_v13 = vld [vmem:[%s8665_s14 + $0x4d0] sm:$0xff]  ;;  %1201 = vst [vmem:[%s8673_s15 + $0x258] sm:$0xff] %v1200_v11 }
  0x3d   : > { %1203 = vst [vmem:[%s8673_s15 + $0x260] sm:$0xff] %v1202_v12  ;;  %1205 = vst [vmem:[%s8673_s15 + $0x268] sm:$0xff] %v1204_v13  ;;  %v1206_v14 = vld [vmem:[%s8665_s14 + $0x4e0] sm:$0xff]  ;;  %v1208_v15 = vld [vmem:[%s8665_s14 + $0x4f0] sm:$0xff] }
  0x3e   : > { %v1210_v16 = vld [vmem:[%s8665_s14 + $0x500] sm:$0xff]  ;;  %1207 = vst [vmem:[%s8673_s15 + $0x270] sm:$0xff] %v1206_v14  ;;  %1209 = vst [vmem:[%s8673_s15 + $0x278] sm:$0xff] %v1208_v15  ;;  %v1212_v17 = vld [vmem:[%s8665_s14 + $0x510] sm:$0xff] }
  0x3f   : > { %1211 = vst [vmem:[%s8673_s15 + $0x280] sm:$0xff] %v1210_v16  ;;  %v1214_v18 = vld [vmem:[%s8665_s14 + $0x520] sm:$0xff]  ;;  %v1216_v19 = vld [vmem:[%s8665_s14 + $0x530] sm:$0xff]  ;;  %1213 = vst [vmem:[%s8673_s15 + $0x288] sm:$0xff] %v1212_v17 }
  0x40   : > { %1215 = vst [vmem:[%s8673_s15 + $0x290] sm:$0xff] %v1214_v18  ;;  %1217 = vst [vmem:[%s8673_s15 + $0x298] sm:$0xff] %v1216_v19  ;;  %v1218_v20 = vld [vmem:[%s8665_s14 + $0x540] sm:$0xff]  ;;  %v1220_v21 = vld [vmem:[%s8665_s14 + $0x550] sm:$0xff] }
  0x41   : > { %v1222_v22 = vld [vmem:[%s8665_s14 + $0x560] sm:$0xff]  ;;  %1219 = vst [vmem:[%s8673_s15 + $0x2a0] sm:$0xff] %v1218_v20  ;;  %1221 = vst [vmem:[%s8673_s15 + $0x2a8] sm:$0xff] %v1220_v21  ;;  %v1224_v23 = vld [vmem:[%s8665_s14 + $0x570] sm:$0xff] }
  0x42   : > { %1223 = vst [vmem:[%s8673_s15 + $0x2b0] sm:$0xff] %v1222_v22  ;;  %v1226_v24 = vld [vmem:[%s8665_s14 + $0x580] sm:$0xff]  ;;  %v1228_v25 = vld [vmem:[%s8665_s14 + $0x590] sm:$0xff]  ;;  %1225 = vst [vmem:[%s8673_s15 + $0x2b8] sm:$0xff] %v1224_v23 }
  0x43   : > { %1227 = vst [vmem:[%s8673_s15 + $0x2c0] sm:$0xff] %v1226_v24  ;;  %1229 = vst [vmem:[%s8673_s15 + $0x2c8] sm:$0xff] %v1228_v25  ;;  %v1230_v26 = vld [vmem:[%s8665_s14 + $0x5a0] sm:$0xff]  ;;  %v1232_v27 = vld [vmem:[%s8665_s14 + $0x5b0] sm:$0xff] }
  0x44   : > { %v1234_v28 = vld [vmem:[%s8665_s14 + $0x5c0] sm:$0xff]  ;;  %1231 = vst [vmem:[%s8673_s15 + $0x2d0] sm:$0xff] %v1230_v26  ;;  %1233 = vst [vmem:[%s8673_s15 + $0x2d8] sm:$0xff] %v1232_v27  ;;  %v1236_v29 = vld [vmem:[%s8665_s14 + $0x5d0] sm:$0xff] }
  0x45   : > { %1235 = vst [vmem:[%s8673_s15 + $0x2e0] sm:$0xff] %v1234_v28  ;;  %v1238_v30 = vld [vmem:[%s8665_s14 + $0x5e0] sm:$0xff]  ;;  %v1240_v31 = vld [vmem:[%s8665_s14 + $0x5f0] sm:$0xff]  ;;  %1237 = vst [vmem:[%s8673_s15 + $0x2e8] sm:$0xff] %v1236_v29 }
  0x46   : > { %1239 = vst [vmem:[%s8673_s15 + $0x2f0] sm:$0xff] %v1238_v30  ;;  %1241 = vst [vmem:[%s8673_s15 + $0x2f8] sm:$0xff] %v1240_v31  ;;  %v1242_v32 = vld [vmem:[%s8665_s14 + $0x600] sm:$0xff]  ;;  %v1244_v33 = vld [vmem:[%s8665_s14 + $0x610] sm:$0xff] }
  0x47   : > { %v1246_v34 = vld [vmem:[%s8665_s14 + $0x620] sm:$0xff]  ;;  %1243 = vst [vmem:[%s8673_s15 + $0x300] sm:$0xff] %v1242_v32  ;;  %1245 = vst [vmem:[%s8673_s15 + $0x308] sm:$0xff] %v1244_v33  ;;  %v1248_v35 = vld [vmem:[%s8665_s14 + $0x630] sm:$0xff] }
  0x48   : > { %1247 = vst [vmem:[%s8673_s15 + $0x310] sm:$0xff] %v1246_v34  ;;  %v1250_v36 = vld [vmem:[%s8665_s14 + $0x640] sm:$0xff]  ;;  %v1252_v37 = vld [vmem:[%s8665_s14 + $0x650] sm:$0xff]  ;;  %1249 = vst [vmem:[%s8673_s15 + $0x318] sm:$0xff] %v1248_v35 }
  0x49   : > { %1251 = vst [vmem:[%s8673_s15 + $0x320] sm:$0xff] %v1250_v36  ;;  %1253 = vst [vmem:[%s8673_s15 + $0x328] sm:$0xff] %v1252_v37  ;;  %v1254_v38 = vld [vmem:[%s8665_s14 + $0x660] sm:$0xff]  ;;  %v1256_v39 = vld [vmem:[%s8665_s14 + $0x670] sm:$0xff] }
  0x4a   : > { %v1258_v40 = vld [vmem:[%s8665_s14 + $0x680] sm:$0xff]  ;;  %1255 = vst [vmem:[%s8673_s15 + $0x330] sm:$0xff] %v1254_v38  ;;  %1257 = vst [vmem:[%s8673_s15 + $0x338] sm:$0xff] %v1256_v39  ;;  %v1260_v41 = vld [vmem:[%s8665_s14 + $0x690] sm:$0xff] }
  0x4b   : > { %1259 = vst [vmem:[%s8673_s15 + $0x340] sm:$0xff] %v1258_v40  ;;  %v1262_v42 = vld [vmem:[%s8665_s14 + $0x6a0] sm:$0xff]  ;;  %v1264_v43 = vld [vmem:[%s8665_s14 + $0x6b0] sm:$0xff]  ;;  %1261 = vst [vmem:[%s8673_s15 + $0x348] sm:$0xff] %v1260_v41 }
  0x4c   : > { %1263 = vst [vmem:[%s8673_s15 + $0x350] sm:$0xff] %v1262_v42  ;;  %1265 = vst [vmem:[%s8673_s15 + $0x358] sm:$0xff] %v1264_v43  ;;  %v1266_v44 = vld [vmem:[%s8665_s14 + $0x6c0] sm:$0xff]  ;;  %v1268_v45 = vld [vmem:[%s8665_s14 + $0x6d0] sm:$0xff] }
  0x4d   : > { %v1270_v46 = vld [vmem:[%s8665_s14 + $0x6e0] sm:$0xff]  ;;  %1267 = vst [vmem:[%s8673_s15 + $0x360] sm:$0xff] %v1266_v44  ;;  %1269 = vst [vmem:[%s8673_s15 + $0x368] sm:$0xff] %v1268_v45  ;;  %v1272_v47 = vld [vmem:[%s8665_s14 + $0x6f0] sm:$0xff] }
  0x4e   : > { %1271 = vst [vmem:[%s8673_s15 + $0x370] sm:$0xff] %v1270_v46  ;;  %v1274_v48 = vld [vmem:[%s8665_s14 + $0x700] sm:$0xff]  ;;  %v1276_v49 = vld [vmem:[%s8665_s14 + $0x710] sm:$0xff]  ;;  %1273 = vst [vmem:[%s8673_s15 + $0x378] sm:$0xff] %v1272_v47 }
  0x4f   : > { %1275 = vst [vmem:[%s8673_s15 + $0x380] sm:$0xff] %v1274_v48  ;;  %1277 = vst [vmem:[%s8673_s15 + $0x388] sm:$0xff] %v1276_v49  ;;  %v1278_v50 = vld [vmem:[%s8665_s14 + $0x720] sm:$0xff]  ;;  %v1280_v51 = vld [vmem:[%s8665_s14 + $0x730] sm:$0xff] }
  0x50   : > { %v1282_v52 = vld [vmem:[%s8665_s14 + $0x740] sm:$0xff]  ;;  %1279 = vst [vmem:[%s8673_s15 + $0x390] sm:$0xff] %v1278_v50  ;;  %1281 = vst [vmem:[%s8673_s15 + $0x398] sm:$0xff] %v1280_v51  ;;  %v1284_v53 = vld [vmem:[%s8665_s14 + $0x750] sm:$0xff] }
  0x51   : > { %1283 = vst [vmem:[%s8673_s15 + $0x3a0] sm:$0xff] %v1282_v52  ;;  %v1286_v54 = vld [vmem:[%s8665_s14 + $0x760] sm:$0xff]  ;;  %v1288_v55 = vld [vmem:[%s8665_s14 + $0x770] sm:$0xff]  ;;  %1285 = vst [vmem:[%s8673_s15 + $0x3a8] sm:$0xff] %v1284_v53 }
  0x52   : > { %1287 = vst [vmem:[%s8673_s15 + $0x3b0] sm:$0xff] %v1286_v54  ;;  %1289 = vst [vmem:[%s8673_s15 + $0x3b8] sm:$0xff] %v1288_v55  ;;  %v1290_v56 = vld [vmem:[%s8665_s14 + $0x780] sm:$0xff]  ;;  %v1292_v57 = vld [vmem:[%s8665_s14 + $0x790] sm:$0xff] }
  0x53   : > { %v1294_v58 = vld [vmem:[%s8665_s14 + $0x7a0] sm:$0xff]  ;;  %1291 = vst [vmem:[%s8673_s15 + $0x3c0] sm:$0xff] %v1290_v56  ;;  %1293 = vst [vmem:[%s8673_s15 + $0x3c8] sm:$0xff] %v1292_v57  ;;  %v1296_v59 = vld [vmem:[%s8665_s14 + $0x7b0] sm:$0xff] }
  0x54   : > { %1295 = vst [vmem:[%s8673_s15 + $0x3d0] sm:$0xff] %v1294_v58  ;;  %v1298_v60 = vld [vmem:[%s8665_s14 + $0x7c0] sm:$0xff]  ;;  %v1300_v61 = vld [vmem:[%s8665_s14 + $0x7d0] sm:$0xff]  ;;  %1297 = vst [vmem:[%s8673_s15 + $0x3d8] sm:$0xff] %v1296_v59 }
  0x55   : > { %1299 = vst [vmem:[%s8673_s15 + $0x3e0] sm:$0xff] %v1298_v60  ;;  %1301 = vst [vmem:[%s8673_s15 + $0x3e8] sm:$0xff] %v1300_v61  ;;  %v1302_v62 = vld [vmem:[%s8665_s14 + $0x7e0] sm:$0xff]  ;;  %v1304_v63 = vld [vmem:[%s8665_s14 + $0x7f0] sm:$0xff] }
  0x56   : > { %v1306_v0 = vld [vmem:[%s8665_s14 + $0x800] sm:$0xff]  ;;  %1303 = vst [vmem:[%s8673_s15 + $0x3f0] sm:$0xff] %v1302_v62  ;;  %1305 = vst [vmem:[%s8673_s15 + $0x3f8] sm:$0xff] %v1304_v63  ;;  %v1308_v1 = vld [vmem:[%s8665_s14 + $0x810] sm:$0xff] }
  0x57   : > { %1307 = vst [vmem:[%s8673_s15 + $0x400] sm:$0xff] %v1306_v0  ;;  %v1310_v2 = vld [vmem:[%s8665_s14 + $0x820] sm:$0xff]  ;;  %v1312_v3 = vld [vmem:[%s8665_s14 + $0x830] sm:$0xff]  ;;  %1309 = vst [vmem:[%s8673_s15 + $0x408] sm:$0xff] %v1308_v1 }
  0x58   : > { %1311 = vst [vmem:[%s8673_s15 + $0x410] sm:$0xff] %v1310_v2  ;;  %1313 = vst [vmem:[%s8673_s15 + $0x418] sm:$0xff] %v1312_v3  ;;  %v1314_v4 = vld [vmem:[%s8665_s14 + $0x840] sm:$0xff]  ;;  %v1316_v5 = vld [vmem:[%s8665_s14 + $0x850] sm:$0xff] }
  0x59   : > { %v1318_v6 = vld [vmem:[%s8665_s14 + $0x860] sm:$0xff]  ;;  %1315 = vst [vmem:[%s8673_s15 + $0x420] sm:$0xff] %v1314_v4  ;;  %1317 = vst [vmem:[%s8673_s15 + $0x428] sm:$0xff] %v1316_v5  ;;  %v1320_v7 = vld [vmem:[%s8665_s14 + $0x870] sm:$0xff] }
  0x5a   : > { %1319 = vst [vmem:[%s8673_s15 + $0x430] sm:$0xff] %v1318_v6  ;;  %v1322_v8 = vld [vmem:[%s8665_s14 + $0x880] sm:$0xff]  ;;  %v1324_v9 = vld [vmem:[%s8665_s14 + $0x890] sm:$0xff]  ;;  %1321 = vst [vmem:[%s8673_s15 + $0x438] sm:$0xff] %v1320_v7 }
  0x5b   : > { %1323 = vst [vmem:[%s8673_s15 + $0x440] sm:$0xff] %v1322_v8  ;;  %1325 = vst [vmem:[%s8673_s15 + $0x448] sm:$0xff] %v1324_v9  ;;  %v1326_v10 = vld [vmem:[%s8665_s14 + $0x8a0] sm:$0xff]  ;;  %v1328_v11 = vld [vmem:[%s8665_s14 + $0x8b0] sm:$0xff] }
  0x5c   : > { %v1330_v12 = vld [vmem:[%s8665_s14 + $0x8c0] sm:$0xff]  ;;  %1327 = vst [vmem:[%s8673_s15 + $0x450] sm:$0xff] %v1326_v10  ;;  %1329 = vst [vmem:[%s8673_s15 + $0x458] sm:$0xff] %v1328_v11  ;;  %v1332_v13 = vld [vmem:[%s8665_s14 + $0x8d0] sm:$0xff] }
  0x5d   : > { %1331 = vst [vmem:[%s8673_s15 + $0x460] sm:$0xff] %v1330_v12  ;;  %v1334_v14 = vld [vmem:[%s8665_s14 + $0x8e0] sm:$0xff]  ;;  %v1336_v15 = vld [vmem:[%s8665_s14 + $0x8f0] sm:$0xff]  ;;  %1333 = vst [vmem:[%s8673_s15 + $0x468] sm:$0xff] %v1332_v13 }
  0x5e   : > { %1335 = vst [vmem:[%s8673_s15 + $0x470] sm:$0xff] %v1334_v14  ;;  %1337 = vst [vmem:[%s8673_s15 + $0x478] sm:$0xff] %v1336_v15  ;;  %v1338_v16 = vld [vmem:[%s8665_s14 + $0x900] sm:$0xff]  ;;  %v1340_v17 = vld [vmem:[%s8665_s14 + $0x910] sm:$0xff] }
  0x5f   : > { %v1342_v18 = vld [vmem:[%s8665_s14 + $0x920] sm:$0xff]  ;;  %1339 = vst [vmem:[%s8673_s15 + $0x480] sm:$0xff] %v1338_v16  ;;  %1341 = vst [vmem:[%s8673_s15 + $0x488] sm:$0xff] %v1340_v17  ;;  %v1344_v19 = vld [vmem:[%s8665_s14 + $0x930] sm:$0xff] }
  0x60   : > { %1343 = vst [vmem:[%s8673_s15 + $0x490] sm:$0xff] %v1342_v18  ;;  %v1346_v20 = vld [vmem:[%s8665_s14 + $0x940] sm:$0xff]  ;;  %v1348_v21 = vld [vmem:[%s8665_s14 + $0x950] sm:$0xff]  ;;  %1345 = vst [vmem:[%s8673_s15 + $0x498] sm:$0xff] %v1344_v19 }
  0x61   : > { %1347 = vst [vmem:[%s8673_s15 + $0x4a0] sm:$0xff] %v1346_v20  ;;  %1349 = vst [vmem:[%s8673_s15 + $0x4a8] sm:$0xff] %v1348_v21  ;;  %v1350_v22 = vld [vmem:[%s8665_s14 + $0x960] sm:$0xff]  ;;  %v1352_v23 = vld [vmem:[%s8665_s14 + $0x970] sm:$0xff] }
  0x62   : > { %v1354_v24 = vld [vmem:[%s8665_s14 + $0x980] sm:$0xff]  ;;  %1351 = vst [vmem:[%s8673_s15 + $0x4b0] sm:$0xff] %v1350_v22  ;;  %1353 = vst [vmem:[%s8673_s15 + $0x4b8] sm:$0xff] %v1352_v23  ;;  %v1356_v25 = vld [vmem:[%s8665_s14 + $0x990] sm:$0xff] }
  0x63   : > { %1355 = vst [vmem:[%s8673_s15 + $0x4c0] sm:$0xff] %v1354_v24  ;;  %v1358_v26 = vld [vmem:[%s8665_s14 + $0x9a0] sm:$0xff]  ;;  %v1360_v27 = vld [vmem:[%s8665_s14 + $0x9b0] sm:$0xff]  ;;  %1357 = vst [vmem:[%s8673_s15 + $0x4c8] sm:$0xff] %v1356_v25 }
  0x64   : > { %1359 = vst [vmem:[%s8673_s15 + $0x4d0] sm:$0xff] %v1358_v26  ;;  %1361 = vst [vmem:[%s8673_s15 + $0x4d8] sm:$0xff] %v1360_v27  ;;  %v1362_v28 = vld [vmem:[%s8665_s14 + $0x9c0] sm:$0xff]  ;;  %v1364_v29 = vld [vmem:[%s8665_s14 + $0x9d0] sm:$0xff] }
  0x65   : > { %v1366_v30 = vld [vmem:[%s8665_s14 + $0x9e0] sm:$0xff]  ;;  %1363 = vst [vmem:[%s8673_s15 + $0x4e0] sm:$0xff] %v1362_v28  ;;  %1365 = vst [vmem:[%s8673_s15 + $0x4e8] sm:$0xff] %v1364_v29  ;;  %v1368_v31 = vld [vmem:[%s8665_s14 + $0x9f0] sm:$0xff] }
  0x66   : > { %1367 = vst [vmem:[%s8673_s15 + $0x4f0] sm:$0xff] %v1366_v30  ;;  %v1370_v32 = vld [vmem:[%s8665_s14 + $0xa00] sm:$0xff]  ;;  %v1372_v33 = vld [vmem:[%s8665_s14 + $0xa10] sm:$0xff]  ;;  %1369 = vst [vmem:[%s8673_s15 + $0x4f8] sm:$0xff] %v1368_v31 }
  0x67   : > { %1371 = vst [vmem:[%s8673_s15 + $0x500] sm:$0xff] %v1370_v32  ;;  %1373 = vst [vmem:[%s8673_s15 + $0x508] sm:$0xff] %v1372_v33  ;;  %v1374_v34 = vld [vmem:[%s8665_s14 + $0xa20] sm:$0xff]  ;;  %v1376_v35 = vld [vmem:[%s8665_s14 + $0xa30] sm:$0xff] }
  0x68   : > { %v1378_v36 = vld [vmem:[%s8665_s14 + $0xa40] sm:$0xff]  ;;  %1375 = vst [vmem:[%s8673_s15 + $0x510] sm:$0xff] %v1374_v34  ;;  %1377 = vst [vmem:[%s8673_s15 + $0x518] sm:$0xff] %v1376_v35  ;;  %v1380_v37 = vld [vmem:[%s8665_s14 + $0xa50] sm:$0xff] }
  0x69   : > { %1379 = vst [vmem:[%s8673_s15 + $0x520] sm:$0xff] %v1378_v36  ;;  %v1382_v38 = vld [vmem:[%s8665_s14 + $0xa60] sm:$0xff]  ;;  %v1384_v39 = vld [vmem:[%s8665_s14 + $0xa70] sm:$0xff]  ;;  %1381 = vst [vmem:[%s8673_s15 + $0x528] sm:$0xff] %v1380_v37 }
  0x6a   : > { %1383 = vst [vmem:[%s8673_s15 + $0x530] sm:$0xff] %v1382_v38  ;;  %1385 = vst [vmem:[%s8673_s15 + $0x538] sm:$0xff] %v1384_v39  ;;  %v1386_v40 = vld [vmem:[%s8665_s14 + $0xa80] sm:$0xff]  ;;  %v1388_v41 = vld [vmem:[%s8665_s14 + $0xa90] sm:$0xff] }
  0x6b   : > { %v1390_v42 = vld [vmem:[%s8665_s14 + $0xaa0] sm:$0xff]  ;;  %1387 = vst [vmem:[%s8673_s15 + $0x540] sm:$0xff] %v1386_v40  ;;  %1389 = vst [vmem:[%s8673_s15 + $0x548] sm:$0xff] %v1388_v41  ;;  %v1392_v43 = vld [vmem:[%s8665_s14 + $0xab0] sm:$0xff] }
  0x6c   : > { %1391 = vst [vmem:[%s8673_s15 + $0x550] sm:$0xff] %v1390_v42  ;;  %v1394_v44 = vld [vmem:[%s8665_s14 + $0xac0] sm:$0xff]  ;;  %v1396_v45 = vld [vmem:[%s8665_s14 + $0xad0] sm:$0xff]  ;;  %1393 = vst [vmem:[%s8673_s15 + $0x558] sm:$0xff] %v1392_v43 }
  0x6d   : > { %1395 = vst [vmem:[%s8673_s15 + $0x560] sm:$0xff] %v1394_v44  ;;  %1397 = vst [vmem:[%s8673_s15 + $0x568] sm:$0xff] %v1396_v45  ;;  %v1398_v46 = vld [vmem:[%s8665_s14 + $0xae0] sm:$0xff]  ;;  %v1400_v47 = vld [vmem:[%s8665_s14 + $0xaf0] sm:$0xff] }
  0x6e   : > { %v1402_v48 = vld [vmem:[%s8665_s14 + $0xb00] sm:$0xff]  ;;  %1399 = vst [vmem:[%s8673_s15 + $0x570] sm:$0xff] %v1398_v46  ;;  %1401 = vst [vmem:[%s8673_s15 + $0x578] sm:$0xff] %v1400_v47  ;;  %v1404_v49 = vld [vmem:[%s8665_s14 + $0xb10] sm:$0xff] }
  0x6f   : > { %1403 = vst [vmem:[%s8673_s15 + $0x580] sm:$0xff] %v1402_v48  ;;  %v1406_v50 = vld [vmem:[%s8665_s14 + $0xb20] sm:$0xff]  ;;  %v1408_v51 = vld [vmem:[%s8665_s14 + $0xb30] sm:$0xff]  ;;  %1405 = vst [vmem:[%s8673_s15 + $0x588] sm:$0xff] %v1404_v49 }
  0x70   : > { %1407 = vst [vmem:[%s8673_s15 + $0x590] sm:$0xff] %v1406_v50  ;;  %1409 = vst [vmem:[%s8673_s15 + $0x598] sm:$0xff] %v1408_v51  ;;  %v1410_v52 = vld [vmem:[%s8665_s14 + $0xb40] sm:$0xff]  ;;  %v1412_v53 = vld [vmem:[%s8665_s14 + $0xb50] sm:$0xff] }
  0x71   : > { %v1414_v54 = vld [vmem:[%s8665_s14 + $0xb60] sm:$0xff]  ;;  %1411 = vst [vmem:[%s8673_s15 + $0x5a0] sm:$0xff] %v1410_v52  ;;  %1413 = vst [vmem:[%s8673_s15 + $0x5a8] sm:$0xff] %v1412_v53  ;;  %v1416_v55 = vld [vmem:[%s8665_s14 + $0xb70] sm:$0xff] }
  0x72   : > { %1415 = vst [vmem:[%s8673_s15 + $0x5b0] sm:$0xff] %v1414_v54  ;;  %v1418_v56 = vld [vmem:[%s8665_s14 + $0xb80] sm:$0xff]  ;;  %v1420_v57 = vld [vmem:[%s8665_s14 + $0xb90] sm:$0xff]  ;;  %1417 = vst [vmem:[%s8673_s15 + $0x5b8] sm:$0xff] %v1416_v55 }
  0x73   : > { %1419 = vst [vmem:[%s8673_s15 + $0x5c0] sm:$0xff] %v1418_v56  ;;  %1421 = vst [vmem:[%s8673_s15 + $0x5c8] sm:$0xff] %v1420_v57  ;;  %v1422_v58 = vld [vmem:[%s8665_s14 + $0xba0] sm:$0xff]  ;;  %v1424_v59 = vld [vmem:[%s8665_s14 + $0xbb0] sm:$0xff] }
  0x74   : > { %v1426_v60 = vld [vmem:[%s8665_s14 + $0xbc0] sm:$0xff]  ;;  %1423 = vst [vmem:[%s8673_s15 + $0x5d0] sm:$0xff] %v1422_v58  ;;  %1425 = vst [vmem:[%s8673_s15 + $0x5d8] sm:$0xff] %v1424_v59  ;;  %v1428_v61 = vld [vmem:[%s8665_s14 + $0xbd0] sm:$0xff] }
  0x75   : > { %1427 = vst [vmem:[%s8673_s15 + $0x5e0] sm:$0xff] %v1426_v60  ;;  %v1430_v62 = vld [vmem:[%s8665_s14 + $0xbe0] sm:$0xff]  ;;  %v1432_v63 = vld [vmem:[%s8665_s14 + $0xbf0] sm:$0xff]  ;;  %1429 = vst [vmem:[%s8673_s15 + $0x5e8] sm:$0xff] %v1428_v61 }
  0x76   : > { %1431 = vst [vmem:[%s8673_s15 + $0x5f0] sm:$0xff] %v1430_v62  ;;  %1433 = vst [vmem:[%s8673_s15 + $0x5f8] sm:$0xff] %v1432_v63  ;;  %v1434_v0 = vld [vmem:[%s8665_s14 + $0xc00] sm:$0xff]  ;;  %v1436_v1 = vld [vmem:[%s8665_s14 + $0xc10] sm:$0xff] }
  0x77   : > { %v1438_v2 = vld [vmem:[%s8665_s14 + $0xc20] sm:$0xff]  ;;  %1435 = vst [vmem:[%s8673_s15 + $0x600] sm:$0xff] %v1434_v0  ;;  %1437 = vst [vmem:[%s8673_s15 + $0x608] sm:$0xff] %v1436_v1  ;;  %v1440_v3 = vld [vmem:[%s8665_s14 + $0xc30] sm:$0xff] }
  0x78   : > { %1439 = vst [vmem:[%s8673_s15 + $0x610] sm:$0xff] %v1438_v2  ;;  %v1442_v4 = vld [vmem:[%s8665_s14 + $0xc40] sm:$0xff]  ;;  %v1444_v5 = vld [vmem:[%s8665_s14 + $0xc50] sm:$0xff]  ;;  %1441 = vst [vmem:[%s8673_s15 + $0x618] sm:$0xff] %v1440_v3 }
  0x79   : > { %1443 = vst [vmem:[%s8673_s15 + $0x620] sm:$0xff] %v1442_v4  ;;  %1445 = vst [vmem:[%s8673_s15 + $0x628] sm:$0xff] %v1444_v5  ;;  %v1446_v6 = vld [vmem:[%s8665_s14 + $0xc60] sm:$0xff]  ;;  %v1448_v7 = vld [vmem:[%s8665_s14 + $0xc70] sm:$0xff] }
  0x7a   : > { %v1450_v8 = vld [vmem:[%s8665_s14 + $0xc80] sm:$0xff]  ;;  %1447 = vst [vmem:[%s8673_s15 + $0x630] sm:$0xff] %v1446_v6  ;;  %1449 = vst [vmem:[%s8673_s15 + $0x638] sm:$0xff] %v1448_v7  ;;  %v1452_v9 = vld [vmem:[%s8665_s14 + $0xc90] sm:$0xff] }
  0x7b   : > { %1451 = vst [vmem:[%s8673_s15 + $0x640] sm:$0xff] %v1450_v8  ;;  %v1454_v10 = vld [vmem:[%s8665_s14 + $0xca0] sm:$0xff]  ;;  %v1456_v11 = vld [vmem:[%s8665_s14 + $0xcb0] sm:$0xff]  ;;  %1453 = vst [vmem:[%s8673_s15 + $0x648] sm:$0xff] %v1452_v9 }
  0x7c   : > { %1455 = vst [vmem:[%s8673_s15 + $0x650] sm:$0xff] %v1454_v10  ;;  %1457 = vst [vmem:[%s8673_s15 + $0x658] sm:$0xff] %v1456_v11  ;;  %v1458_v12 = vld [vmem:[%s8665_s14 + $0xcc0] sm:$0xff]  ;;  %v1460_v13 = vld [vmem:[%s8665_s14 + $0xcd0] sm:$0xff] }
  0x7d   : > { %v1462_v14 = vld [vmem:[%s8665_s14 + $0xce0] sm:$0xff]  ;;  %1459 = vst [vmem:[%s8673_s15 + $0x660] sm:$0xff] %v1458_v12  ;;  %1461 = vst [vmem:[%s8673_s15 + $0x668] sm:$0xff] %v1460_v13  ;;  %v1464_v15 = vld [vmem:[%s8665_s14 + $0xcf0] sm:$0xff] }
  0x7e   : > { %1463 = vst [vmem:[%s8673_s15 + $0x670] sm:$0xff] %v1462_v14  ;;  %v1466_v16 = vld [vmem:[%s8665_s14 + $0xd00] sm:$0xff]  ;;  %v1468_v17 = vld [vmem:[%s8665_s14 + $0xd10] sm:$0xff]  ;;  %1465 = vst [vmem:[%s8673_s15 + $0x678] sm:$0xff] %v1464_v15 }
  0x7f   : > { %1467 = vst [vmem:[%s8673_s15 + $0x680] sm:$0xff] %v1466_v16  ;;  %1469 = vst [vmem:[%s8673_s15 + $0x688] sm:$0xff] %v1468_v17  ;;  %v1470_v18 = vld [vmem:[%s8665_s14 + $0xd20] sm:$0xff]  ;;  %v1472_v19 = vld [vmem:[%s8665_s14 + $0xd30] sm:$0xff] }
  0x80   : > { %v1474_v20 = vld [vmem:[%s8665_s14 + $0xd40] sm:$0xff]  ;;  %1471 = vst [vmem:[%s8673_s15 + $0x690] sm:$0xff] %v1470_v18  ;;  %1473 = vst [vmem:[%s8673_s15 + $0x698] sm:$0xff] %v1472_v19  ;;  %v1476_v21 = vld [vmem:[%s8665_s14 + $0xd50] sm:$0xff] }
  0x81   : > { %1475 = vst [vmem:[%s8673_s15 + $0x6a0] sm:$0xff] %v1474_v20  ;;  %v1478_v22 = vld [vmem:[%s8665_s14 + $0xd60] sm:$0xff]  ;;  %v1480_v23 = vld [vmem:[%s8665_s14 + $0xd70] sm:$0xff]  ;;  %1477 = vst [vmem:[%s8673_s15 + $0x6a8] sm:$0xff] %v1476_v21 }
  0x82   : > { %1479 = vst [vmem:[%s8673_s15 + $0x6b0] sm:$0xff] %v1478_v22  ;;  %1481 = vst [vmem:[%s8673_s15 + $0x6b8] sm:$0xff] %v1480_v23  ;;  %v1482_v24 = vld [vmem:[%s8665_s14 + $0xd80] sm:$0xff]  ;;  %v1484_v25 = vld [vmem:[%s8665_s14 + $0xd90] sm:$0xff] }
  0x83   : > { %v1486_v26 = vld [vmem:[%s8665_s14 + $0xda0] sm:$0xff]  ;;  %1483 = vst [vmem:[%s8673_s15 + $0x6c0] sm:$0xff] %v1482_v24  ;;  %1485 = vst [vmem:[%s8673_s15 + $0x6c8] sm:$0xff] %v1484_v25  ;;  %v1488_v27 = vld [vmem:[%s8665_s14 + $0xdb0] sm:$0xff] }
  0x84   : > { %1487 = vst [vmem:[%s8673_s15 + $0x6d0] sm:$0xff] %v1486_v26  ;;  %v1490_v28 = vld [vmem:[%s8665_s14 + $0xdc0] sm:$0xff]  ;;  %v1492_v29 = vld [vmem:[%s8665_s14 + $0xdd0] sm:$0xff]  ;;  %1489 = vst [vmem:[%s8673_s15 + $0x6d8] sm:$0xff] %v1488_v27 }
  0x85   : > { %1491 = vst [vmem:[%s8673_s15 + $0x6e0] sm:$0xff] %v1490_v28  ;;  %1493 = vst [vmem:[%s8673_s15 + $0x6e8] sm:$0xff] %v1492_v29  ;;  %v1494_v30 = vld [vmem:[%s8665_s14 + $0xde0] sm:$0xff]  ;;  %v1496_v31 = vld [vmem:[%s8665_s14 + $0xdf0] sm:$0xff] }
  0x86   : > { %v1498_v32 = vld [vmem:[%s8665_s14 + $0xe00] sm:$0xff]  ;;  %1495 = vst [vmem:[%s8673_s15 + $0x6f0] sm:$0xff] %v1494_v30  ;;  %1497 = vst [vmem:[%s8673_s15 + $0x6f8] sm:$0xff] %v1496_v31  ;;  %v1500_v33 = vld [vmem:[%s8665_s14 + $0xe10] sm:$0xff] }
  0x87   : > { %1499 = vst [vmem:[%s8673_s15 + $0x700] sm:$0xff] %v1498_v32  ;;  %v1502_v34 = vld [vmem:[%s8665_s14 + $0xe20] sm:$0xff]  ;;  %v1504_v35 = vld [vmem:[%s8665_s14 + $0xe30] sm:$0xff]  ;;  %1501 = vst [vmem:[%s8673_s15 + $0x708] sm:$0xff] %v1500_v33 }
  0x88   : > { %1503 = vst [vmem:[%s8673_s15 + $0x710] sm:$0xff] %v1502_v34  ;;  %1505 = vst [vmem:[%s8673_s15 + $0x718] sm:$0xff] %v1504_v35  ;;  %v1506_v36 = vld [vmem:[%s8665_s14 + $0xe40] sm:$0xff]  ;;  %v1508_v37 = vld [vmem:[%s8665_s14 + $0xe50] sm:$0xff] }
  0x89   : > { %v1510_v38 = vld [vmem:[%s8665_s14 + $0xe60] sm:$0xff]  ;;  %1507 = vst [vmem:[%s8673_s15 + $0x720] sm:$0xff] %v1506_v36  ;;  %1509 = vst [vmem:[%s8673_s15 + $0x728] sm:$0xff] %v1508_v37  ;;  %v1512_v39 = vld [vmem:[%s8665_s14 + $0xe70] sm:$0xff] }
  0x8a   : > { %1511 = vst [vmem:[%s8673_s15 + $0x730] sm:$0xff] %v1510_v38  ;;  %v1514_v40 = vld [vmem:[%s8665_s14 + $0xe80] sm:$0xff]  ;;  %v1516_v41 = vld [vmem:[%s8665_s14 + $0xe90] sm:$0xff]  ;;  %1513 = vst [vmem:[%s8673_s15 + $0x738] sm:$0xff] %v1512_v39 }
  0x8b   : > { %1515 = vst [vmem:[%s8673_s15 + $0x740] sm:$0xff] %v1514_v40  ;;  %1517 = vst [vmem:[%s8673_s15 + $0x748] sm:$0xff] %v1516_v41  ;;  %v1518_v42 = vld [vmem:[%s8665_s14 + $0xea0] sm:$0xff]  ;;  %v1520_v43 = vld [vmem:[%s8665_s14 + $0xeb0] sm:$0xff] }
  0x8c   : > { %v1522_v44 = vld [vmem:[%s8665_s14 + $0xec0] sm:$0xff]  ;;  %1519 = vst [vmem:[%s8673_s15 + $0x750] sm:$0xff] %v1518_v42  ;;  %1521 = vst [vmem:[%s8673_s15 + $0x758] sm:$0xff] %v1520_v43  ;;  %v1524_v45 = vld [vmem:[%s8665_s14 + $0xed0] sm:$0xff] }
  0x8d   : > { %1523 = vst [vmem:[%s8673_s15 + $0x760] sm:$0xff] %v1522_v44  ;;  %v1526_v46 = vld [vmem:[%s8665_s14 + $0xee0] sm:$0xff]  ;;  %v1528_v47 = vld [vmem:[%s8665_s14 + $0xef0] sm:$0xff]  ;;  %1525 = vst [vmem:[%s8673_s15 + $0x768] sm:$0xff] %v1524_v45 }
  0x8e   : > { %1527 = vst [vmem:[%s8673_s15 + $0x770] sm:$0xff] %v1526_v46  ;;  %1529 = vst [vmem:[%s8673_s15 + $0x778] sm:$0xff] %v1528_v47  ;;  %v1530_v48 = vld [vmem:[%s8665_s14 + $0xf00] sm:$0xff]  ;;  %v1532_v49 = vld [vmem:[%s8665_s14 + $0xf10] sm:$0xff] }
  0x8f   : > { %v1534_v50 = vld [vmem:[%s8665_s14 + $0xf20] sm:$0xff]  ;;  %1531 = vst [vmem:[%s8673_s15 + $0x780] sm:$0xff] %v1530_v48  ;;  %1533 = vst [vmem:[%s8673_s15 + $0x788] sm:$0xff] %v1532_v49  ;;  %v1536_v51 = vld [vmem:[%s8665_s14 + $0xf30] sm:$0xff] }
  0x90   : > { %1535 = vst [vmem:[%s8673_s15 + $0x790] sm:$0xff] %v1534_v50  ;;  %v1538_v52 = vld [vmem:[%s8665_s14 + $0xf40] sm:$0xff]  ;;  %v1540_v53 = vld [vmem:[%s8665_s14 + $0xf50] sm:$0xff]  ;;  %1537 = vst [vmem:[%s8673_s15 + $0x798] sm:$0xff] %v1536_v51 }
  0x91   : > { %1539 = vst [vmem:[%s8673_s15 + $0x7a0] sm:$0xff] %v1538_v52  ;;  %1541 = vst [vmem:[%s8673_s15 + $0x7a8] sm:$0xff] %v1540_v53  ;;  %v1542_v54 = vld [vmem:[%s8665_s14 + $0xf60] sm:$0xff]  ;;  %v1544_v55 = vld [vmem:[%s8665_s14 + $0xf70] sm:$0xff] }
  0x92   : > { %v1546_v56 = vld [vmem:[%s8665_s14 + $0xf80] sm:$0xff]  ;;  %1543 = vst [vmem:[%s8673_s15 + $0x7b0] sm:$0xff] %v1542_v54  ;;  %1545 = vst [vmem:[%s8673_s15 + $0x7b8] sm:$0xff] %v1544_v55  ;;  %v1548_v57 = vld [vmem:[%s8665_s14 + $0xf90] sm:$0xff] }
  0x93   : > { %1547 = vst [vmem:[%s8673_s15 + $0x7c0] sm:$0xff] %v1546_v56  ;;  %v1550_v58 = vld [vmem:[%s8665_s14 + $0xfa0] sm:$0xff]  ;;  %v1552_v59 = vld [vmem:[%s8665_s14 + $0xfb0] sm:$0xff]  ;;  %1549 = vst [vmem:[%s8673_s15 + $0x7c8] sm:$0xff] %v1548_v57 }
  0x94   : > { %1551 = vst [vmem:[%s8673_s15 + $0x7d0] sm:$0xff] %v1550_v58  ;;  %1553 = vst [vmem:[%s8673_s15 + $0x7d8] sm:$0xff] %v1552_v59  ;;  %v1554_v60 = vld [vmem:[%s8665_s14 + $0xfc0] sm:$0xff]  ;;  %v1556_v61 = vld [vmem:[%s8665_s14 + $0xfd0] sm:$0xff] }
  0x95   : > { %v1558_v62 = vld [vmem:[%s8665_s14 + $0xfe0] sm:$0xff]  ;;  %1555 = vst [vmem:[%s8673_s15 + $0x7e0] sm:$0xff] %v1554_v60  ;;  %1557 = vst [vmem:[%s8673_s15 + $0x7e8] sm:$0xff] %v1556_v61  ;;  %v1560_v63 = vld [vmem:[%s8665_s14 + $0xff0] sm:$0xff] }
  0x96   : > { %1559 = vst [vmem:[%s8673_s15 + $0x7f0] sm:$0xff] %v1558_v62  ;;  %v1562_v0 = vld [vmem:[%s8665_s14 + $0x1000] sm:$0xff]  ;;  %v1564_v1 = vld [vmem:[%s8665_s14 + $0x1010] sm:$0xff]  ;;  %1561 = vst [vmem:[%s8673_s15 + $0x7f8] sm:$0xff] %v1560_v63 }
  0x97   : > { %1563 = vst [vmem:[%s8673_s15 + $0x800] sm:$0xff] %v1562_v0  ;;  %1565 = vst [vmem:[%s8673_s15 + $0x808] sm:$0xff] %v1564_v1  ;;  %v1566_v2 = vld [vmem:[%s8665_s14 + $0x1020] sm:$0xff]  ;;  %v1568_v3 = vld [vmem:[%s8665_s14 + $0x1030] sm:$0xff] }
  0x98   : > { %v1570_v4 = vld [vmem:[%s8665_s14 + $0x1040] sm:$0xff]  ;;  %1567 = vst [vmem:[%s8673_s15 + $0x810] sm:$0xff] %v1566_v2  ;;  %1569 = vst [vmem:[%s8673_s15 + $0x818] sm:$0xff] %v1568_v3  ;;  %v1572_v5 = vld [vmem:[%s8665_s14 + $0x1050] sm:$0xff] }
  0x99   : > { %1571 = vst [vmem:[%s8673_s15 + $0x820] sm:$0xff] %v1570_v4  ;;  %v1574_v6 = vld [vmem:[%s8665_s14 + $0x1060] sm:$0xff]  ;;  %v1576_v7 = vld [vmem:[%s8665_s14 + $0x1070] sm:$0xff]  ;;  %1573 = vst [vmem:[%s8673_s15 + $0x828] sm:$0xff] %v1572_v5 }
  0x9a   : > { %1575 = vst [vmem:[%s8673_s15 + $0x830] sm:$0xff] %v1574_v6  ;;  %1577 = vst [vmem:[%s8673_s15 + $0x838] sm:$0xff] %v1576_v7  ;;  %v1578_v8 = vld [vmem:[%s8665_s14 + $0x1080] sm:$0xff]  ;;  %v1580_v9 = vld [vmem:[%s8665_s14 + $0x1090] sm:$0xff] }
  0x9b   : > { %v1582_v10 = vld [vmem:[%s8665_s14 + $0x10a0] sm:$0xff]  ;;  %1579 = vst [vmem:[%s8673_s15 + $0x840] sm:$0xff] %v1578_v8  ;;  %1581 = vst [vmem:[%s8673_s15 + $0x848] sm:$0xff] %v1580_v9  ;;  %v1584_v11 = vld [vmem:[%s8665_s14 + $0x10b0] sm:$0xff] }
  0x9c   : > { %1583 = vst [vmem:[%s8673_s15 + $0x850] sm:$0xff] %v1582_v10  ;;  %v1586_v12 = vld [vmem:[%s8665_s14 + $0x10c0] sm:$0xff]  ;;  %v1588_v13 = vld [vmem:[%s8665_s14 + $0x10d0] sm:$0xff]  ;;  %1585 = vst [vmem:[%s8673_s15 + $0x858] sm:$0xff] %v1584_v11 }
  0x9d   : > { %1587 = vst [vmem:[%s8673_s15 + $0x860] sm:$0xff] %v1586_v12  ;;  %1589 = vst [vmem:[%s8673_s15 + $0x868] sm:$0xff] %v1588_v13  ;;  %v1590_v14 = vld [vmem:[%s8665_s14 + $0x10e0] sm:$0xff]  ;;  %v1592_v15 = vld [vmem:[%s8665_s14 + $0x10f0] sm:$0xff] }
  0x9e   : > { %v1594_v16 = vld [vmem:[%s8665_s14 + $0x1100] sm:$0xff]  ;;  %1591 = vst [vmem:[%s8673_s15 + $0x870] sm:$0xff] %v1590_v14  ;;  %1593 = vst [vmem:[%s8673_s15 + $0x878] sm:$0xff] %v1592_v15  ;;  %v1596_v17 = vld [vmem:[%s8665_s14 + $0x1110] sm:$0xff] }
  0x9f   : > { %1595 = vst [vmem:[%s8673_s15 + $0x880] sm:$0xff] %v1594_v16  ;;  %v1598_v18 = vld [vmem:[%s8665_s14 + $0x1120] sm:$0xff]  ;;  %v1600_v19 = vld [vmem:[%s8665_s14 + $0x1130] sm:$0xff]  ;;  %1597 = vst [vmem:[%s8673_s15 + $0x888] sm:$0xff] %v1596_v17 }
  0xa0   : > { %1599 = vst [vmem:[%s8673_s15 + $0x890] sm:$0xff] %v1598_v18  ;;  %1601 = vst [vmem:[%s8673_s15 + $0x898] sm:$0xff] %v1600_v19  ;;  %v1602_v20 = vld [vmem:[%s8665_s14 + $0x1140] sm:$0xff]  ;;  %v1604_v21 = vld [vmem:[%s8665_s14 + $0x1150] sm:$0xff] }
  0xa1   : > { %v1606_v22 = vld [vmem:[%s8665_s14 + $0x1160] sm:$0xff]  ;;  %1603 = vst [vmem:[%s8673_s15 + $0x8a0] sm:$0xff] %v1602_v20  ;;  %1605 = vst [vmem:[%s8673_s15 + $0x8a8] sm:$0xff] %v1604_v21  ;;  %v1608_v23 = vld [vmem:[%s8665_s14 + $0x1170] sm:$0xff] }
  0xa2   : > { %1607 = vst [vmem:[%s8673_s15 + $0x8b0] sm:$0xff] %v1606_v22  ;;  %v1610_v24 = vld [vmem:[%s8665_s14 + $0x1180] sm:$0xff]  ;;  %v1612_v25 = vld [vmem:[%s8665_s14 + $0x1190] sm:$0xff]  ;;  %1609 = vst [vmem:[%s8673_s15 + $0x8b8] sm:$0xff] %v1608_v23 }
  0xa3   : > { %1611 = vst [vmem:[%s8673_s15 + $0x8c0] sm:$0xff] %v1610_v24  ;;  %1613 = vst [vmem:[%s8673_s15 + $0x8c8] sm:$0xff] %v1612_v25  ;;  %v1614_v26 = vld [vmem:[%s8665_s14 + $0x11a0] sm:$0xff]  ;;  %v1616_v27 = vld [vmem:[%s8665_s14 + $0x11b0] sm:$0xff] }
  0xa4   : > { %v1618_v28 = vld [vmem:[%s8665_s14 + $0x11c0] sm:$0xff]  ;;  %1615 = vst [vmem:[%s8673_s15 + $0x8d0] sm:$0xff] %v1614_v26  ;;  %1617 = vst [vmem:[%s8673_s15 + $0x8d8] sm:$0xff] %v1616_v27  ;;  %v1620_v29 = vld [vmem:[%s8665_s14 + $0x11d0] sm:$0xff] }
  0xa5   : > { %1619 = vst [vmem:[%s8673_s15 + $0x8e0] sm:$0xff] %v1618_v28  ;;  %v1622_v30 = vld [vmem:[%s8665_s14 + $0x11e0] sm:$0xff]  ;;  %v1624_v31 = vld [vmem:[%s8665_s14 + $0x11f0] sm:$0xff]  ;;  %1621 = vst [vmem:[%s8673_s15 + $0x8e8] sm:$0xff] %v1620_v29 }
  0xa6   : > { %1623 = vst [vmem:[%s8673_s15 + $0x8f0] sm:$0xff] %v1622_v30  ;;  %1625 = vst [vmem:[%s8673_s15 + $0x8f8] sm:$0xff] %v1624_v31  ;;  %v1626_v32 = vld [vmem:[%s8665_s14 + $0x1200] sm:$0xff]  ;;  %v1628_v33 = vld [vmem:[%s8665_s14 + $0x1210] sm:$0xff] }
  0xa7   : > { %v1630_v34 = vld [vmem:[%s8665_s14 + $0x1220] sm:$0xff]  ;;  %1627 = vst [vmem:[%s8673_s15 + $0x900] sm:$0xff] %v1626_v32  ;;  %1629 = vst [vmem:[%s8673_s15 + $0x908] sm:$0xff] %v1628_v33  ;;  %v1632_v35 = vld [vmem:[%s8665_s14 + $0x1230] sm:$0xff] }
  0xa8   : > { %1631 = vst [vmem:[%s8673_s15 + $0x910] sm:$0xff] %v1630_v34  ;;  %v1634_v36 = vld [vmem:[%s8665_s14 + $0x1240] sm:$0xff]  ;;  %v1636_v37 = vld [vmem:[%s8665_s14 + $0x1250] sm:$0xff]  ;;  %1633 = vst [vmem:[%s8673_s15 + $0x918] sm:$0xff] %v1632_v35 }
  0xa9   : > { %1635 = vst [vmem:[%s8673_s15 + $0x920] sm:$0xff] %v1634_v36  ;;  %1637 = vst [vmem:[%s8673_s15 + $0x928] sm:$0xff] %v1636_v37  ;;  %v1638_v38 = vld [vmem:[%s8665_s14 + $0x1260] sm:$0xff]  ;;  %v1640_v39 = vld [vmem:[%s8665_s14 + $0x1270] sm:$0xff] }
  0xaa   : > { %v1642_v40 = vld [vmem:[%s8665_s14 + $0x1280] sm:$0xff]  ;;  %1639 = vst [vmem:[%s8673_s15 + $0x930] sm:$0xff] %v1638_v38  ;;  %1641 = vst [vmem:[%s8673_s15 + $0x938] sm:$0xff] %v1640_v39  ;;  %v1644_v41 = vld [vmem:[%s8665_s14 + $0x1290] sm:$0xff] }
  0xab   : > { %1643 = vst [vmem:[%s8673_s15 + $0x940] sm:$0xff] %v1642_v40  ;;  %v1646_v42 = vld [vmem:[%s8665_s14 + $0x12a0] sm:$0xff]  ;;  %v1648_v43 = vld [vmem:[%s8665_s14 + $0x12b0] sm:$0xff]  ;;  %1645 = vst [vmem:[%s8673_s15 + $0x948] sm:$0xff] %v1644_v41 }
  0xac   : > { %1647 = vst [vmem:[%s8673_s15 + $0x950] sm:$0xff] %v1646_v42  ;;  %1649 = vst [vmem:[%s8673_s15 + $0x958] sm:$0xff] %v1648_v43  ;;  %v1650_v44 = vld [vmem:[%s8665_s14 + $0x12c0] sm:$0xff]  ;;  %v1652_v45 = vld [vmem:[%s8665_s14 + $0x12d0] sm:$0xff] }
  0xad   : > { %v1654_v46 = vld [vmem:[%s8665_s14 + $0x12e0] sm:$0xff]  ;;  %1651 = vst [vmem:[%s8673_s15 + $0x960] sm:$0xff] %v1650_v44  ;;  %1653 = vst [vmem:[%s8673_s15 + $0x968] sm:$0xff] %v1652_v45  ;;  %v1656_v47 = vld [vmem:[%s8665_s14 + $0x12f0] sm:$0xff] }
  0xae   : > { %1655 = vst [vmem:[%s8673_s15 + $0x970] sm:$0xff] %v1654_v46  ;;  %v1658_v48 = vld [vmem:[%s8665_s14 + $0x1300] sm:$0xff]  ;;  %v1660_v49 = vld [vmem:[%s8665_s14 + $0x1310] sm:$0xff]  ;;  %1657 = vst [vmem:[%s8673_s15 + $0x978] sm:$0xff] %v1656_v47 }
  0xaf   : > { %1659 = vst [vmem:[%s8673_s15 + $0x980] sm:$0xff] %v1658_v48  ;;  %1661 = vst [vmem:[%s8673_s15 + $0x988] sm:$0xff] %v1660_v49  ;;  %v1662_v50 = vld [vmem:[%s8665_s14 + $0x1320] sm:$0xff]  ;;  %v1664_v51 = vld [vmem:[%s8665_s14 + $0x1330] sm:$0xff] }
  0xb0   : > { %v1666_v52 = vld [vmem:[%s8665_s14 + $0x1340] sm:$0xff]  ;;  %1663 = vst [vmem:[%s8673_s15 + $0x990] sm:$0xff] %v1662_v50  ;;  %1665 = vst [vmem:[%s8673_s15 + $0x998] sm:$0xff] %v1664_v51  ;;  %v1668_v53 = vld [vmem:[%s8665_s14 + $0x1350] sm:$0xff] }
  0xb1   : > { %1667 = vst [vmem:[%s8673_s15 + $0x9a0] sm:$0xff] %v1666_v52  ;;  %v1670_v54 = vld [vmem:[%s8665_s14 + $0x1360] sm:$0xff]  ;;  %v1672_v55 = vld [vmem:[%s8665_s14 + $0x1370] sm:$0xff]  ;;  %1669 = vst [vmem:[%s8673_s15 + $0x9a8] sm:$0xff] %v1668_v53 }
  0xb2   : > { %1671 = vst [vmem:[%s8673_s15 + $0x9b0] sm:$0xff] %v1670_v54  ;;  %1673 = vst [vmem:[%s8673_s15 + $0x9b8] sm:$0xff] %v1672_v55  ;;  %v1674_v56 = vld [vmem:[%s8665_s14 + $0x1380] sm:$0xff]  ;;  %v1676_v57 = vld [vmem:[%s8665_s14 + $0x1390] sm:$0xff] }
  0xb3   : > { %v1678_v58 = vld [vmem:[%s8665_s14 + $0x13a0] sm:$0xff]  ;;  %1675 = vst [vmem:[%s8673_s15 + $0x9c0] sm:$0xff] %v1674_v56  ;;  %1677 = vst [vmem:[%s8673_s15 + $0x9c8] sm:$0xff] %v1676_v57  ;;  %v1680_v59 = vld [vmem:[%s8665_s14 + $0x13b0] sm:$0xff] }
  0xb4   : > { %1679 = vst [vmem:[%s8673_s15 + $0x9d0] sm:$0xff] %v1678_v58  ;;  %v1682_v60 = vld [vmem:[%s8665_s14 + $0x13c0] sm:$0xff]  ;;  %v1684_v61 = vld [vmem:[%s8665_s14 + $0x13d0] sm:$0xff]  ;;  %1681 = vst [vmem:[%s8673_s15 + $0x9d8] sm:$0xff] %v1680_v59 }
  0xb5   : > { %1683 = vst [vmem:[%s8673_s15 + $0x9e0] sm:$0xff] %v1682_v60  ;;  %1685 = vst [vmem:[%s8673_s15 + $0x9e8] sm:$0xff] %v1684_v61  ;;  %v1686_v62 = vld [vmem:[%s8665_s14 + $0x13e0] sm:$0xff]  ;;  %v1688_v63 = vld [vmem:[%s8665_s14 + $0x13f0] sm:$0xff] }
  0xb6   : > { %v1690_v0 = vld [vmem:[%s8665_s14 + $0x1400] sm:$0xff]  ;;  %1687 = vst [vmem:[%s8673_s15 + $0x9f0] sm:$0xff] %v1686_v62  ;;  %1689 = vst [vmem:[%s8673_s15 + $0x9f8] sm:$0xff] %v1688_v63  ;;  %v1692_v1 = vld [vmem:[%s8665_s14 + $0x1410] sm:$0xff] }
  0xb7   : > { %1691 = vst [vmem:[%s8673_s15 + $0xa00] sm:$0xff] %v1690_v0  ;;  %v1694_v2 = vld [vmem:[%s8665_s14 + $0x1420] sm:$0xff]  ;;  %v1696_v3 = vld [vmem:[%s8665_s14 + $0x1430] sm:$0xff]  ;;  %1693 = vst [vmem:[%s8673_s15 + $0xa08] sm:$0xff] %v1692_v1 }
  0xb8   : > { %1695 = vst [vmem:[%s8673_s15 + $0xa10] sm:$0xff] %v1694_v2  ;;  %1697 = vst [vmem:[%s8673_s15 + $0xa18] sm:$0xff] %v1696_v3  ;;  %v1698_v4 = vld [vmem:[%s8665_s14 + $0x1440] sm:$0xff]  ;;  %v1700_v5 = vld [vmem:[%s8665_s14 + $0x1450] sm:$0xff] }
  0xb9   : > { %v1702_v6 = vld [vmem:[%s8665_s14 + $0x1460] sm:$0xff]  ;;  %1699 = vst [vmem:[%s8673_s15 + $0xa20] sm:$0xff] %v1698_v4  ;;  %1701 = vst [vmem:[%s8673_s15 + $0xa28] sm:$0xff] %v1700_v5  ;;  %v1704_v7 = vld [vmem:[%s8665_s14 + $0x1470] sm:$0xff] }
  0xba   : > { %1703 = vst [vmem:[%s8673_s15 + $0xa30] sm:$0xff] %v1702_v6  ;;  %v1706_v8 = vld [vmem:[%s8665_s14 + $0x1480] sm:$0xff]  ;;  %v1708_v9 = vld [vmem:[%s8665_s14 + $0x1490] sm:$0xff]  ;;  %1705 = vst [vmem:[%s8673_s15 + $0xa38] sm:$0xff] %v1704_v7 }
  0xbb   : > { %1707 = vst [vmem:[%s8673_s15 + $0xa40] sm:$0xff] %v1706_v8  ;;  %1709 = vst [vmem:[%s8673_s15 + $0xa48] sm:$0xff] %v1708_v9  ;;  %v1710_v10 = vld [vmem:[%s8665_s14 + $0x14a0] sm:$0xff]  ;;  %v1712_v11 = vld [vmem:[%s8665_s14 + $0x14b0] sm:$0xff] }
  0xbc   : > { %v1714_v12 = vld [vmem:[%s8665_s14 + $0x14c0] sm:$0xff]  ;;  %1711 = vst [vmem:[%s8673_s15 + $0xa50] sm:$0xff] %v1710_v10  ;;  %1713 = vst [vmem:[%s8673_s15 + $0xa58] sm:$0xff] %v1712_v11  ;;  %v1716_v13 = vld [vmem:[%s8665_s14 + $0x14d0] sm:$0xff] }
  0xbd   : > { %1715 = vst [vmem:[%s8673_s15 + $0xa60] sm:$0xff] %v1714_v12  ;;  %v1718_v14 = vld [vmem:[%s8665_s14 + $0x14e0] sm:$0xff]  ;;  %v1720_v15 = vld [vmem:[%s8665_s14 + $0x14f0] sm:$0xff]  ;;  %1717 = vst [vmem:[%s8673_s15 + $0xa68] sm:$0xff] %v1716_v13 }
  0xbe   : > { %1719 = vst [vmem:[%s8673_s15 + $0xa70] sm:$0xff] %v1718_v14  ;;  %1721 = vst [vmem:[%s8673_s15 + $0xa78] sm:$0xff] %v1720_v15  ;;  %v1722_v16 = vld [vmem:[%s8665_s14 + $0x1500] sm:$0xff]  ;;  %v1724_v17 = vld [vmem:[%s8665_s14 + $0x1510] sm:$0xff] }
  0xbf   : > { %v1726_v18 = vld [vmem:[%s8665_s14 + $0x1520] sm:$0xff]  ;;  %1723 = vst [vmem:[%s8673_s15 + $0xa80] sm:$0xff] %v1722_v16  ;;  %1725 = vst [vmem:[%s8673_s15 + $0xa88] sm:$0xff] %v1724_v17  ;;  %v1728_v19 = vld [vmem:[%s8665_s14 + $0x1530] sm:$0xff] }
  0xc0   : > { %1727 = vst [vmem:[%s8673_s15 + $0xa90] sm:$0xff] %v1726_v18  ;;  %v1730_v20 = vld [vmem:[%s8665_s14 + $0x1540] sm:$0xff]  ;;  %v1732_v21 = vld [vmem:[%s8665_s14 + $0x1550] sm:$0xff]  ;;  %1729 = vst [vmem:[%s8673_s15 + $0xa98] sm:$0xff] %v1728_v19 }
  0xc1   : > { %1731 = vst [vmem:[%s8673_s15 + $0xaa0] sm:$0xff] %v1730_v20  ;;  %1733 = vst [vmem:[%s8673_s15 + $0xaa8] sm:$0xff] %v1732_v21  ;;  %v1734_v22 = vld [vmem:[%s8665_s14 + $0x1560] sm:$0xff]  ;;  %v1736_v23 = vld [vmem:[%s8665_s14 + $0x1570] sm:$0xff] }
  0xc2   : > { %v1738_v24 = vld [vmem:[%s8665_s14 + $0x1580] sm:$0xff]  ;;  %1735 = vst [vmem:[%s8673_s15 + $0xab0] sm:$0xff] %v1734_v22  ;;  %1737 = vst [vmem:[%s8673_s15 + $0xab8] sm:$0xff] %v1736_v23  ;;  %v1740_v25 = vld [vmem:[%s8665_s14 + $0x1590] sm:$0xff] }
  0xc3   : > { %1739 = vst [vmem:[%s8673_s15 + $0xac0] sm:$0xff] %v1738_v24  ;;  %v1742_v26 = vld [vmem:[%s8665_s14 + $0x15a0] sm:$0xff]  ;;  %v1744_v27 = vld [vmem:[%s8665_s14 + $0x15b0] sm:$0xff]  ;;  %1741 = vst [vmem:[%s8673_s15 + $0xac8] sm:$0xff] %v1740_v25 }
  0xc4   : > { %1743 = vst [vmem:[%s8673_s15 + $0xad0] sm:$0xff] %v1742_v26  ;;  %1745 = vst [vmem:[%s8673_s15 + $0xad8] sm:$0xff] %v1744_v27  ;;  %v1746_v28 = vld [vmem:[%s8665_s14 + $0x15c0] sm:$0xff]  ;;  %v1748_v29 = vld [vmem:[%s8665_s14 + $0x15d0] sm:$0xff] }
  0xc5   : > { %v1750_v30 = vld [vmem:[%s8665_s14 + $0x15e0] sm:$0xff]  ;;  %1747 = vst [vmem:[%s8673_s15 + $0xae0] sm:$0xff] %v1746_v28  ;;  %1749 = vst [vmem:[%s8673_s15 + $0xae8] sm:$0xff] %v1748_v29  ;;  %v1752_v31 = vld [vmem:[%s8665_s14 + $0x15f0] sm:$0xff] }
  0xc6   : > { %1751 = vst [vmem:[%s8673_s15 + $0xaf0] sm:$0xff] %v1750_v30  ;;  %v1754_v32 = vld [vmem:[%s8665_s14 + $0x1600] sm:$0xff]  ;;  %v1756_v33 = vld [vmem:[%s8665_s14 + $0x1610] sm:$0xff]  ;;  %1753 = vst [vmem:[%s8673_s15 + $0xaf8] sm:$0xff] %v1752_v31 }
  0xc7   : > { %1755 = vst [vmem:[%s8673_s15 + $0xb00] sm:$0xff] %v1754_v32  ;;  %1757 = vst [vmem:[%s8673_s15 + $0xb08] sm:$0xff] %v1756_v33  ;;  %v1758_v34 = vld [vmem:[%s8665_s14 + $0x1620] sm:$0xff]  ;;  %v1760_v35 = vld [vmem:[%s8665_s14 + $0x1630] sm:$0xff] }
  0xc8   : > { %v1762_v36 = vld [vmem:[%s8665_s14 + $0x1640] sm:$0xff]  ;;  %1759 = vst [vmem:[%s8673_s15 + $0xb10] sm:$0xff] %v1758_v34  ;;  %1761 = vst [vmem:[%s8673_s15 + $0xb18] sm:$0xff] %v1760_v35  ;;  %v1764_v37 = vld [vmem:[%s8665_s14 + $0x1650] sm:$0xff] }
  0xc9   : > { %1763 = vst [vmem:[%s8673_s15 + $0xb20] sm:$0xff] %v1762_v36  ;;  %v1766_v38 = vld [vmem:[%s8665_s14 + $0x1660] sm:$0xff]  ;;  %v1768_v39 = vld [vmem:[%s8665_s14 + $0x1670] sm:$0xff]  ;;  %1765 = vst [vmem:[%s8673_s15 + $0xb28] sm:$0xff] %v1764_v37 }
  0xca   : > { %1767 = vst [vmem:[%s8673_s15 + $0xb30] sm:$0xff] %v1766_v38  ;;  %1769 = vst [vmem:[%s8673_s15 + $0xb38] sm:$0xff] %v1768_v39  ;;  %v1770_v40 = vld [vmem:[%s8665_s14 + $0x1680] sm:$0xff]  ;;  %v1772_v41 = vld [vmem:[%s8665_s14 + $0x1690] sm:$0xff] }
  0xcb   : > { %v1774_v42 = vld [vmem:[%s8665_s14 + $0x16a0] sm:$0xff]  ;;  %1771 = vst [vmem:[%s8673_s15 + $0xb40] sm:$0xff] %v1770_v40  ;;  %1773 = vst [vmem:[%s8673_s15 + $0xb48] sm:$0xff] %v1772_v41  ;;  %v1776_v43 = vld [vmem:[%s8665_s14 + $0x16b0] sm:$0xff] }
  0xcc   : > { %1775 = vst [vmem:[%s8673_s15 + $0xb50] sm:$0xff] %v1774_v42  ;;  %v1778_v44 = vld [vmem:[%s8665_s14 + $0x16c0] sm:$0xff]  ;;  %v1780_v45 = vld [vmem:[%s8665_s14 + $0x16d0] sm:$0xff]  ;;  %1777 = vst [vmem:[%s8673_s15 + $0xb58] sm:$0xff] %v1776_v43 }
  0xcd   : > { %1779 = vst [vmem:[%s8673_s15 + $0xb60] sm:$0xff] %v1778_v44  ;;  %1781 = vst [vmem:[%s8673_s15 + $0xb68] sm:$0xff] %v1780_v45  ;;  %v1782_v46 = vld [vmem:[%s8665_s14 + $0x16e0] sm:$0xff]  ;;  %v1784_v47 = vld [vmem:[%s8665_s14 + $0x16f0] sm:$0xff] }
  0xce   : > { %v1786_v48 = vld [vmem:[%s8665_s14 + $0x1700] sm:$0xff]  ;;  %1783 = vst [vmem:[%s8673_s15 + $0xb70] sm:$0xff] %v1782_v46  ;;  %1785 = vst [vmem:[%s8673_s15 + $0xb78] sm:$0xff] %v1784_v47  ;;  %v1788_v49 = vld [vmem:[%s8665_s14 + $0x1710] sm:$0xff] }
  0xcf   : > { %1787 = vst [vmem:[%s8673_s15 + $0xb80] sm:$0xff] %v1786_v48  ;;  %v1790_v50 = vld [vmem:[%s8665_s14 + $0x1720] sm:$0xff]  ;;  %v1792_v51 = vld [vmem:[%s8665_s14 + $0x1730] sm:$0xff]  ;;  %1789 = vst [vmem:[%s8673_s15 + $0xb88] sm:$0xff] %v1788_v49 }
  0xd0   : > { %1791 = vst [vmem:[%s8673_s15 + $0xb90] sm:$0xff] %v1790_v50  ;;  %1793 = vst [vmem:[%s8673_s15 + $0xb98] sm:$0xff] %v1792_v51  ;;  %v1794_v52 = vld [vmem:[%s8665_s14 + $0x1740] sm:$0xff]  ;;  %v1796_v53 = vld [vmem:[%s8665_s14 + $0x1750] sm:$0xff] }
  0xd1   : > { %v1798_v54 = vld [vmem:[%s8665_s14 + $0x1760] sm:$0xff]  ;;  %1795 = vst [vmem:[%s8673_s15 + $0xba0] sm:$0xff] %v1794_v52  ;;  %1797 = vst [vmem:[%s8673_s15 + $0xba8] sm:$0xff] %v1796_v53  ;;  %v1800_v55 = vld [vmem:[%s8665_s14 + $0x1770] sm:$0xff] }
  0xd2   : > { %1799 = vst [vmem:[%s8673_s15 + $0xbb0] sm:$0xff] %v1798_v54  ;;  %v1802_v56 = vld [vmem:[%s8665_s14 + $0x1780] sm:$0xff]  ;;  %v1804_v57 = vld [vmem:[%s8665_s14 + $0x1790] sm:$0xff]  ;;  %1801 = vst [vmem:[%s8673_s15 + $0xbb8] sm:$0xff] %v1800_v55 }
  0xd3   : > { %1803 = vst [vmem:[%s8673_s15 + $0xbc0] sm:$0xff] %v1802_v56  ;;  %1805 = vst [vmem:[%s8673_s15 + $0xbc8] sm:$0xff] %v1804_v57  ;;  %v1806_v58 = vld [vmem:[%s8665_s14 + $0x17a0] sm:$0xff]  ;;  %v1808_v59 = vld [vmem:[%s8665_s14 + $0x17b0] sm:$0xff] }
  0xd4   : > { %v1810_v60 = vld [vmem:[%s8665_s14 + $0x17c0] sm:$0xff]  ;;  %1807 = vst [vmem:[%s8673_s15 + $0xbd0] sm:$0xff] %v1806_v58  ;;  %1809 = vst [vmem:[%s8673_s15 + $0xbd8] sm:$0xff] %v1808_v59  ;;  %v1812_v61 = vld [vmem:[%s8665_s14 + $0x17d0] sm:$0xff] }
  0xd5   : > { %1811 = vst [vmem:[%s8673_s15 + $0xbe0] sm:$0xff] %v1810_v60  ;;  %v1814_v62 = vld [vmem:[%s8665_s14 + $0x17e0] sm:$0xff]  ;;  %v1816_v63 = vld [vmem:[%s8665_s14 + $0x17f0] sm:$0xff]  ;;  %1813 = vst [vmem:[%s8673_s15 + $0xbe8] sm:$0xff] %v1812_v61 }
  0xd6   : > { %1815 = vst [vmem:[%s8673_s15 + $0xbf0] sm:$0xff] %v1814_v62  ;;  %1817 = vst [vmem:[%s8673_s15 + $0xbf8] sm:$0xff] %v1816_v63  ;;  %v1818_v0 = vld [vmem:[%s8665_s14 + $0x1800] sm:$0xff]  ;;  %v1820_v1 = vld [vmem:[%s8665_s14 + $0x1810] sm:$0xff] }
  0xd7   : > { %v1822_v2 = vld [vmem:[%s8665_s14 + $0x1820] sm:$0xff]  ;;  %1819 = vst [vmem:[%s8673_s15 + $0xc00] sm:$0xff] %v1818_v0  ;;  %1821 = vst [vmem:[%s8673_s15 + $0xc08] sm:$0xff] %v1820_v1  ;;  %v1824_v3 = vld [vmem:[%s8665_s14 + $0x1830] sm:$0xff] }
  0xd8   : > { %1823 = vst [vmem:[%s8673_s15 + $0xc10] sm:$0xff] %v1822_v2  ;;  %v1826_v4 = vld [vmem:[%s8665_s14 + $0x1840] sm:$0xff]  ;;  %v1828_v5 = vld [vmem:[%s8665_s14 + $0x1850] sm:$0xff]  ;;  %1825 = vst [vmem:[%s8673_s15 + $0xc18] sm:$0xff] %v1824_v3 }
  0xd9   : > { %1827 = vst [vmem:[%s8673_s15 + $0xc20] sm:$0xff] %v1826_v4  ;;  %1829 = vst [vmem:[%s8673_s15 + $0xc28] sm:$0xff] %v1828_v5  ;;  %v1830_v6 = vld [vmem:[%s8665_s14 + $0x1860] sm:$0xff]  ;;  %v1832_v7 = vld [vmem:[%s8665_s14 + $0x1870] sm:$0xff] }
  0xda   : > { %v1834_v8 = vld [vmem:[%s8665_s14 + $0x1880] sm:$0xff]  ;;  %1831 = vst [vmem:[%s8673_s15 + $0xc30] sm:$0xff] %v1830_v6  ;;  %1833 = vst [vmem:[%s8673_s15 + $0xc38] sm:$0xff] %v1832_v7  ;;  %v1836_v9 = vld [vmem:[%s8665_s14 + $0x1890] sm:$0xff] }
  0xdb   : > { %1835 = vst [vmem:[%s8673_s15 + $0xc40] sm:$0xff] %v1834_v8  ;;  %v1838_v10 = vld [vmem:[%s8665_s14 + $0x18a0] sm:$0xff]  ;;  %v1840_v11 = vld [vmem:[%s8665_s14 + $0x18b0] sm:$0xff]  ;;  %1837 = vst [vmem:[%s8673_s15 + $0xc48] sm:$0xff] %v1836_v9 }
  0xdc   : > { %1839 = vst [vmem:[%s8673_s15 + $0xc50] sm:$0xff] %v1838_v10  ;;  %1841 = vst [vmem:[%s8673_s15 + $0xc58] sm:$0xff] %v1840_v11  ;;  %v1842_v12 = vld [vmem:[%s8665_s14 + $0x18c0] sm:$0xff]  ;;  %v1844_v13 = vld [vmem:[%s8665_s14 + $0x18d0] sm:$0xff] }
  0xdd   : > { %v1846_v14 = vld [vmem:[%s8665_s14 + $0x18e0] sm:$0xff]  ;;  %1843 = vst [vmem:[%s8673_s15 + $0xc60] sm:$0xff] %v1842_v12  ;;  %1845 = vst [vmem:[%s8673_s15 + $0xc68] sm:$0xff] %v1844_v13  ;;  %v1848_v15 = vld [vmem:[%s8665_s14 + $0x18f0] sm:$0xff] }
  0xde   : > { %1847 = vst [vmem:[%s8673_s15 + $0xc70] sm:$0xff] %v1846_v14  ;;  %1849 = vst [vmem:[%s8673_s15 + $0xc78] sm:$0xff] %v1848_v15 }
  0xdf PF: > { %p6879_p10 = scmp.ge.s32.totalorder %s8569_s24, 1  ;;  %p1862_p11 = scmp.lt.s32.totalorder %s8569_s24, 3 }
  0xe1   : > { %p1863_p12 = pnand %p6879_p10, %p1862_p11 }
  0xe2   : > { %s9484_s9 = sand.u32 (!%p1863_p12), 1, %s8561_s22   ;;  %s7799_s16 = sshll.u32 (!%p1863_p12), %s8631_s25, 6 }
  0xe3   : > { %1866 = sbr.rel (%p1863_p12) target bundleno = 1086 (0x43e), region = 74  ;;  %s6880_s15 = sshll.u32 (!%p1863_p12), %s9484_s9, 2 }
  0xe4   : > { %s7802_s14 = smul.u32 (!%p1863_p12), 3200, %s9484_s9  ;;  %s1906_s17 = scalar_lea.vmem (!%p1863_p12), [#allocation5], %s6880_s15 }
  0xe5   : > { %s6768_s18 = sshll.u32 (!%p1863_p12), %s1906_s17, 4  ;;  %s10810_s19 = scalar_lea.vmem (!%p1863_p12), [#allocation3], %s6880_s15  ;;  %s10818_s18 = int_to_ptr.vmem [resolvable:$true] %s6768_s18 }
  0xe6   : > { %s9505_s29 = scalar_lea.vmem (!%p1863_p12), [#allocation2], %s7802_s14  ;;  %s6754_s20 = sshll.u32 (!%p1863_p12), %s10810_s19, 4  ;;  %s10827_s20 = int_to_ptr.vmem [resolvable:$true] %s6754_s20 }
  0xe7   : > { %s10816_s10 = scalar_lea.hbm (!%p1863_p12), %s10896_s6, %s7799_s16  ;;  %s6740_s12 = scalar_lea.sflag (!%p1863_p12), [#allocation6], %s9484_s9 }
  0xe8   : > { %v1926_v16 = vld [vmem:[%s10891_s1 + $0x10] sm:$0xff]  ;;  %v1924_v17 = vld [vmem:[%s10891_s1] sm:$0xff]  ;;  %v8571_v18 = vmov 0   ;;  %v1927_v19 = vld [vmem:[%s10891_s1 + $0x18] sm:$0xff]  ;;  %vm2324_vm0 = vcmask 1041408   ;;  %vm1997_vm1 = vcmask 556032  }
  0xe9   : > { %7850 = vset.pattern.permute.xlu1 %v8571_v18  ;;  %7849 = vset.pattern.permute.xlu0 %v8571_v18  ;;  %v1925_v20 = vld [vmem:[%s10891_s1 + $0x8] sm:$0xff]  ;;  %v6888_v21 = vld [vmem:[%s10892_s2 + $0x1] ss:$0 sm:$0xff]  ;;  %v6883_v22 = vld [vmem:[%s10892_s2] ss:$0 sm:$0xff]  ;;  %vm2190_vm10 = vcmask 1041409  }
  0xea   : > { %2079 = vperm.xlu0 %7849, %v1926_v16   ;;  %1974 = vperm.xlu1 %7850, %v1924_v17   ;;  %v1928_v23 = vld [vmem:[%s10891_s1 + $0x20] sm:$0xff]  ;;  %v1929_v24 = vld [vmem:[%s10891_s1 + $0x28] sm:$0xff]  ;;  %v1930_v25 = vld [vmem:[%s10891_s1 + $0x30] sm:$0xff]  ;;  %s8479_s13 = scalar_lea.vmem %s10818_s18, 64 }
  0xeb   : > { %v1931_v26 = vld [vmem:[%s10891_s1 + $0x38] sm:$0xff]  ;;  %v6974_v28 = vld [vmem:[%s10892_s2 + $0x2] ss:$0 sm:$0xff]  ;;  %v7032_v29 = vld [vmem:[%s10892_s2 + $0x3] ss:$0 sm:$0xff]  ;;  %p8480_p0 = scmp.ne.s32.totalorder %s10818_s18, %s8479_s13 }
  0xec   : > { %v7851_v27 = vld [vmem:[%s9505_s29 + $0x13c] ss:$8 sps:$4 sm:$0xff]   ;;  %v7855_v31 = vld [vmem:[%s9505_s29 + $0x138] ss:$8 sps:$4 sm:$0xff]   ;;  %v7857_v33 = vld [vmem:[%s9505_s29 + $0x12c] ss:$8 sps:$4 sm:$0xff]  }
  0xed   : > { %v7853_v30 = vld [vmem:[%s9505_s29 + $0x74] ss:$8 sps:$4 sm:$0xff]   ;;  %v7856_v32 = vld [vmem:[%s9505_s29 + $0x70] ss:$8 sps:$4 sm:$0xff]   ;;  %2331 = vmatprep.subr.bf16.mxu0 %v7851_v27  ;;  %v7859_v34 = vld [vmem:[%s9505_s29 + $0x64] ss:$8 sps:$4 sm:$0xff]   ;;  %p8481_p1 = pnand %p8480_p0, %p8649_p6 }
  0xee   : > { %2084 = vperm.xlu0 %7849, %v1927_v19   ;;  %1979 = vperm.xlu1 %7850, %v1925_v20   ;;  %v7861_v35 = vld [vmem:[%s9505_s29 + $0x128] ss:$8 sps:$4 sm:$0xff]   ;;  %v1932_v36 = vld [vmem:[%s10891_s1 + $0x40] sm:$0xff]  ;;  %v7865_v40 = vld [vmem:[%s9505_s29 + $0x54] ss:$8 sps:$4 sm:$0xff]  }
  0xef   : > { %2519 = vmatprep.subr.bf16.mxu1 %v7853_v30  ;;  %2332 = vmatpush1.bf16.msra.mxu0 %v7855_v31  ;;  %v1933_v37 = vld [vmem:[%s10891_s1 + $0x48] sm:$0xff]  ;;  %v7863_v39 = vld [vmem:[%s9505_s29 + $0x11c] ss:$8 sps:$4 sm:$0xff]   ;;  %v7867_v41 = vld [vmem:[%s9505_s29 + $0x118] ss:$8 sps:$4 sm:$0xff]   ;;  %p8482_p2 = pneg %p8481_p1 }
  0xf0   : > { %2520 = vmatpush1.bf16.msra.mxu1 %v7856_v32  ;;  %2333 = vmatprep.subr.bf16.mxu0 %v7857_v33  ;;  %v7862_v38 = vld [vmem:[%s9505_s29 + $0x60] ss:$8 sps:$4 sm:$0xff]   ;;  %v7868_v42 = vld [vmem:[%s9505_s29 + $0x50] ss:$8 sps:$4 sm:$0xff]   ;;  %v7869_v43 = vld [vmem:[%s9505_s29 + $0x10c] ss:$8 sps:$4 sm:$0xff]  }
  0xf1   : > { %2521 = vmatprep.subr.bf16.mxu1 %v7859_v34  ;;  %v7871_v44 = vld [vmem:[%s9505_s29 + $0x44] ss:$8 sps:$4 sm:$0xff]   ;;  %v1934_v45 = vld [vmem:[%s10891_s1 + $0x50] sm:$0xff]  ;;  %v1935_v46 = vld [vmem:[%s10891_s1 + $0x58] sm:$0xff] }
  0xf2   : > { %2133 = vperm.xlu0 %7849, %v6888_v21   ;;  %2029 = vperm.xlu1 %7850, %v6883_v22   ;;  %v7873_v47 = vld [vmem:[%s9505_s29 + $0x108] ss:$8 sps:$4 sm:$0xff]   ;;  %v7875_v49 = vld [vmem:[%s9505_s29 + $0xfc] ss:$8 sps:$4 sm:$0xff]   ;;  %v7879_v53 = vld [vmem:[%s9505_s29 + $0xf8] ss:$8 sps:$4 sm:$0xff]  }
  0xf3   : > { %2334 = vmatpush1.bf16.msra.mxu0 %v7861_v35  ;;  %v7874_v48 = vld [vmem:[%s9505_s29 + $0x40] ss:$8 sps:$4 sm:$0xff]   ;;  %v7877_v50 = vld [vmem:[%s9505_s29 + $0x34] ss:$8 sps:$4 sm:$0xff]   ;;  %v7090_v51 = vld [vmem:[%s10892_s2 + $0x4] ss:$0 sm:$0xff] }
  0xf4   : > { %2522 = vmatpush1.bf16.msra.mxu1 %v7862_v38  ;;  %2335 = vmatprep.subr.bf16.mxu0 %v7863_v39  ;;  %v7148_v52 = vld [vmem:[%s10892_s2 + $0x5] ss:$0 sm:$0xff]  ;;  %v7880_v54 = vld [vmem:[%s9505_s29 + $0x30] ss:$8 sps:$4 sm:$0xff]   ;;  %v7881_v55 = vld [vmem:[%s9505_s29 + $0xec] ss:$8 sps:$4 sm:$0xff]  }
  0xf5   : > { %2523 = vmatprep.subr.bf16.mxu1 %v7865_v40  ;;  %v7883_v56 = vld [vmem:[%s9505_s29 + $0x24] ss:$8 sps:$4 sm:$0xff]   ;;  %v7885_v59 = vld [vmem:[%s9505_s29 + $0xe8] ss:$8 sps:$4 sm:$0xff]   ;;  %v7889_v62 = vld [vmem:[%s9505_s29 + $0x14] ss:$8 sps:$4 sm:$0xff]  }
  0xf6   : > { %2562 = vperm.xlu0 %7849, %v1928_v23   ;;  %2567 = vperm.xlu1 %7850, %v1929_v24   ;;  %v1936_v57 = vld [vmem:[%s10891_s1 + $0x60] sm:$0xff]  ;;  %v1937_v58 = vld [vmem:[%s10891_s1 + $0x68] sm:$0xff]  ;;  %v1938_v63 = vld [vmem:[%s10891_s1 + $0x70] sm:$0xff] }
  0xf7   : > { %2336 = vmatpush1.bf16.msra.mxu0 %v7867_v41  ;;  %v7886_v60 = vld [vmem:[%s9505_s29 + $0x20] ss:$8 sps:$4 sm:$0xff]   ;;  %v7887_v61 = vld [vmem:[%s9505_s29 + $0xdc] ss:$8 sps:$4 sm:$0xff]   ;;  %v7892_v2 = vld [vmem:[%s9505_s29 + $0x10] ss:$8 sps:$4 sm:$0xff]  }
  0xf8   : > { %2524 = vmatpush1.bf16.msra.mxu1 %v7868_v42  ;;  %2337 = vmatprep.subr.bf16.mxu0 %v7869_v43  ;;  %v1939_v0 = vld [vmem:[%s10891_s1 + $0x78] sm:$0xff]  ;;  %v7893_v3 = vld [vmem:[%s9505_s29 + $0xcc] ss:$8 sps:$4 sm:$0xff]   ;;  %v7206_v5 = vld [vmem:[%s10892_s2 + $0x6] ss:$0 sm:$0xff] }
  0xf9   : > { %2525 = vmatprep.subr.bf16.mxu1 %v7871_v44  ;;  %v7891_v1 = vld [vmem:[%s9505_s29 + $0xd8] ss:$8 sps:$4 sm:$0xff]   ;;  %v7895_v4 = vld [vmem:[%s9505_s29 + $0x4] ss:$8 sps:$4 sm:$0xff]   ;;  %v7897_v9 = vld [vmem:[%s9505_s29 + $0xc8] ss:$8 sps:$4 sm:$0xff]  }
  0xfa   : > { %2857 = vperm.xlu0 %7849, %v1930_v25   ;;  %2862 = vperm.xlu1 %7850, %v1931_v26   ;;  %v6917_v6 = vld [vmem:[%s9505_s29 + $0x188] sm:$0x33]  ;;  %v7264_v7 = vld [vmem:[%s10892_s2 + $0x7] ss:$0 sm:$0xff]  ;;  %v2076_v8 = vld [vmem:[%s9505_s29 + $0xc0] sm:$0x33] }
  0xfb   : > { %2338 = vmatpush1.bf16.msra.mxu0 %v7873_v47  ;;  %v7898_v10 = vld [vmem:[%s9505_s29] ss:$8 sps:$4 sm:$0xff]   ;;  %v6943_v11 = vcombine.high %v6917_v6, %v6917_v6  ;;  %v6971_v14 = vcombine.high %v2076_v8, %v2076_v8  ;;  %v6942_v15 = vcombine.low %v6917_v6, %v6917_v6  ;;  %v6970_v16 = vcombine.low %v2076_v8, %v2076_v8  ;;  %v7903_v17 = vld [vmem:[%s9505_s29 + $0x17c] ss:$8 sps:$4 sm:$0xff]   ;;  %v1942_v19 = vld [vmem:[%s10891_s1 + $0x90] sm:$0xff] }
  0xfc   : > { %2526 = vmatpush1.bf16.msra.mxu1 %v7874_v48  ;;  %2339 = vmatprep.subr.bf16.mxu0 %v7875_v49  ;;  %v1940_v12 = vld [vmem:[%s10891_s1 + $0x80] sm:$0xff]  ;;  %v1941_v13 = vld [vmem:[%s10891_s1 + $0x88] sm:$0xff]  ;;  %v7905_v18 = vld [vmem:[%s9505_s29 + $0xb4] ss:$8 sps:$4 sm:$0xff]  }
  0xfd   : > { %2527 = vmatprep.subr.bf16.mxu1 %v7877_v50  ;;  %v1943_v20 = vld [vmem:[%s10891_s1 + $0x98] sm:$0xff]  ;;  %v2326_v21 = vsel %vm2324_vm0, %v6942_v15, 0  ;;  %v2514_v22 = vsel %vm2324_vm0, %v6970_v16, 0  ;;  %v7909_v25 = vld [vmem:[%s9505_s29 + $0x16c] ss:$8 sps:$4 sm:$0xff]   ;;  %v1944_v31 = vld [vmem:[%s10891_s1 + $0xa0] sm:$0xff] }
  0xfe   : > { %2616 = vperm.xlu0 %7849, %v6974_v28   ;;  %2911 = vperm.xlu1 %7850, %v7032_v29   ;;  %v7907_v23 = vld [vmem:[%s9505_s29 + $0x178] ss:$8 sps:$4 sm:$0xff]   ;;  %v7911_v26 = vld [vmem:[%s9505_s29 + $0xa4] ss:$8 sps:$4 sm:$0xff]   ;;  %v7322_v27 = vld [vmem:[%s10892_s2 + $0x8] ss:$0 sm:$0xff] }
  0xff   : > { %2340 = vmatpush1.bf16.msra.mxu0 %v7879_v53  ;;  %v7908_v24 = vld [vmem:[%s9505_s29 + $0xb0] ss:$8 sps:$4 sm:$0xff]   ;;  %v7380_v28 = vld [vmem:[%s10892_s2 + $0x9] ss:$0 sm:$0xff]  ;;  %v7915_v33 = vld [vmem:[%s9505_s29 + $0x15c] ss:$8 sps:$4 sm:$0xff]  }
 0x100   : > { %2528 = vmatpush1.bf16.msra.mxu1 %v7880_v54  ;;  %2341 = vmatprep.subr.bf16.mxu0 %v7881_v55  ;;  %v7913_v29 = vld [vmem:[%s9505_s29 + $0x168] ss:$8 sps:$4 sm:$0xff]   ;;  %v7917_v34 = vld [vmem:[%s9505_s29 + $0x94] ss:$8 sps:$4 sm:$0xff]   ;;  %v7919_v35 = vld [vmem:[%s9505_s29 + $0x158] ss:$8 sps:$4 sm:$0xff]  }
 0x101   : > { %2529 = vmatprep.subr.bf16.mxu1 %v7883_v56  ;;  %v7914_v30 = vld [vmem:[%s9505_s29 + $0xa0] ss:$8 sps:$4 sm:$0xff]   ;;  %v1947_v38 = vld [vmem:[%s10891_s1 + $0xb8] sm:$0xff]  ;;  %v7921_v39 = vld [vmem:[%s9505_s29 + $0x14c] ss:$8 sps:$4 sm:$0xff]  }
 0x102   : > { %3152 = vperm.xlu0 %7849, %v1932_v36   ;;  %3157 = vperm.xlu1 %7850, %v1933_v37   ;;  %v1945_v32 = vld [vmem:[%s10891_s1 + $0xa8] sm:$0xff]  ;;  %v7920_v36 = vld [vmem:[%s9505_s29 + $0x90] ss:$8 sps:$4 sm:$0xff]  }
 0x103   : > { %2342 = vmatpush1.bf16.msra.mxu0 %v7885_v59  ;;  %v1946_v37 = vld [vmem:[%s10891_s1 + $0xb0] sm:$0xff]  ;;  %v7923_v40 = vld [vmem:[%s9505_s29 + $0x84] ss:$8 sps:$4 sm:$0xff]   ;;  %v7926_v42 = vld [vmem:[%s9505_s29 + $0x80] ss:$8 sps:$4 sm:$0xff]  }
 0x104   : > { %2530 = vmatpush1.bf16.msra.mxu1 %v7886_v60  ;;  %2343 = vmatprep.subr.bf16.mxu0 %v7887_v61  ;;  %v7925_v41 = vld [vmem:[%s9505_s29 + $0x148] ss:$8 sps:$4 sm:$0xff]   ;;  %v1951_v48 = vld [vmem:[%s10891_s1 + $0xd8] sm:$0xff]  ;;  %v7554_v49 = vld [vmem:[%s10892_s2 + $0xc] ss:$0 sm:$0xff] }
 0x105   : > { %2531 = vmatprep.subr.bf16.mxu1 %v7889_v62  ;;  %v7438_v43 = vld [vmem:[%s10892_s2 + $0xa] ss:$0 sm:$0xff]  ;;  %v7496_v44 = vld [vmem:[%s10892_s2 + $0xb] ss:$0 sm:$0xff]  ;;  %v1950_v47 = vld [vmem:[%s10891_s1 + $0xd0] sm:$0xff] }
 0x106   : > { %3447 = vperm.xlu0 %7849, %v1934_v45   ;;  %3452 = vperm.xlu1 %7850, %v1935_v46   ;;  %v1948_v45 = vld [vmem:[%s10891_s1 + $0xc0] sm:$0xff]  ;;  %v1949_v46 = vld [vmem:[%s10891_s1 + $0xc8] sm:$0xff]  ;;  %v1954_v53 = vld [vmem:[%s10891_s1 + $0xf0] sm:$0xff] }
 0x107   : > { %2344 = vmatpush1.bf16.msra.mxu0 %v7891_v1  ;;  %v7612_v50 = vld [vmem:[%s10892_s2 + $0xd] ss:$0 sm:$0xff]  ;;  %v1955_v54 = vld [vmem:[%s10891_s1 + $0xf8] sm:$0xff]  ;;  %v7670_v55 = vld [vmem:[%s10892_s2 + $0xe] ss:$0 sm:$0xff] }
 0x108   : > { %2532 = vmatpush1.bf16.msra.mxu1 %v7892_v2  ;;  %2345 = vmatprep.subr.bf16.mxu0 %v7893_v3  ;;  %v7728_v56 = vld [vmem:[%s10892_s2 + $0xf] ss:$0 sm:$0xff]  ;;  %v1916_v1 = vld [vmem:[%s10890_s0] sm:$0xff]  ;;  %v9697_v6 = vld [vmem:[%s10890_s0 + $0x10] sm:$0xff] }
 0x109   : > { %2533 = vmatprep.subr.bf16.mxu1 %v7895_v4  ;;  %v1920_v4 = vld [vmem:[%s10890_s0 + $0x20] sm:$0xff] }
 0x10a   : > { %3206 = vperm.xlu0 %7849, %v7090_v51   ;;  %3501 = vperm.xlu1 %7850, %v7148_v52   ;;  %v1952_v51 = vld [vmem:[%s10891_s1 + $0xe0] sm:$0xff]  ;;  %v1953_v52 = vld [vmem:[%s10891_s1 + $0xe8] sm:$0xff] }
 0x10b   : > { %2346 = vmatpush1.bf16.msra.mxu0 %v7897_v9 }
 0x10c   : > { %2534 = vmatpush1.bf16.msra.mxu1 %v7898_v10  ;;  %6944 = vmatprep.subr.msk.bf16.mxu0 %vm2324_vm0, %v6943_v11 }
 0x10d   : > { %6972 = vmatprep.subr.msk.bf16.mxu1 %vm2324_vm0, %v6971_v14 }
 0x10e   : > { %3742 = vperm.xlu0 %7849, %v1936_v57   ;;  %3747 = vperm.xlu1 %7850, %v1937_v58   ;;  %v7929_v57 = vld [vmem:[%s9505_s29 + $0x204] ss:$8 sps:$4 sm:$0xff]  }
 0x10f   : > { %2354 = vmatpush2.bf16.msra.mxu0 %v2326_v21  ;;  %v7932_v58 = vld [vmem:[%s9505_s29 + $0x2cc] ss:$8 sps:$4 sm:$0xff]   ;;  %v9728_v21 = vld [vmem:[%s10890_s0 + $0x18] sm:$0xff] }
 0x110   : > { %2542 = vmatpush2.bf16.msra.mxu1 %v2514_v22  ;;  %2355 = vmatprep.subr.bf16.mxu0 %v7903_v17 }
 0x111   : > { %2543 = vmatprep.subr.bf16.mxu1 %v7905_v18  ;;  %v9722_v18 = vld [vmem:[%s10890_s0 + $0x28] sm:$0xff] }
 0x112   : > { %4037 = vperm.xlu0 %7849, %v1938_v63   ;;  %4042 = vperm.xlu1 %7850, %v1939_v0  }
 0x113   : > { %2356 = vmatpush2.bf16.msra.mxu0 %v7907_v23 }
 0x114   : > { %2544 = vmatpush2.bf16.msra.mxu1 %v7908_v24  ;;  %2357 = vmatprep.subr.bf16.mxu0 %v7909_v25 }
 0x115   : > { %2545 = vmatprep.subr.bf16.mxu1 %v7911_v26 }
 0x116   : > { %3796 = vperm.xlu0 %7849, %v7206_v5   ;;  %4091 = vperm.xlu1 %7850, %v7264_v7   ;;  %v9702_v7 = vld [vmem:[%s10890_s0 + $0x30] sm:$0xff] }
 0x117   : > { %2358 = vmatpush2.bf16.msra.mxu0 %v7913_v29 }
 0x118   : > { %2546 = vmatpush2.bf16.msra.mxu1 %v7914_v30  ;;  %2359 = vmatprep.subr.bf16.mxu0 %v7915_v33  ;;  %v9739_v30 = vld [vmem:[%s10890_s0 + $0x38] sm:$0xff] }
 0x119   : > { %2547 = vmatprep.subr.bf16.mxu1 %v7917_v34 }
 0x11a   : > { %4332 = vperm.xlu0 %7849, %v1940_v12   ;;  %4337 = vperm.xlu1 %7850, %v1941_v13   ;;  %v9714_v12 = vld [vmem:[%s10890_s0 + $0x8] sm:$0xff] }
 0x11b   : > { %2360 = vmatpush2.bf16.msra.mxu0 %v7919_v35 }
 0x11c   : > { %2548 = vmatpush2.bf16.msra.mxu1 %v7920_v36  ;;  %2361 = vmatprep.subr.bf16.mxu0 %v7921_v39 }
 0x11d   : > { %2549 = vmatprep.subr.bf16.mxu1 %v7923_v40 }
 0x11e   : > { %4627 = vperm.xlu0 %7849, %v1942_v19   ;;  %4632 = vperm.xlu1 %7850, %v1943_v20  }
 0x11f   : > { %2362 = vmatpush2.bf16.msra.mxu0 %v7925_v41 }
 0x120   : > { %2550 = vmatpush2.bf16.msra.mxu1 %v7926_v42  ;;  %2812 = vmatprep.subr.bf16.mxu0 %v7929_v57 }
 0x121   : > { %3107 = vmatprep.subr.bf16.mxu1 %v7932_v58 }
 0x122   : > { %4386 = vperm.xlu0 %7849, %v7322_v27   ;;  %4681 = vperm.xlu1 %7850, %v7380_v28  }
 0x126   : > { %4922 = vperm.xlu0 %7849, %v1944_v31   ;;  %4927 = vperm.xlu1 %7850, %v1945_v32  }
 0x12a   : > { %5217 = vperm.xlu0 %7849, %v1946_v37   ;;  %5222 = vperm.xlu1 %7850, %v1947_v38  }
 0x12e   : > { %4976 = vperm.xlu0 %7849, %v7438_v43   ;;  %5271 = vperm.xlu1 %7850, %v7496_v44  }
 0x132   : > { %5512 = vperm.xlu0 %7849, %v1948_v45   ;;  %5517 = vperm.xlu1 %7850, %v1949_v46  }
 0x136   : > { %5807 = vperm.xlu0 %7849, %v1950_v47   ;;  %5812 = vperm.xlu1 %7850, %v1951_v48  }
 0x13a   : > { %5566 = vperm.xlu0 %7849, %v7554_v49   ;;  %5861 = vperm.xlu1 %7850, %v7612_v50  }
 0x13e   : > { %6102 = vperm.xlu0 %7849, %v1952_v51   ;;  %6107 = vperm.xlu1 %7850, %v1953_v52  }
 0x142   : > { %6397 = vperm.xlu0 %7849, %v1954_v53   ;;  %6402 = vperm.xlu1 %7850, %v1955_v54  }
 0x146   : > { %6156 = vperm.xlu0 %7849, %v7670_v55   ;;  %6451 = vperm.xlu1 %7850, %v7728_v56  }
 0x165   : > { %v2080_v59 = vpop.permute.xlu0 %2079  ;;  %v1975_v60 = vpop.permute.xlu1 %1974 }
 0x166   : > { %v2087_v24 = vmul.f32 %v2080_v59, %v1916_v1  ;;  %v2088_v25 = vmul.f32 %v2080_v59, %v9714_v12  ;;  %v2091_v28 = vmul.f32 %v2080_v59, %v1920_v4  ;;  %v2092_v29 = vmul.f32 %v2080_v59, %v9722_v18 }
 0x167   : > { %v1982_v33 = vmul.f32 %v1975_v60, %v1916_v1  ;;  %v1983_v34 = vmul.f32 %v1975_v60, %v9714_v12  ;;  %v1986_v35 = vmul.f32 %v1975_v60, %v1920_v4  ;;  %v1987_v37 = vmul.f32 %v1975_v60, %v9722_v18 }
 0x168   : > { %v2102_v49 = vsel %vm1997_vm1, %v2088_v25, 0.0 }
 0x169   : > { %v2085_v61 = vpop.permute.xlu0 %2084  ;;  %v9677_v62 = vpop.permute.xlu1 %1979 }
 0x16a   : > { %v2089_v41 = vmul.f32 %v2085_v61, %v9697_v6  ;;  %v2090_v42 = vmul.f32 %v2085_v61, %v9728_v21  ;;  %v2093_v43 = vmul.f32 %v2085_v61, %v9702_v7  ;;  %v1984_v45 = vmul.f32 %v9677_v62, %v9697_v6 }
 0x16b   : > { %v2094_v50 = vmul.f32 %v2085_v61, %v9739_v30  ;;  %v1985_v51 = vmul.f32 %v9677_v62, %v9728_v21  ;;  %v1988_v53 = vmul.f32 %v9677_v62, %v9702_v7 }
 0x16c   : > { %v2095_v57 = vadd.f32 %v2089_v41, %v2087_v24  ;;  %v2103_v58 = vsel %vm1997_vm1, %v2090_v42, 0.0  ;;  %v2111_v59 = vadd.f32 %v2093_v43, %v2091_v28 }
 0x16d   : > { %v9679_v63 = vpop.permute.xlu0 %2133  ;;  %v9681_v0 = vpop.permute.xlu1 %2029  ;;  %v2007_v24 = vadd.f32 %v1988_v53, %v1986_v35 }
 0x16f   : > { %v2008_v42 = vrot.slane %v2007_v24, 4 }
 0x171   : > { %v9686_v2 = vpop.permute.xlu0 %2562  ;;  %v9688_v3 = vpop.permute.xlu1 %2567  ;;  %v2009_v53 = vadd.f32 %v2008_v42, %v2007_v24 }
 0x172   : > { %v2570_v5 = vmul.f32 %v9686_v2, %v1916_v1  ;;  %v2574_v8 = vmul.f32 %v9686_v2, %v1920_v4  ;;  %v2572_v9 = vmul.f32 %v9688_v3, %v9697_v6  ;;  %v2576_v10 = vmul.f32 %v9688_v3, %v9702_v7 }
 0x174   : > { %v2578_v13 = vadd.f32 %v2572_v9, %v2570_v5  ;;  %v2594_v14 = vadd.f32 %v2576_v10, %v2574_v8  ;;  %v2118_v9 = vsel %vm1997_vm1, %v2092_v29, 0.0  ;;  %v2119_v10 = vsel %vm1997_vm1, %v2094_v50, 0.0 }
 0x175   : > { %v9709_v11 = vpop.permute.xlu0 %2857  ;;  %v9716_v15 = vpop.permute.xlu1 %2862  ;;  %v2571_v29 = vmul.f32 %v9686_v2, %v9714_v12 }
 0x176   : > { %v2579_v16 = vrot.slane %v2578_v13, 4  ;;  %v2865_v17 = vmul.f32 %v9709_v11, %v1916_v1  ;;  %v2595_v19 = vrot.slane %v2594_v14, 4  ;;  %v2869_v20 = vmul.f32 %v9709_v11, %v1920_v4 }
 0x177   : > { %v2867_v23 = vmul.f32 %v9716_v15, %v9697_v6  ;;  %v2871_v27 = vmul.f32 %v9716_v15, %v9702_v7  ;;  %v1990_v4 = vadd.f32 %v1984_v45, %v1982_v33 }
 0x178   : > { %v2580_v22 = vadd.f32 %v2579_v16, %v2578_v13  ;;  %v2596_v26 = vadd.f32 %v2595_v19, %v2594_v14  ;;  %v1989_v13 = vmul.f32 %v9677_v62, %v9739_v30  ;;  %v2104_v16 = vadd.f32 %v2103_v58, %v2102_v49 }
 0x179   : > { %v2873_v31 = vadd.f32 %v2867_v23, %v2865_v17  ;;  %v2889_v36 = vadd.f32 %v2871_v27, %v2869_v20  ;;  %v9755_v60 = vpop.permute.xlu0 %2616  ;;  %v1999_v17 = vsel %vm1997_vm1, %v1985_v51, 0.0  ;;  %v2112_v23 = vrot.slane %v2111_v59, 4 }
 0x17a   : > { %v2581_v32 = vrot.slane %v2580_v22, 2  ;;  %v2597_v40 = vrot.slane %v2596_v26, 2  ;;  %v2120_v27 = vadd.f32 %v2119_v10, %v2118_v9  ;;  %v1991_v28 = vrot.slane %v1990_v4, 4 }
 0x17b   : > { %v2874_v38 = vrot.slane %v2873_v31, 4  ;;  %v2890_v44 = vrot.slane %v2889_v36, 4  ;;  %v2575_v62 = vmul.f32 %v9686_v2, %v9722_v18  ;;  %v2113_v41 = vadd.f32 %v2112_v23, %v2111_v59 }
 0x17c   : > { %v2582_v39 = vadd.f32 %v2581_v32, %v2580_v22  ;;  %v2598_v48 = vadd.f32 %v2597_v40, %v2596_v26  ;;  %v2096_v22 = vrot.slane %v2095_v57, 4  ;;  %v1998_v26 = vsel %vm1997_vm1, %v1983_v34, 0.0  ;;  %v9778_v34 = vpop.permute.xlu1 %2911 }
 0x17d   : > { %v2875_v46 = vadd.f32 %v2874_v38, %v2873_v31  ;;  %v2891_v52 = vadd.f32 %v2890_v44, %v2889_v36  ;;  %v2573_v31 = vmul.f32 %v9688_v3, %v9728_v21  ;;  %v2577_v32 = vmul.f32 %v9688_v3, %v9739_v30 }
 0x17e   : > { %v2583_v47 = vrot.slane %v2582_v39, 1  ;;  %v2599_v55 = vrot.slane %v2598_v48, 1  ;;  %v2105_v36 = vrot.slane %v2104_v16, 4  ;;  %v2000_v35 = vadd.f32 %v1999_v17, %v1998_v26 }
 0x17f   : > { %v2876_v56 = vrot.slane %v2875_v46, 2  ;;  %v2892_v1 = vrot.slane %v2891_v52, 2  ;;  %v2015_v38 = vsel %vm1997_vm1, %v1989_v13, 0.0  ;;  %v2097_v40 = vadd.f32 %v2096_v22, %v2095_v57 }
 0x180   : > { %v2584_v54 = vadd.f32 %v2583_v47, %v2582_v39  ;;  %v2600_v5 = vadd.f32 %v2599_v55, %v2598_v48  ;;  %v2014_v2 = vsel %vm1997_vm1, %v1987_v37, 0.0  ;;  %v2121_v44 = vrot.slane %v2120_v27, 4 }
 0x181   : > { %v2877_v8 = vadd.f32 %v2876_v56, %v2875_v46  ;;  %v2893_v14 = vadd.f32 %v2892_v1, %v2891_v52  ;;  %v1992_v45 = vadd.f32 %v1991_v28, %v1990_v4  ;;  %v2585_v46 = vsel %vm1997_vm1, %v2571_v29, 0.0 }
 0x182   : > { %v9758_v61 = vadd.f32 %v9755_v60, %v2584_v54  ;;  %v9766_v19 = vadd.f32 %v9755_v60, %v2600_v5  ;;  %v2601_v47 = vsel %vm1997_vm1, %v2575_v62, 0.0  ;;  %v2586_v48 = vsel %vm1997_vm1, %v2573_v31, 0.0 }
 0x183   : > { %v2878_v20 = vrot.slane %v2877_v8, 1  ;;  %v2894_v25 = vrot.slane %v2893_v14, 1  ;;  %v2602_v49 = vsel %vm1997_vm1, %v2577_v32, 0.0  ;;  %v2106_v50 = vadd.f32 %v2105_v36, %v2104_v16 }
 0x184   : > { %v2016_v51 = vadd.f32 %v2015_v38, %v2014_v2  ;;  %v2001_v52 = vrot.slane %v2000_v35, 4  ;;  %v2098_v54 = vrot.slane %v2097_v40, 2  ;;  %v2114_v55 = vrot.slane %v2113_v41, 2 }
 0x185   : > { %v2879_v33 = vadd.f32 %v2878_v20, %v2877_v8  ;;  %v2895_v39 = vadd.f32 %v2894_v25, %v2893_v14  ;;  %v2587_v37 = vadd.f32 %v2586_v48, %v2585_v46  ;;  %v2603_v56 = vadd.f32 %v2602_v49, %v2601_v47 }
 0x186   : > { %v2122_v57 = vadd.f32 %v2121_v44, %v2120_v27  ;;  %v1993_v58 = vrot.slane %v1992_v45, 2  ;;  %v2017_v59 = vrot.slane %v2016_v51, 4  ;;  %v2107_v1 = vrot.slane %v2106_v50, 2 }
 0x187   : > { %v9781_v43 = vadd.f32 %v9778_v34, %v2879_v33  ;;  %v9785_v3 = vadd.f32 %v9778_v34, %v2895_v39  ;;  %v2002_v4 = vadd.f32 %v2001_v52, %v2000_v35  ;;  %v2099_v5 = vadd.f32 %v2098_v54, %v2097_v40 }
 0x188   : > { %v2115_v8 = vadd.f32 %v2114_v55, %v2113_v41  ;;  %v2010_v9 = vrot.slane %v2009_v53, 2  ;;  %v2588_v10 = vrot.slane %v2587_v37, 4  ;;  %v2604_v13 = vrot.slane %v2603_v56, 4 }
 0x189   : > { %v2123_v14 = vrot.slane %v2122_v57, 2  ;;  %v1994_v17 = vadd.f32 %v1993_v58, %v1992_v45  ;;  %v2018_v16 = vadd.f32 %v2017_v59, %v2016_v51  ;;  %v2108_v20 = vadd.f32 %v2107_v1, %v2106_v50 }
 0x18a   : > { %v2100_v22 = vrot.slane %v2099_v5, 1  ;;  %v2116_v23 = vrot.slane %v2115_v8, 1  ;;  %v2003_v24 = vrot.slane %v2002_v4, 2  ;;  %v2011_v25 = vadd.f32 %v2010_v9, %v2009_v53 }
 0x18b   : > { %v2589_v26 = vadd.f32 %v2588_v10, %v2587_v37  ;;  %v2605_v28 = vadd.f32 %v2604_v13, %v2603_v56  ;;  %v2866_v27 = vmul.f32 %v9709_v11, %v9714_v12  ;;  %v2868_v29 = vmul.f32 %v9716_v15, %v9728_v21 }
 0x18c   : > { %v2124_v62 = vadd.f32 %v2123_v14, %v2122_v57  ;;  %v1995_v31 = vrot.slane %v1994_v17, 1  ;;  %v2870_v32 = vmul.f32 %v9709_v11, %v9722_v18  ;;  %v2872_v33 = vmul.f32 %v9716_v15, %v9739_v30 }
 0x18d   : > { %v2109_v36 = vrot.slane %v2108_v20, 1  ;;  %v2019_v35 = vrot.slane %v2018_v16, 2  ;;  %v2101_v38 = vadd.f32 %v2100_v22, %v2099_v5  ;;  %v2117_v39 = vadd.f32 %v2116_v23, %v2115_v8 }
 0x18e   : > { %v2004_v40 = vadd.f32 %v2003_v24, %v2002_v4  ;;  %v2012_v41 = vrot.slane %v2011_v25, 1  ;;  %v2880_v42 = vsel %vm1997_vm1, %v2866_v27, 0.0  ;;  %v2881_v2 = vsel %vm1997_vm1, %v2868_v29, 0.0 }
 0x18f   : > { %v2590_v44 = vrot.slane %v2589_v26, 2  ;;  %v2606_v45 = vrot.slane %v2605_v28, 2  ;;  %v2125_v46 = vrot.slane %v2124_v62, 1  ;;  %v1996_v47 = vadd.f32 %v1995_v31, %v1994_v17 }
 0x190   : > { %v2896_v48 = vsel %vm1997_vm1, %v2870_v32, 0.0  ;;  %v2897_v11 = vsel %vm1997_vm1, %v2872_v33, 0.0  ;;  %v2110_v49 = vadd.f32 %v2109_v36, %v2108_v20  ;;  %v2020_v15 = vadd.f32 %v2019_v35, %v2018_v16 }
 0x191   : > { %v2136_v50 = vadd.f32 %v9679_v63, %v2101_v38  ;;  %v2013_v51 = vadd.f32 %v2012_v41, %v2011_v25  ;;  %v2882_v52 = vadd.f32 %v2881_v2, %v2880_v42  ;;  %v2138_v53 = vadd.f32 %v9679_v63, %v2117_v39 }
 0x192   : > { %v2898_v54 = vadd.f32 %v2897_v11, %v2896_v48  ;;  %v2591_v55 = vadd.f32 %v2590_v44, %v2589_v26  ;;  %v2607_v37 = vadd.f32 %v2606_v45, %v2605_v28  ;;  %v2126_v56 = vadd.f32 %v2125_v46, %v2124_v62 }
 0x193   : > { %v2005_v57 = vrot.slane %v2004_v40, 1  ;;  %v2032_v58 = vadd.f32 %v9681_v0, %v1996_v47  ;;  %v2137_v59 = vadd.f32 %v9679_v63, %v2110_v49  ;;  %v2021_v1 = vrot.slane %v2020_v15, 1 }
 0x194   : > { %vm2140_vm2 = vcmp.gt.f32.partialorder %v2136_v50, 1.0  ;;  %v2034_v4 = vadd.f32 %v9681_v0, %v2013_v51  ;;  %v2883_v5 = vrot.slane %v2882_v52, 4  ;;  %vm2142_vm3 = vcmp.gt.f32.partialorder %v2138_v53, 1.0 }
 0x195   : > { %v2899_v8 = vrot.slane %v2898_v54, 4  ;;  %v2592_v9 = vrot.slane %v2591_v55, 1  ;;  %v2608_v10 = vrot.slane %v2607_v37, 1  ;;  %v2139_v13 = vadd.f32 %v9679_v63, %v2126_v56 }
 0x196   : > { %v2006_v14 = vadd.f32 %v2005_v57, %v2004_v40  ;;  %vm2036_vm4 = vcmp.gt.f32.partialorder %v2032_v58, 1.0  ;;  %vm2141_vm5 = vcmp.gt.f32.partialorder %v2137_v59, 1.0  ;;  %v2022_v17 = vadd.f32 %v2021_v1, %v2020_v15  ;;  %v7927_v1 = vld [vmem:[%s9505_s29 + $0x200] ss:$8 sps:$4 sm:$0xff]  }
 0x197   : > { %v8572_v16 = vmov 0.0   ;;  %vm2038_vm6 = vcmp.gt.f32.partialorder %v2034_v4, 1.0  ;;  %v2884_v23 = vadd.f32 %v2883_v5, %v2882_v52  ;;  %v2900_v25 = vadd.f32 %v2899_v8, %v2898_v54  ;;  %v7935_v8 = vld [vmem:[%s9505_s29 + $0x1f4] ss:$8 sps:$4 sm:$0xff]  }
 0x198   : > { %v6889_v20 = vsel %vm2140_vm2, 1.0, %v8572_v16  ;;  %v6891_v22 = vsel %vm2142_vm3, 1.0, %v8572_v16  ;;  %v6884_v24 = vsel %vm2036_vm4, 1.0, %v8572_v16  ;;  %v2593_v26 = vadd.f32 %v2592_v9, %v2591_v55 }
 0x199   : > { %v2609_v28 = vadd.f32 %v2608_v10, %v2607_v37  ;;  %vm2143_vm7 = vcmp.gt.f32.partialorder %v2139_v13, 1.0  ;;  %v2033_v27 = vadd.f32 %v9681_v0, %v2006_v14  ;;  %v2152_v63 = vpack.c.bf16 %v6889_v20, %v6889_v20 }
 0x19a   : > { %v2154_v29 = vpack.c.bf16 %v6891_v22, %v6891_v22  ;;  %v2035_v62 = vadd.f32 %v9681_v0, %v2022_v17  ;;  %v6886_v31 = vsel %vm2038_vm6, 1.0, %v8572_v16  ;;  %v2048_v32 = vpack.c.bf16 %v6884_v24, %v6884_v24  ;;  %v7930_v17 = vld [vmem:[%s9505_s29 + $0x2c8] ss:$8 sps:$4 sm:$0xff]  }
 0x19b   : > { %v2885_v33 = vrot.slane %v2884_v23, 2  ;;  %v6890_v36 = vsel %vm2141_vm5, 1.0, %v8572_v16  ;;  %v2620_v35 = vadd.f32 %v9755_v60, %v2593_v26  ;;  %v2622_v38 = vadd.f32 %v9755_v60, %v2609_v28  ;;  %v7933_v24 = vld [vmem:[%s9505_s29 + $0x1f0] ss:$8 sps:$4 sm:$0xff]   ;;  %v7941_v26 = vld [vmem:[%s9505_s29 + $0x1e4] ss:$8 sps:$4 sm:$0xff]  }
 0x19c   : > { %v2901_v39 = vrot.slane %v2900_v25, 2  ;;  %v6892_v40 = vsel %vm2143_vm7, 1.0, %v8572_v16  ;;  %vm2037_vm8 = vcmp.gt.f32.partialorder %v2033_v27, 1.0  ;;  %v2050_v41 = vpack.c.bf16 %v6886_v31, %v6886_v31  ;;  %v7939_v31 = vld [vmem:[%s9505_s29 + $0x1e0] ss:$8 sps:$4 sm:$0xff]  }
 0x19d   : > { %v2153_v42 = vpack.c.bf16 %v6890_v36, %v6890_v36  ;;  %v2186_v2 = vunpack.c.l.b16 %v2152_v63  ;;  %v2188_v44 = vunpack.c.l.b16 %v2154_v29  ;;  %vm2039_vm9 = vcmp.gt.f32.partialorder %v2035_v62, 1.0  ;;  %v7936_v63 = vld [vmem:[%s9505_s29 + $0x2b8] ss:$8 sps:$4 sm:$0xff]  }
 0x19e   : > { %v2376_v0 = vunpack.c.l.b16 %v2048_v32  ;;  %v2886_v45 = vadd.f32 %v2885_v33, %v2884_v23  ;;  %v2155_v46 = vpack.c.bf16 %v6892_v40, %v6892_v40  ;;  %vm2624_vm11 = vcmp.gt.f32.partialorder %v2620_v35, 1.0  ;;  %v7944_v32 = vld [vmem:[%s9505_s29 + $0x2ac] ss:$8 sps:$4 sm:$0xff]  }
 0x19f   : > { %v2187_v47 = vunpack.c.l.b16 %v2153_v42  ;;  %vm2626_vm12 = vcmp.gt.f32.partialorder %v2622_v38, 1.0  ;;  %v2902_v48 = vadd.f32 %v2901_v39, %v2900_v25  ;;  %v6885_v60 = vsel %vm2037_vm8, 1.0, %v8572_v16  ;;  %v7938_v25 = vld [vmem:[%s9505_s29 + $0x2bc] ss:$8 sps:$4 sm:$0xff]   ;;  %v7942_v38 = vld [vmem:[%s9505_s29 + $0x2a8] ss:$8 sps:$4 sm:$0xff]  }
 0x1a0   : > { %v2378_v11 = vunpack.c.l.b16 %v2050_v41  ;;  %v2189_v49 = vunpack.c.l.b16 %v2155_v46  ;;  %v6887_v15 = vsel %vm2039_vm9, 1.0, %v8572_v16  ;;  %v2049_v50 = vpack.c.bf16 %v6885_v60, %v6885_v60  ;;  %v7947_v33 = vld [vmem:[%s9505_s29 + $0x1d4] ss:$8 sps:$4 sm:$0xff]   ;;  %v7953_v40 = vld [vmem:[%s9505_s29 + $0x1c4] ss:$8 sps:$4 sm:$0xff]  }
 0x1a1   : > { %v2051_v51 = vpack.c.bf16 %v6887_v15, %v6887_v15  ;;  %v2191_v52 = vsel %vm2190_vm10, %v2188_v44, %v2186_v2  ;;  %v6976_v53 = vsel %vm2624_vm11, 1.0, %v8572_v16  ;;  %v6978_v54 = vsel %vm2626_vm12, 1.0, %v8572_v16  ;;  %v7950_v39 = vld [vmem:[%s9505_s29 + $0x29c] ss:$8 sps:$4 sm:$0xff]   ;;  %v7948_v2 = vld [vmem:[%s9505_s29 + $0x298] ss:$8 sps:$4 sm:$0xff]  }
 0x1a2   : > { %v2192_v55 = vsel %vm2190_vm10, %v2189_v49, %v2187_v47  ;;  %v2377_v37 = vunpack.c.l.b16 %v2049_v50  ;;  %v2887_v56 = vrot.slane %v2886_v45, 1  ;;  %v2903_v57 = vrot.slane %v2902_v48, 1  ;;  %v7951_v44 = vld [vmem:[%s9505_s29 + $0x1c0] ss:$8 sps:$4 sm:$0xff]   ;;  %v7957_v60 = vld [vmem:[%s9505_s29 + $0x1b0] ss:$8 sps:$4 sm:$0xff]  }
 0x1a3   : > { %v2194_v58 = vpack.c.b16 %v2192_v55, %v2192_v55  ;;  %v2379_v59 = vunpack.c.l.b16 %v2051_v51  ;;  %v2193_v4 = vpack.c.b16 %v2191_v52, %v2191_v52  ;;  %v2380_v5 = vsel %vm2190_vm10, %v2378_v11, %v2376_v0  ;;  %v7956_v0 = vld [vmem:[%s9505_s29 + $0x28c] ss:$8 sps:$4 sm:$0xff]   ;;  %v7962_v11 = vld [vmem:[%s9505_s29 + $0x27c] ss:$8 sps:$4 sm:$0xff]   ;;  %v7960_v51 = vld [vmem:[%s9505_s29 + $0x278] ss:$8 sps:$4 sm:$0xff]  }
 0x1a4   : > { %v2636_v9 = vpack.c.bf16 %v6976_v53, %v6976_v53  ;;  %v2638_v10 = vpack.c.bf16 %v6978_v54, %v6978_v54  ;;  %v2888_v20 = vadd.f32 %v2887_v56, %v2886_v45  ;;  %v2904_v22 = vadd.f32 %v2903_v57, %v2902_v48  ;;  %v7959_v45 = vld [vmem:[%s9505_s29 + $0x1b4] ss:$8 sps:$4 sm:$0xff]   ;;  %v7954_v48 = vld [vmem:[%s9505_s29 + $0x288] ss:$8 sps:$4 sm:$0xff]   ;;  %v7965_v49 = vld [vmem:[%s9505_s29 + $0x1a4] ss:$8 sps:$4 sm:$0xff]  }
 0x1a5   : > { %6945 = vmatprep.mubr.msk.bf16.mxu0 %vm1997_vm1, %v2194_v58  ;;  %v2381_v13 = vsel %vm2190_vm10, %v2379_v59, %v2377_v37  ;;  %v2382_v23 = vpack.c.b16 %v2380_v5, %v2380_v5  ;;  %v7963_v52 = vld [vmem:[%s9505_s29 + $0x1a0] ss:$8 sps:$4 sm:$0xff]   ;;  %v7968_v53 = vld [vmem:[%s9505_s29 + $0x26c] ss:$8 sps:$4 sm:$0xff]   ;;  %v7969_v57 = vld [vmem:[%s9505_s29 + $0x190] ss:$8 sps:$4 sm:$0xff]  }
 0x1a6   : > { %v2383_v14 = vpack.c.b16 %v2381_v13, %v2381_v13  ;;  %2364 = vmatmul.mubr.bf16.vlgmr.msra.gmra.mxu0 %v2193_v4  ;;  %v2670_v28 = vunpack.c.l.b16 %v2636_v9  ;;  %v2672_v27 = vunpack.c.l.b16 %v2638_v10  ;;  %v2915_v29 = vadd.f32 %v9778_v34, %v2888_v20  ;;  %v7971_v54 = vld [vmem:[%s9505_s29 + $0x194] ss:$8 sps:$4 sm:$0xff]   ;;  %v7966_v56 = vld [vmem:[%s9505_s29 + $0x268] ss:$8 sps:$4 sm:$0xff]   ;;  %v7972_v59 = vld [vmem:[%s9505_s29 + $0x258] ss:$8 sps:$4 sm:$0xff]   ;;  %v9870_v4 = vpop.permute.xlu1 %3157 }
 0x1a7   : > { %2813 = vmatpush1.bf16.msra.mxu0 %v7927_v1  ;;  %v2917_v62 = vadd.f32 %v9778_v34, %v2904_v22  ;;  %v7945_v34 = vld [vmem:[%s9505_s29 + $0x1d0] ss:$8 sps:$4 sm:$0xff]   ;;  %v7974_v58 = vld [vmem:[%s9505_s29 + $0x25c] ss:$8 sps:$4 sm:$0xff]   ;;  %v9868_v1 = vpop.permute.xlu0 %3152  ;;  %vm2623_vm15 = vcmp.gt.f32.partialorder %v9758_v61, 1.0  ;;  %vm2625_vm2 = vcmp.gt.f32.partialorder %v9766_v19, 1.0 }
 0x1a8   : > { %6973 = vmatprep.mubr.msk.bf16.mxu1 %vm1997_vm1, %v2383_v14  ;;  %2814 = vmatprep.subr.bf16.mxu0 %v7935_v8  ;;  %v2674_v36 = vsel %vm2190_vm10, %v2672_v27, %v2670_v28  ;;  %vm2919_vm13 = vcmp.gt.f32.partialorder %v2915_v29, 1.0  ;;  %v7003_v5 = vld [vmem:[%s9505_s29 + $0x250] sm:$0x33]  ;;  %v7061_v8 = vld [vmem:[%s9505_s29 + $0x318] sm:$0x33]  ;;  %v3161_v10 = vmul.f32 %v9868_v1, %v9714_v12  ;;  %vm2918_vm3 = vcmp.gt.f32.partialorder %v9781_v43, 1.0 }
 0x1a9   : > { %2552 = vmatmul.mubr.bf16.vlgmr.msra.gmra.mxu1 %v2382_v23  ;;  %v2676_v35 = vpack.c.b16 %v2674_v36, %v2674_v36  ;;  %vm2921_vm14 = vcmp.gt.f32.partialorder %v2917_v62, 1.0  ;;  %v7034_v41 = vsel %vm2919_vm13, 1.0, %v8572_v16  ;;  %v7029_v9 = vcombine.high %v7003_v5, %v7003_v5  ;;  %v7981_v22 = vld [vmem:[%s9505_s29 + $0x244] ss:$8 sps:$4 sm:$0xff]   ;;  %v7982_v36 = vld [vmem:[%s9505_s29 + $0x308] ss:$8 sps:$4 sm:$0xff]  }
 0x1aa   : > { %3108 = vmatpush1.bf16.msra.mxu1 %v7930_v17  ;;  %v7036_v42 = vsel %vm2921_vm14, 1.0, %v8572_v16  ;;  %v2931_v46 = vpack.c.bf16 %v7034_v41, %v7034_v41  ;;  %v9878_v14 = vpop.permute.xlu1 %3452  ;;  %v7087_v17 = vcombine.high %v7061_v8, %v7061_v8  ;;  %v7028_v20 = vcombine.low %v7003_v5, %v7003_v5  ;;  %v7984_v28 = vld [vmem:[%s9505_s29 + $0x30c] ss:$8 sps:$4 sm:$0xff]  }
 0x1ab   : > { %3109 = vmatprep.subr.bf16.mxu1 %v7938_v25  ;;  %2815 = vmatpush1.bf16.msra.mxu0 %v7933_v24  ;;  %v2933_v47 = vpack.c.bf16 %v7036_v42, %v7036_v42  ;;  %v9876_v13 = vpop.permute.xlu0 %3447  ;;  %v3165_v23 = vmul.f32 %v9868_v1, %v9722_v18  ;;  %v3163_v24 = vmul.f32 %v9870_v4, %v9728_v21  ;;  %v8005_v5 = vld [vmem:[%s9505_s29 + $0x394] ss:$8 sps:$4 sm:$0xff]   ;;  %vm2920_vm4 = vcmp.gt.f32.partialorder %v9785_v3, 1.0 }
 0x1ac   : > { %2816 = vmatprep.subr.bf16.mxu0 %v7941_v26  ;;  %7031 = vmatprep.mubr.msk.bf16.mxu0 %vm1997_vm1, %v2676_v35  ;;  %v2965_v15 = vunpack.c.l.b16 %v2931_v46  ;;  %v3167_v25 = vmul.f32 %v9870_v4, %v9739_v30  ;;  %v7086_v26 = vcombine.low %v7061_v8, %v7061_v8  ;;  %v2807_v27 = vsel %vm2324_vm0, %v7028_v20, 0  ;;  %v7987_v35 = vld [vmem:[%s9505_s29 + $0x234] ss:$8 sps:$4 sm:$0xff]  }
 0x1ad   : > { %v2967_v50 = vunpack.c.l.b16 %v2933_v47  ;;  %v3458_v29 = vmul.f32 %v9878_v14, %v9728_v21  ;;  %v7988_v47 = vld [vmem:[%s9505_s29 + $0x2f8] ss:$8 sps:$4 sm:$0xff]   ;;  %v8008_v8 = vld [vmem:[%s9505_s29 + $0x45c] ss:$8 sps:$4 sm:$0xff]  }
 0x1ae   : > { %3110 = vmatpush1.bf16.msra.mxu1 %v7936_v63  ;;  %v3456_v63 = vmul.f32 %v9876_v13, %v9714_v12  ;;  %v3102_v62 = vsel %vm2324_vm0, %v7086_v26, 0  ;;  %v3175_v12 = vsel %vm1997_vm1, %v3161_v10, 0.0 }
 0x1af   : > { %3111 = vmatprep.subr.bf16.mxu1 %v7944_v32  ;;  %2817 = vmatpush1.bf16.msra.mxu0 %v7939_v31  ;;  %v2969_v55 = vsel %vm2190_vm10, %v2967_v50, %v2965_v15  ;;  %v7979_v31 = vld [vmem:[%s9505_s29 + $0x240] ss:$8 sps:$4 sm:$0xff]   ;;  %v3460_v32 = vmul.f32 %v9876_v13, %v9722_v18  ;;  %v3471_v42 = vsel %vm1997_vm1, %v3458_v29, 0.0 }
 0x1b0   : > { %2818 = vmatprep.subr.bf16.mxu0 %v7947_v33  ;;  %v2971_v37 = vpack.c.b16 %v2969_v55, %v2969_v55  ;;  %v3462_v33 = vmul.f32 %v9878_v14, %v9739_v30  ;;  %v3470_v41 = vsel %vm1997_vm1, %v3456_v63, 0.0  ;;  %v7991_v15 = vld [vmem:[%s9505_s29 + $0x220] ss:$8 sps:$4 sm:$0xff]  }
 0x1b2   : > { %3112 = vmatpush1.bf16.msra.mxu1 %v7942_v38  ;;  %7089 = vmatprep.mubr.msk.bf16.mxu1 %vm1997_vm1, %v2971_v37  ;;  %v3191_v38 = vsel %vm1997_vm1, %v3165_v23, 0.0  ;;  %v3487_v46 = vsel %vm1997_vm1, %v3462_v33, 0.0 }
 0x1b3   : > { %3113 = vmatprep.subr.bf16.mxu1 %v7950_v39  ;;  %2819 = vmatpush1.bf16.msra.mxu0 %v7945_v34  ;;  %v3176_v34 = vsel %vm1997_vm1, %v3163_v24, 0.0  ;;  %v3192_v39 = vsel %vm1997_vm1, %v3167_v25, 0.0 }
 0x1b4   : > { %2820 = vmatprep.subr.bf16.mxu0 %v7953_v40  ;;  %v7990_v40 = vld [vmem:[%s9505_s29 + $0x2fc] ss:$8 sps:$4 sm:$0xff]  }
 0x1b6   : > { %3114 = vmatpush1.bf16.msra.mxu1 %v7948_v2  ;;  %v7985_v2 = vld [vmem:[%s9505_s29 + $0x230] ss:$8 sps:$4 sm:$0xff]  }
 0x1b7   : > { %3115 = vmatprep.subr.bf16.mxu1 %v7956_v0  ;;  %2821 = vmatpush1.bf16.msra.mxu0 %v7951_v44  ;;  %v3177_v44 = vadd.f32 %v3176_v34, %v3175_v12  ;;  %v3193_v0 = vadd.f32 %v3192_v39, %v3191_v38  ;;  %v9928_v34 = vpop.permute.xlu1 %3501 }
 0x1b8   : > { %2822 = vmatprep.subr.bf16.mxu0 %v7959_v45  ;;  %v3486_v45 = vsel %vm1997_vm1, %v3460_v32, 0.0 }
 0x1b9   : > { %v3178_v50 = vrot.slane %v3177_v44, 4 }
 0x1ba   : > { %3116 = vmatpush1.bf16.msra.mxu1 %v7954_v48  ;;  %v7993_v48 = vld [vmem:[%s9505_s29 + $0x224] ss:$8 sps:$4 sm:$0xff]  }
 0x1bb   : > { %3117 = vmatprep.subr.bf16.mxu1 %v7962_v11  ;;  %2823 = vmatpush1.bf16.msra.mxu0 %v7957_v60  ;;  %v7996_v60 = vld [vmem:[%s9505_s29 + $0x2ec] ss:$8 sps:$4 sm:$0xff]   ;;  %v3472_v11 = vadd.f32 %v3471_v42, %v3470_v41  ;;  %v6975_v41 = vsel %vm2623_vm15, 1.0, %v8572_v16  ;;  %v6977_v42 = vsel %vm2625_vm2, 1.0, %v8572_v16 }
 0x1bc   : > { %2824 = vmatprep.subr.bf16.mxu0 %v7965_v49  ;;  %v3488_v49 = vadd.f32 %v3487_v46, %v3486_v45  ;;  %v2635_v43 = vpack.c.bf16 %v6975_v41, %v6975_v41  ;;  %v8006_v41 = vld [vmem:[%s9505_s29 + $0x458] ss:$8 sps:$4 sm:$0xff]  }
 0x1bd   : > { %v3473_v55 = vrot.slane %v3472_v11, 4 }
 0x1be   : > { %3118 = vmatpush1.bf16.msra.mxu1 %v7960_v51  ;;  %v3194_v51 = vrot.slane %v3193_v0, 4  ;;  %v3489_v37 = vrot.slane %v3488_v49, 4 }
 0x1bf   : > { %3119 = vmatprep.subr.bf16.mxu1 %v7968_v53  ;;  %2825 = vmatpush1.bf16.msra.mxu0 %v7963_v52  ;;  %v7994_v52 = vld [vmem:[%s9505_s29 + $0x2e8] ss:$8 sps:$4 sm:$0xff]   ;;  %v7999_v53 = vld [vmem:[%s9505_s29 + $0x214] ss:$8 sps:$4 sm:$0xff]  }
 0x1c0   : > { %2826 = vmatprep.subr.bf16.mxu0 %v7971_v54  ;;  %v8002_v54 = vld [vmem:[%s9505_s29 + $0x2dc] ss:$8 sps:$4 sm:$0xff]   ;;  %v3490_v10 = vadd.f32 %v3489_v37, %v3488_v49  ;;  %v9946_v49 = vpop.permute.xlu1 %3747  ;;  %v2669_v37 = vunpack.c.l.b16 %v2635_v43 }
 0x1c2   : > { %3120 = vmatpush1.bf16.msra.mxu1 %v7966_v56  ;;  %v7997_v56 = vld [vmem:[%s9505_s29 + $0x210] ss:$8 sps:$4 sm:$0xff]   ;;  %v3491_v23 = vrot.slane %v3490_v10, 2 }
 0x1c3   : > { %3121 = vmatprep.subr.bf16.mxu1 %v7974_v58  ;;  %2827 = vmatpush1.bf16.msra.mxu0 %v7969_v57  ;;  %v3179_v57 = vadd.f32 %v3178_v50, %v3177_v44  ;;  %v3195_v58 = vadd.f32 %v3194_v51, %v3193_v0  ;;  %v7035_v44 = vsel %vm2920_vm4, 1.0, %v8572_v16  ;;  %v2637_v0 = vpack.c.bf16 %v6977_v42, %v6977_v42 }
 0x1c4   : > { %7030 = vmatprep.subr.msk.bf16.mxu0 %vm2324_vm0, %v7029_v9  ;;  %v3474_v9 = vadd.f32 %v3473_v55, %v3472_v11  ;;  %v2932_v46 = vpack.c.bf16 %v7035_v44, %v7035_v44  ;;  %v3162_v51 = vmul.f32 %v9870_v4, %v9697_v6  ;;  %v8011_v44 = vld [vmem:[%s9505_s29 + $0x384] ss:$8 sps:$4 sm:$0xff]  }
 0x1c5   : > { %v3196_v20 = vrot.slane %v3195_v58, 2 }
 0x1c6   : > { %3122 = vmatpush1.bf16.msra.mxu1 %v7972_v59  ;;  %v8000_v59 = vld [vmem:[%s9505_s29 + $0x2d8] ss:$8 sps:$4 sm:$0xff]  }
 0x1c7   : > { %7088 = vmatprep.subr.msk.bf16.mxu1 %vm2324_vm0, %v7087_v17  ;;  %2835 = vmatpush2.bf16.msra.mxu0 %v2807_v27  ;;  %v3180_v17 = vrot.slane %v3179_v57, 2  ;;  %v3197_v25 = vadd.f32 %v3196_v20, %v3195_v58  ;;  %v9981_v20 = vpop.permute.xlu1 %4042 }
 0x1c8   : > { %2836 = vmatprep.subr.bf16.mxu0 %v7981_v22  ;;  %v3475_v22 = vrot.slane %v3474_v9, 2 }
 0x1c9   : > { %v3181_v24 = vadd.f32 %v3180_v17, %v3179_v57  ;;  %v3198_v63 = vrot.slane %v3197_v25, 1 }
 0x1ca   : > { %3130 = vmatpush2.bf16.msra.mxu1 %v3102_v62  ;;  %v3476_v26 = vadd.f32 %v3475_v22, %v3474_v9 }
 0x1cb   : > { %3131 = vmatprep.subr.bf16.mxu1 %v7984_v28  ;;  %2837 = vmatpush2.bf16.msra.mxu0 %v7979_v31  ;;  %v3492_v28 = vadd.f32 %v3491_v23, %v3490_v10  ;;  %v3182_v27 = vrot.slane %v3181_v24, 1  ;;  %v3199_v32 = vadd.f32 %v3198_v63, %v3197_v25  ;;  %v9986_v23 = vld [vmem:[%s10890_s0 + $0x8] sm:$0xff] }
 0x1cc   : > { %2838 = vmatprep.subr.bf16.mxu0 %v7987_v35  ;;  %v3477_v29 = vrot.slane %v3476_v26, 1 }
 0x1cd   : > { %v3493_v62 = vrot.slane %v3492_v28, 1  ;;  %v3183_v31 = vadd.f32 %v3182_v27, %v3181_v24 }
 0x1ce   : > { %3132 = vmatpush2.bf16.msra.mxu1 %v7982_v36  ;;  %v3478_v33 = vadd.f32 %v3477_v29, %v3476_v26  ;;  %v9924_v36 = vpop.permute.xlu0 %3206  ;;  %v3753_v26 = vmul.f32 %v9946_v49, %v9728_v21 }
 0x1cf   : > { %3133 = vmatprep.subr.bf16.mxu1 %v7990_v40  ;;  %2839 = vmatpush2.bf16.msra.mxu0 %v7985_v2  ;;  %v3494_v35 = vadd.f32 %v3493_v62, %v3492_v28  ;;  %v3210_v12 = vadd.f32 %v9924_v36, %v3183_v31  ;;  %v3212_v38 = vadd.f32 %v9924_v36, %v3199_v32  ;;  %v7033_v2 = vsel %vm2918_vm3, 1.0, %v8572_v16 }
 0x1d0   : > { %2840 = vmatprep.subr.bf16.mxu0 %v7993_v48  ;;  %v3505_v39 = vadd.f32 %v9928_v34, %v3478_v33  ;;  %v2930_v45 = vpack.c.bf16 %v7033_v2, %v7033_v2  ;;  %v3757_v28 = vmul.f32 %v9946_v49, %v9739_v30  ;;  %v4048_v32 = vmul.f32 %v9981_v20, %v9728_v21 }
 0x1d1   : > { %v3507_v40 = vadd.f32 %v9928_v34, %v3494_v35  ;;  %vm3214_vm5 = vcmp.gt.f32.partialorder %v3210_v12, 1.0  ;;  %vm3216_vm6 = vcmp.gt.f32.partialorder %v3212_v38, 1.0  ;;  %v4052_v33 = vmul.f32 %v9981_v20, %v9739_v30  ;;  %v8003_v35 = vld [vmem:[%s9505_s29 + $0x390] ss:$8 sps:$4 sm:$0xff]  }
 0x1d2   : > { %3134 = vmatpush2.bf16.msra.mxu1 %v7988_v47  ;;  %vm3509_vm7 = vcmp.gt.f32.partialorder %v3505_v39, 1.0  ;;  %v7092_v61 = vsel %vm3214_vm5, 1.0, %v8572_v16  ;;  %v7094_v19 = vsel %vm3216_vm6, 1.0, %v8572_v16  ;;  %v9944_v11 = vpop.permute.xlu0 %3742  ;;  %v2964_v58 = vunpack.c.l.b16 %v2930_v45  ;;  %v10013_v38 = vld [vmem:[%s10890_s0 + $0x30] sm:$0xff] }
 0x1d3   : > { %3135 = vmatprep.subr.bf16.mxu1 %v7996_v60  ;;  %2841 = vmatpush2.bf16.msra.mxu0 %v7991_v15  ;;  %vm3511_vm8 = vcmp.gt.f32.partialorder %v3507_v40, 1.0  ;;  %v7150_v3 = vsel %vm3509_vm7, 1.0, %v8572_v16  ;;  %v3226_v47 = vpack.c.bf16 %v7092_v61, %v7092_v61  ;;  %v3228_v48 = vpack.c.bf16 %v7094_v19, %v7094_v19  ;;  %v9951_v15 = vld [vmem:[%s10890_s0] sm:$0xff] }
 0x1d4   : > { %2842 = vmatprep.subr.bf16.mxu0 %v7999_v53  ;;  %v7152_v60 = vsel %vm3511_vm8, 1.0, %v8572_v16  ;;  %v3160_v50 = vmul.f32 %v9951_v15, %v9868_v1  ;;  %v3521_v55 = vpack.c.bf16 %v7150_v3, %v7150_v3  ;;  %v3455_v10 = vmul.f32 %v9951_v15, %v9876_v13 }
 0x1d5   : > { %v3523_v57 = vpack.c.bf16 %v7152_v60, %v7152_v60  ;;  %v3751_v24 = vmul.f32 %v9986_v23, %v9944_v11  ;;  %v3755_v25 = vmul.f32 %v9944_v11, %v9722_v18  ;;  %v3461_v39 = vmul.f32 %v10013_v38, %v9878_v14  ;;  %v8012_v60 = vld [vmem:[%s9505_s29 + $0x448] ss:$8 sps:$4 sm:$0xff]  }
 0x1d6   : > { %3136 = vmatpush2.bf16.msra.mxu1 %v7994_v52  ;;  %v9960_v52 = vld [vmem:[%s10890_s0 + $0x20] sm:$0xff]  ;;  %v9966_v6 = vadd.f32 %v3162_v51, %v3160_v50  ;;  %v9979_v17 = vpop.permute.xlu0 %4037  ;;  %v3766_v19 = vsel %vm1997_vm1, %v3753_v26, 0.0  ;;  %v4061_v3 = vsel %vm1997_vm1, %v4048_v32, 0.0  ;;  %v8017_v50 = vld [vmem:[%s9505_s29 + $0x374] ss:$8 sps:$4 sm:$0xff]  }
 0x1d7   : > { %3137 = vmatprep.subr.bf16.mxu1 %v8002_v54  ;;  %2843 = vmatpush2.bf16.msra.mxu0 %v7997_v56  ;;  %v3164_v53 = vmul.f32 %v9960_v52, %v9868_v1  ;;  %v3166_v54 = vmul.f32 %v9870_v4, %v9702_v7  ;;  %v2671_v56 = vunpack.c.l.b16 %v2637_v0  ;;  %v9975_v1 = vld [vmem:[%s10890_s0 + $0x10] sm:$0xff]  ;;  %v3555_v4 = vunpack.c.l.b16 %v3521_v55 }
 0x1d8   : > { %3402 = vmatprep.subr.bf16.mxu0 %v8005_v5  ;;  %v3260_v5 = vunpack.c.l.b16 %v3226_v47  ;;  %v3457_v7 = vmul.f32 %v9975_v1, %v9878_v14  ;;  %v3557_v22 = vunpack.c.l.b16 %v3523_v57  ;;  %v4046_v62 = vmul.f32 %v9986_v23, %v9979_v17  ;;  %v8009_v47 = vld [vmem:[%s9505_s29 + $0x380] ss:$8 sps:$4 sm:$0xff]  }
 0x1d9   : > { %v9968_v9 = vadd.f32 %v3166_v54, %v3164_v53  ;;  %v2673_v27 = vsel %vm2190_vm10, %v2671_v56, %v2669_v37  ;;  %v4050_v31 = vmul.f32 %v9979_v17, %v9722_v18  ;;  %v3459_v12 = vmul.f32 %v9960_v52, %v9876_v13  ;;  %v8014_v13 = vld [vmem:[%s9505_s29 + $0x44c] ss:$8 sps:$4 sm:$0xff]   ;;  %v8020_v54 = vld [vmem:[%s9505_s29 + $0x43c] ss:$8 sps:$4 sm:$0xff]  }
 0x1da   : > { %3138 = vmatpush2.bf16.msra.mxu1 %v8000_v59  ;;  %v2966_v59 = vunpack.c.l.b16 %v2932_v46  ;;  %v2675_v40 = vpack.c.b16 %v2673_v27, %v2673_v27  ;;  %v3463_v42 = vadd.f32 %v3457_v7, %v3455_v10  ;;  %v3765_v21 = vsel %vm1997_vm1, %v3751_v24, 0.0  ;;  %v8023_v10 = vld [vmem:[%s9505_s29 + $0x364] ss:$8 sps:$4 sm:$0xff]  }
 0x1db   : > { %3697 = vmatprep.subr.bf16.mxu1 %v8008_v8  ;;  %v3262_v8 = vunpack.c.l.b16 %v3228_v48  ;;  %v3559_v30 = vsel %vm2190_vm10, %v3557_v22, %v3555_v4  ;;  %v3781_v61 = vsel %vm1997_vm1, %v3755_v25, 0.0  ;;  %v3782_v14 = vsel %vm1997_vm1, %v3757_v28, 0.0  ;;  %v8026_v22 = vld [vmem:[%s9505_s29 + $0x42c] ss:$8 sps:$4 sm:$0xff]  }
 0x1dc   : > { %v2968_v63 = vsel %vm2190_vm10, %v2966_v59, %v2964_v58  ;;  %2845 = vmatmul.mubr.bf16.vlgmr.msra.gmra.mxu0 %v2675_v40  ;;  %v3561_v43 = vpack.c.b16 %v3559_v30, %v3559_v30  ;;  %v4060_v0 = vsel %vm1997_vm1, %v4046_v62, 0.0  ;;  %v4076_v45 = vsel %vm1997_vm1, %v4050_v31, 0.0  ;;  %v8015_v59 = vld [vmem:[%s9505_s29 + $0x370] ss:$8 sps:$4 sm:$0xff]   ;;  %v8029_v31 = vld [vmem:[%s9505_s29 + $0x354] ss:$8 sps:$4 sm:$0xff]  }
 0x1dd   : > { %v3264_v29 = vsel %vm2190_vm10, %v3262_v8, %v3260_v5  ;;  %v2970_v18 = vpack.c.b16 %v2968_v63, %v2968_v63  ;;  %v4077_v46 = vsel %vm1997_vm1, %v4052_v33, 0.0  ;;  %3403 = vmatpush1.bf16.msra.mxu0 %v8003_v35  ;;  %v3479_v48 = vadd.f32 %v3461_v39, %v3459_v12  ;;  %v8018_v8 = vld [vmem:[%s9505_s29 + $0x438] ss:$8 sps:$4 sm:$0xff]   ;;  %v8024_v62 = vld [vmem:[%s9505_s29 + $0x428] ss:$8 sps:$4 sm:$0xff]  }
 0x1de   : > { %v3266_v2 = vpack.c.b16 %v3264_v29, %v3264_v29  ;;  %v3767_v51 = vadd.f32 %v3766_v19, %v3765_v21  ;;  %v3783_v53 = vadd.f32 %v3782_v14, %v3781_v61  ;;  %3404 = vmatprep.subr.bf16.mxu0 %v8011_v44  ;;  %v4062_v55 = vadd.f32 %v4061_v3, %v4060_v0  ;;  %v8021_v63 = vld [vmem:[%s9505_s29 + $0x360] ss:$8 sps:$4 sm:$0xff]   ;;  %v8032_v35 = vld [vmem:[%s9505_s29 + $0x41c] ss:$8 sps:$4 sm:$0xff]   ;;  %v8038_v44 = vld [vmem:[%s9505_s29 + $0x40c] ss:$8 sps:$4 sm:$0xff]  }
 0x1df   : > { %3140 = vmatmul.mubr.bf16.vlgmr.msra.gmra.mxu1 %v2970_v18  ;;  %v4078_v37 = vadd.f32 %v4077_v46, %v4076_v45  ;;  %v3169_v56 = vrot.slane %v9966_v6, 4  ;;  %v3185_v57 = vrot.slane %v9968_v9, 4  ;;  %v3464_v58 = vrot.slane %v3463_v42, 4  ;;  %v8027_v18 = vld [vmem:[%s9505_s29 + $0x350] ss:$8 sps:$4 sm:$0xff]  }
 0x1e0   : > { %7147 = vmatprep.mubr.msk.bf16.mxu0 %vm1997_vm1, %v3266_v2  ;;  %3698 = vmatpush1.bf16.msra.mxu1 %v8006_v41  ;;  %v3480_v5 = vrot.slane %v3479_v48, 4  ;;  %v3768_v7 = vrot.slane %v3767_v51, 4  ;;  %v3784_v4 = vrot.slane %v3783_v53, 4  ;;  %v4063_v24 = vrot.slane %v4062_v55, 4  ;;  %v8035_v21 = vld [vmem:[%s9505_s29 + $0x344] ss:$8 sps:$4 sm:$0xff]  }
 0x1e1   : > { %7205 = vmatprep.mubr.msk.bf16.mxu1 %vm1997_vm1, %v3561_v43  ;;  %3699 = vmatprep.subr.bf16.mxu1 %v8014_v13  ;;  %v4079_v25 = vrot.slane %v4078_v37, 4  ;;  %v3170_v26 = vadd.f32 %v3169_v56, %v9966_v6  ;;  %v3186_v28 = vadd.f32 %v3185_v57, %v9968_v9  ;;  %v3465_v27 = vadd.f32 %v3464_v58, %v3463_v42  ;;  %v8030_v42 = vld [vmem:[%s9505_s29 + $0x418] ss:$8 sps:$4 sm:$0xff]   ;;  %v8036_v3 = vld [vmem:[%s9505_s29 + $0x408] ss:$8 sps:$4 sm:$0xff]  }
 0x1e2   : > { %3405 = vmatpush1.bf16.msra.mxu0 %v8009_v47  ;;  %v3481_v29 = vadd.f32 %v3480_v5, %v3479_v48  ;;  %v3769_v32 = vadd.f32 %v3768_v7, %v3767_v51  ;;  %v3785_v33 = vadd.f32 %v3784_v4, %v3783_v53  ;;  %v4064_v12 = vadd.f32 %v4063_v24, %v4062_v55  ;;  %v8033_v0 = vld [vmem:[%s9505_s29 + $0x340] ss:$8 sps:$4 sm:$0xff]   ;;  %v8041_v46 = vld [vmem:[%s9505_s29 + $0x334] ss:$8 sps:$4 sm:$0xff]   ;;  %v8047_v58 = vld [vmem:[%s9505_s29 + $0x324] ss:$8 sps:$4 sm:$0xff]  }
 0x1e3   : > { %3406 = vmatprep.subr.bf16.mxu0 %v8017_v50  ;;  %v4080_v6 = vadd.f32 %v4079_v25, %v4078_v37  ;;  %v3171_v39 = vrot.slane %v3170_v26, 2  ;;  %v3187_v9 = vrot.slane %v3186_v28, 2  ;;  %v3466_v40 = vrot.slane %v3465_v27, 2  ;;  %v8039_v37 = vld [vmem:[%s9505_s29 + $0x330] ss:$8 sps:$4 sm:$0xff]  }
 0x1e4   : > { %3700 = vmatpush1.bf16.msra.mxu1 %v8012_v60  ;;  %v3482_v41 = vrot.slane %v3481_v29, 2  ;;  %v3770_v2 = vrot.slane %v3769_v32, 2  ;;  %v3786_v30 = vrot.slane %v3785_v33, 2  ;;  %v4065_v13 = vrot.slane %v4064_v12, 2  ;;  %v8044_v60 = vld [vmem:[%s9505_s29 + $0x3fc] ss:$8 sps:$4 sm:$0xff]  }
 0x1e5   : > { %3701 = vmatprep.subr.bf16.mxu1 %v8020_v54  ;;  %v4081_v61 = vrot.slane %v4080_v6, 2  ;;  %v3172_v19 = vadd.f32 %v3171_v39, %v3170_v26  ;;  %v3188_v14 = vadd.f32 %v3187_v9, %v3186_v28  ;;  %v3467_v43 = vadd.f32 %v3466_v40, %v3465_v27  ;;  %v8042_v57 = vld [vmem:[%s9505_s29 + $0x3f8] ss:$8 sps:$4 sm:$0xff]  }
 0x1e6   : > { %3407 = vmatpush1.bf16.msra.mxu0 %v8015_v59  ;;  %v3483_v45 = vadd.f32 %v3482_v41, %v3481_v29  ;;  %v3771_v47 = vadd.f32 %v3770_v2, %v3769_v32  ;;  %v3787_v48 = vadd.f32 %v3786_v30, %v3785_v33  ;;  %v4066_v50 = vadd.f32 %v4065_v13, %v4064_v12  ;;  %v8045_v28 = vld [vmem:[%s9505_s29 + $0x320] ss:$8 sps:$4 sm:$0xff]   ;;  %v10067_v41 = vpop.permute.xlu0 %3796 }
 0x1e7   : > { %3408 = vmatprep.subr.bf16.mxu0 %v8023_v10  ;;  %v4082_v51 = vadd.f32 %v4081_v61, %v4080_v6  ;;  %v3173_v53 = vrot.slane %v3172_v19, 1  ;;  %v3189_v54 = vrot.slane %v3188_v14, 1  ;;  %v3468_v55 = vrot.slane %v3467_v43, 1  ;;  %v7119_v10 = vld [vmem:[%s9505_s29 + $0x3e0] sm:$0x33] }
 0x1e8   : > { %3702 = vmatpush1.bf16.msra.mxu1 %v8018_v8  ;;  %v3484_v56 = vrot.slane %v3483_v45, 1  ;;  %v3772_v59 = vrot.slane %v3771_v47, 1  ;;  %v3788_v5 = vrot.slane %v3787_v48, 1  ;;  %v8050_v8 = vld [vmem:[%s9505_s29 + $0x3ec] ss:$8 sps:$4 sm:$0xff]   ;;  %v4067_v7 = vrot.slane %v4066_v50, 1 }
 0x1e9   : > { %3703 = vmatprep.subr.bf16.mxu1 %v8026_v22  ;;  %v4083_v4 = vrot.slane %v4082_v51, 1  ;;  %v7177_v22 = vld [vmem:[%s9505_s29 + $0x4a8] sm:$0x33]  ;;  %v3174_v24 = vadd.f32 %v3173_v53, %v3172_v19  ;;  %v3190_v25 = vadd.f32 %v3189_v54, %v3188_v14  ;;  %v3469_v26 = vadd.f32 %v3468_v55, %v3467_v43  ;;  %v8055_v19 = vld [vmem:[%s9505_s29 + $0x3d0] ss:$8 sps:$4 sm:$0xff]  }
 0x1ea   : > { %3409 = vmatpush1.bf16.msra.mxu0 %v8021_v63  ;;  %v3485_v27 = vadd.f32 %v3484_v56, %v3483_v45  ;;  %v8048_v63 = vld [vmem:[%s9505_s29 + $0x3e8] ss:$8 sps:$4 sm:$0xff]   ;;  %v7145_v29 = vcombine.high %v7119_v10, %v7119_v10  ;;  %v3789_v32 = vadd.f32 %v3788_v5, %v3787_v48  ;;  %v7203_v33 = vcombine.high %v7177_v22, %v7177_v22  ;;  %v8058_v14 = vld [vmem:[%s9505_s29 + $0x498] ss:$8 sps:$4 sm:$0xff]   ;;  %v8063_v43 = vld [vmem:[%s9505_s29 + $0x3c4] ss:$8 sps:$4 sm:$0xff]  }
 0x1eb   : > { %3410 = vmatprep.subr.bf16.mxu0 %v8029_v31  ;;  %v3773_v31 = vadd.f32 %v3772_v59, %v3771_v47  ;;  %v4068_v12 = vadd.f32 %v4067_v7, %v4066_v50  ;;  %v4084_v6 = vadd.f32 %v4083_v4, %v4082_v51  ;;  %v3209_v39 = vadd.f32 %v9924_v36, %v3174_v24  ;;  %v8061_v48 = vld [vmem:[%s9505_s29 + $0x3c0] ss:$8 sps:$4 sm:$0xff]   ;;  %v8069_v53 = vld [vmem:[%s9505_s29 + $0x3b4] ss:$8 sps:$4 sm:$0xff]  }
 0x1ec   : > { %3704 = vmatpush1.bf16.msra.mxu1 %v8024_v62  ;;  %v7144_v62 = vcombine.low %v7119_v10, %v7119_v10  ;;  %v3211_v9 = vadd.f32 %v9924_v36, %v3190_v25  ;;  %v3504_v40 = vadd.f32 %v9928_v34, %v3469_v26  ;;  %v3802_v30 = vadd.f32 %v10067_v41, %v3789_v32  ;;  %v10074_v36 = vpop.permute.xlu1 %4091  ;;  %v8064_v51 = vld [vmem:[%s9505_s29 + $0x488] ss:$8 sps:$4 sm:$0xff]  }
 0x1ed   : > { %3705 = vmatprep.subr.bf16.mxu1 %v8032_v35  ;;  %v7202_v35 = vcombine.low %v7177_v22, %v7177_v22  ;;  %v3800_v2 = vadd.f32 %v10067_v41, %v3773_v31  ;;  %v4095_v13 = vadd.f32 %v10074_v36, %v4068_v12  ;;  %v4097_v61 = vadd.f32 %v10074_v36, %v4084_v6  ;;  %v8067_v26 = vld [vmem:[%s9505_s29 + $0x3b0] ss:$8 sps:$4 sm:$0xff]   ;;  %v8078_v31 = vld [vmem:[%s9505_s29 + $0x46c] ss:$8 sps:$4 sm:$0xff]  }
 0x1ee   : > { %3411 = vmatpush1.bf16.msra.mxu0 %v8027_v18  ;;  %v3506_v18 = vadd.f32 %v9928_v34, %v3485_v27  ;;  %vm3213_vm9 = vcmp.gt.f32.partialorder %v3209_v39, 1.0  ;;  %vm3215_vm11 = vcmp.gt.f32.partialorder %v3211_v9, 1.0  ;;  %vm3508_vm12 = vcmp.gt.f32.partialorder %v3504_v40, 1.0  ;;  %v8073_v9 = vld [vmem:[%s9505_s29 + $0x3a0] ss:$8 sps:$4 sm:$0xff]  }
 0x1ef   : > { %3412 = vmatprep.subr.bf16.mxu0 %v8035_v21  ;;  %v8057_v21 = vld [vmem:[%s9505_s29 + $0x3d4] ss:$8 sps:$4 sm:$0xff]   ;;  %v3692_v34 = vsel %vm2324_vm0, %v7202_v35, 0  ;;  %vm3804_vm14 = vcmp.gt.f32.partialorder %v3800_v2, 1.0  ;;  %vm3806_vm15 = vcmp.gt.f32.partialorder %v3802_v30, 1.0  ;;  %v7091_v45 = vsel %vm3213_vm9, 1.0, %v8572_v16 }
 0x1f0   : > { %3706 = vmatpush1.bf16.msra.mxu1 %v8030_v42  ;;  %v3397_v42 = vsel %vm2324_vm0, %v7144_v62, 0  ;;  %vm3510_vm13 = vcmp.gt.f32.partialorder %v3506_v18, 1.0  ;;  %vm4099_vm2 = vcmp.gt.f32.partialorder %v4095_v13, 1.0  ;;  %vm4101_vm3 = vcmp.gt.f32.partialorder %v4097_v61, 1.0  ;;  %v10103_v7 = vpop.permute.xlu1 %4337  ;;  %v8076_v30 = vld [vmem:[%s9505_s29 + $0x468] ss:$8 sps:$4 sm:$0xff]  }
 0x1f1   : > { %3707 = vmatprep.subr.bf16.mxu1 %v8038_v44  ;;  %v8060_v44 = vld [vmem:[%s9505_s29 + $0x49c] ss:$8 sps:$4 sm:$0xff]   ;;  %v7151_v47 = vsel %vm3510_vm13, 1.0, %v8572_v16  ;;  %v7210_v50 = vsel %vm3806_vm15, 1.0, %v8572_v16  ;;  %v3225_v54 = vpack.c.bf16 %v7091_v45, %v7091_v45  ;;  %v7268_v56 = vsel %vm4101_vm3, 1.0, %v8572_v16  ;;  %v10135_v61 = vld [vmem:[%s10890_s0 + $0x28] sm:$0xff] }
 0x1f2   : > { %3413 = vmatpush1.bf16.msra.mxu0 %v8033_v0  ;;  %v8066_v0 = vld [vmem:[%s9505_s29 + $0x48c] ss:$8 sps:$4 sm:$0xff]   ;;  %v3522_v5 = vpack.c.bf16 %v7151_v47, %v7151_v47  ;;  %v3754_v10 = vmul.f32 %v9960_v52, %v9944_v11  ;;  %v3752_v4 = vmul.f32 %v9975_v1, %v9946_v49  ;;  %v3756_v22 = vmul.f32 %v10013_v38, %v9946_v49  ;;  %v10151_v45 = vld [vmem:[%s10890_s0 + $0x38] sm:$0xff] }
 0x1f3   : > { %3414 = vmatprep.subr.bf16.mxu0 %v8041_v46  ;;  %v7149_v46 = vsel %vm3508_vm12, 1.0, %v8572_v16  ;;  %v3818_v25 = vpack.c.bf16 %v7210_v50, %v7210_v50  ;;  %v4113_v27 = vpack.c.bf16 %v7268_v56, %v7268_v56  ;;  %v4045_v40 = vmul.f32 %v9951_v15, %v9979_v17 }
 0x1f4   : > { %3708 = vmatpush1.bf16.msra.mxu1 %v8036_v3  ;;  %v7093_v3 = vsel %vm3215_vm11, 1.0, %v8572_v16  ;;  %v3520_v59 = vpack.c.bf16 %v7149_v46, %v7149_v46  ;;  %v10115_v35 = vadd.f32 %v3756_v22, %v3754_v10  ;;  %v4049_v18 = vmul.f32 %v9960_v52, %v9979_v17  ;;  %v10124_v2 = vpop.permute.xlu1 %4632  ;;  %v8087_v10 = vld [vmem:[%s9505_s29 + $0x514] ss:$8 sps:$4 sm:$0xff]  }
 0x1f5   : > { %3709 = vmatprep.subr.bf16.mxu1 %v8044_v60  ;;  %v7208_v60 = vsel %vm3804_vm14, 1.0, %v8572_v16  ;;  %v3227_v55 = vpack.c.bf16 %v7093_v3, %v7093_v3  ;;  %v3852_v6 = vunpack.c.l.b16 %v3818_v25  ;;  %v4347_v3 = vmul.f32 %v10151_v45, %v10103_v7  ;;  %v8090_v25 = vld [vmem:[%s9505_s29 + $0x5dc] ss:$8 sps:$4 sm:$0xff]  }
 0x1f6   : > { %3415 = vmatpush1.bf16.msra.mxu0 %v8039_v37  ;;  %v7266_v37 = vsel %vm4099_vm2, 1.0, %v8572_v16  ;;  %v3816_v24 = vpack.c.bf16 %v7208_v60, %v7208_v60  ;;  %v3554_v32 = vunpack.c.l.b16 %v3520_v59  ;;  %v4642_v50 = vmul.f32 %v10151_v45, %v10124_v2 }
 0x1f7   : > { %3416 = vmatprep.subr.bf16.mxu0 %v8047_v58  ;;  %v8072_v58 = vld [vmem:[%s9505_s29 + $0x47c] ss:$8 sps:$4 sm:$0xff]   ;;  %v3261_v62 = vunpack.c.l.b16 %v3227_v55 }
 0x1f8   : > { %3710 = vmatpush1.bf16.msra.mxu1 %v8042_v57  ;;  %v10096_v57 = vpop.permute.xlu0 %4332  ;;  %v3850_v12 = vunpack.c.l.b16 %v3816_v24 }
 0x1f9   : > { %3711 = vmatprep.subr.bf16.mxu1 %v8050_v8  ;;  %v3750_v8 = vmul.f32 %v9951_v15, %v9944_v11  ;;  %v8075_v11 = vld [vmem:[%s9505_s29 + $0x3a4] ss:$8 sps:$4 sm:$0xff]   ;;  %v4341_v13 = vmul.f32 %v9986_v23, %v10096_v57  ;;  %v4345_v17 = vmul.f32 %v10135_v61, %v10096_v57 }
 0x1fa   : > { %3417 = vmatpush1.bf16.msra.mxu0 %v8045_v28  ;;  %v4111_v28 = vpack.c.bf16 %v7266_v37, %v7266_v37  ;;  %v8082_v37 = vld [vmem:[%s9505_s29 + $0x5e8] ss:$8 sps:$4 sm:$0xff]  }
 0x1fb   : > { %7146 = vmatprep.subr.msk.bf16.mxu0 %vm2324_vm0, %v7145_v29  ;;  %v3259_v29 = vunpack.c.l.b16 %v3225_v54  ;;  %v10113_v49 = vadd.f32 %v3752_v4, %v3750_v8  ;;  %v4051_v54 = vmul.f32 %v10013_v38, %v9981_v20  ;;  %v4355_v59 = vsel %vm1997_vm1, %v4341_v13, 0.0 }
 0x1fc   : > { %3712 = vmatpush1.bf16.msra.mxu1 %v8048_v63  ;;  %v8070_v63 = vld [vmem:[%s9505_s29 + $0x478] ss:$8 sps:$4 sm:$0xff]   ;;  %v10117_v39 = vpop.permute.xlu0 %4627 }
 0x1fd   : > { %7204 = vmatprep.subr.msk.bf16.mxu1 %vm2324_vm0, %v7203_v33  ;;  %v3556_v33 = vunpack.c.l.b16 %v3522_v5  ;;  %v4636_v46 = vmul.f32 %v9986_v23, %v10117_v39  ;;  %v4371_v5 = vsel %vm1997_vm1, %v4345_v17, 0.0 }
 0x1fe   : > { %3425 = vmatpush2.bf16.msra.mxu0 %v3397_v42  ;;  %v4145_v42 = vunpack.c.l.b16 %v4111_v28 }
 0x1ff   : > { %3426 = vmatprep.subr.bf16.mxu0 %v8057_v21  ;;  %v4147_v21 = vunpack.c.l.b16 %v4113_v27  ;;  %v3558_v47 = vsel %vm2190_vm10, %v3556_v33, %v3554_v32  ;;  %v4650_v22 = vsel %vm1997_vm1, %v4636_v46, 0.0  ;;  %v4667_v27 = vsel %vm1997_vm1, %v4642_v50, 0.0  ;;  %v8100_v50 = vld [vmem:[%s9505_s29 + $0x5b8] ss:$8 sps:$4 sm:$0xff]  }
 0x200   : > { %3720 = vmatpush2.bf16.msra.mxu1 %v3692_v34  ;;  %v8081_v34 = vld [vmem:[%s9505_s29 + $0x524] ss:$8 sps:$4 sm:$0xff]   ;;  %v3560_v8 = vpack.c.b16 %v3558_v47, %v3558_v47 }
 0x201   : > { %3721 = vmatprep.subr.bf16.mxu1 %v8060_v44  ;;  %v4047_v44 = vmul.f32 %v9975_v1, %v9981_v20  ;;  %v4149_v56 = vsel %vm2190_vm10, %v4147_v21, %v4145_v42  ;;  %v4372_v20 = vsel %vm1997_vm1, %v4347_v3, 0.0  ;;  %v8091_v21 = vld [vmem:[%s9505_s29 + $0x500] ss:$8 sps:$4 sm:$0xff]  }
 0x202   : > { %3427 = vmatpush2.bf16.msra.mxu0 %v8055_v19  ;;  %v3263_v19 = vsel %vm2190_vm10, %v3261_v62, %v3259_v29  ;;  %v4069_v29 = vadd.f32 %v4051_v54, %v4049_v18  ;;  %v8088_v62 = vld [vmem:[%s9505_s29 + $0x5d8] ss:$8 sps:$4 sm:$0xff]   ;;  %v4373_v33 = vadd.f32 %v4372_v20, %v4371_v5  ;;  %v3775_v18 = vrot.slane %v10115_v35, 4 }
 0x203   : > { %3428 = vmatprep.subr.bf16.mxu0 %v8063_v43  ;;  %v10144_v43 = vld [vmem:[%s10890_s0 + $0x18] sm:$0xff]  ;;  %v3265_v55 = vpack.c.b16 %v3263_v19, %v3263_v19 }
 0x204   : > { %3722 = vmatpush2.bf16.msra.mxu1 %v8058_v14  ;;  %v8084_v14 = vld [vmem:[%s9505_s29 + $0x5ec] ss:$8 sps:$4 sm:$0xff]   ;;  %v4638_v60 = vmul.f32 %v10144_v43, %v10124_v2  ;;  %v4374_v17 = vrot.slane %v4373_v33, 4  ;;  %v8102_v19 = vld [vmem:[%s9505_s29 + $0x5bc] ss:$8 sps:$4 sm:$0xff]   ;;  %v3776_v46 = vadd.f32 %v3775_v18, %v10115_v35 }
 0x205   : > { %3723 = vmatprep.subr.bf16.mxu1 %v8066_v0  ;;  %v4343_v0 = vmul.f32 %v10144_v43, %v10103_v7 }
 0x206   : > { %3429 = vmatpush2.bf16.msra.mxu0 %v8061_v48  ;;  %v4640_v48 = vmul.f32 %v10135_v61, %v10117_v39  ;;  %v4651_v28 = vsel %vm1997_vm1, %v4638_v60, 0.0  ;;  %v4375_v54 = vadd.f32 %v4374_v17, %v4373_v33  ;;  %v3777_v35 = vrot.slane %v3776_v46, 2 }
 0x207   : > { %3430 = vmatprep.subr.bf16.mxu0 %v8069_v53  ;;  %v3854_v53 = vsel %vm2190_vm10, %v3852_v6, %v3850_v12  ;;  %v4356_v4 = vsel %vm1997_vm1, %v4343_v0, 0.0  ;;  %v8096_v12 = vld [vmem:[%s9505_s29 + $0x5cc] ss:$8 sps:$4 sm:$0xff]   ;;  %v4652_v6 = vadd.f32 %v4651_v28, %v4650_v22 }
 0x208   : > { %3724 = vmatpush2.bf16.msra.mxu1 %v8064_v51  ;;  %v8079_v51 = vld [vmem:[%s9505_s29 + $0x520] ss:$8 sps:$4 sm:$0xff]   ;;  %v3856_v24 = vpack.c.b16 %v3854_v53, %v3854_v53  ;;  %v4357_v32 = vadd.f32 %v4356_v4, %v4355_v59  ;;  %v8111_v4 = vld [vmem:[%s9505_s29 + $0x4d4] ss:$8 sps:$4 sm:$0xff]   ;;  %v4376_v22 = vrot.slane %v4375_v54, 2 }
 0x209   : > { %3725 = vmatprep.subr.bf16.mxu1 %v8072_v58  ;;  %v4053_v58 = vadd.f32 %v4047_v44, %v4045_v40  ;;  %v3759_v40 = vrot.slane %v10113_v49, 4  ;;  %v8099_v44 = vld [vmem:[%s9505_s29 + $0x4f4] ss:$8 sps:$4 sm:$0xff]   ;;  %v8103_v59 = vld [vmem:[%s9505_s29 + $0x4e0] ss:$8 sps:$4 sm:$0xff]  }
 0x20a   : > { %3431 = vmatpush2.bf16.msra.mxu0 %v8067_v26  ;;  %v4666_v26 = vsel %vm1997_vm1, %v4640_v48, 0.0  ;;  %v4358_v13 = vrot.slane %v4357_v32, 4  ;;  %v8097_v48 = vld [vmem:[%s9505_s29 + $0x4f0] ss:$8 sps:$4 sm:$0xff]   ;;  %v4377_v18 = vadd.f32 %v4376_v22, %v4375_v54 }
 0x20b   : > { %3432 = vmatprep.subr.bf16.mxu0 %v8075_v11  ;;  %v8085_v11 = vld [vmem:[%s9505_s29 + $0x510] ss:$8 sps:$4 sm:$0xff]   ;;  %v4054_v42 = vrot.slane %v4053_v58, 4  ;;  %v3760_v3 = vadd.f32 %v3759_v40, %v10113_v49 }
 0x20c   : > { %3726 = vmatpush2.bf16.msra.mxu1 %v8070_v63  ;;  %v4151_v63 = vpack.c.b16 %v4149_v56, %v4149_v56  ;;  %v4359_v53 = vadd.f32 %v4358_v13, %v4357_v32 }
 0x20d   : > { %3727 = vmatprep.subr.bf16.mxu1 %v8078_v31  ;;  %v8093_v31 = vld [vmem:[%s9505_s29 + $0x504] ss:$8 sps:$4 sm:$0xff]   ;;  %v4055_v47 = vadd.f32 %v4054_v42, %v4053_v58  ;;  %v3761_v56 = vrot.slane %v3760_v3, 2 }
 0x20e   : > { %3433 = vmatpush2.bf16.msra.mxu0 %v8073_v9  ;;  %v4668_v9 = vadd.f32 %v4667_v27, %v4666_v26  ;;  %v4360_v20 = vrot.slane %v4359_v53, 2  ;;  %v8120_v42 = vld [vmem:[%s9505_s29 + $0x58c] ss:$8 sps:$4 sm:$0xff]  }
 0x20f   : > { %3992 = vmatprep.subr.bf16.mxu0 %v8081_v34  ;;  %v8094_v34 = vld [vmem:[%s9505_s29 + $0x5c8] ss:$8 sps:$4 sm:$0xff]   ;;  %v4056_v58 = vrot.slane %v4055_v47, 2 }
 0x210   : > { %3728 = vmatpush2.bf16.msra.mxu1 %v8076_v30  ;;  %v4070_v30 = vrot.slane %v4069_v29, 4  ;;  %v4669_v0 = vrot.slane %v4668_v9, 4  ;;  %v4361_v40 = vadd.f32 %v4360_v20, %v4359_v53  ;;  %v7235_v53 = vld [vmem:[%s9505_s29 + $0x570] sm:$0x33] }
 0x211   : > { %4287 = vmatprep.subr.bf16.mxu1 %v8084_v14  ;;  %3435 = vmatmul.mubr.bf16.vlgmr.msra.gmra.mxu0 %v3265_v55  ;;  %v4653_v14 = vrot.slane %v4652_v6, 4  ;;  %v8108_v55 = vld [vmem:[%s9505_s29 + $0x5ac] ss:$8 sps:$4 sm:$0xff]  }
 0x212   : > { %3993 = vmatpush1.bf16.msra.mxu0 %v8079_v51  ;;  %7263 = vmatprep.mubr.msk.bf16.mxu0 %vm1997_vm1, %v3856_v24  ;;  %v4071_v60 = vadd.f32 %v4070_v30, %v4069_v29  ;;  %v8105_v51 = vld [vmem:[%s9505_s29 + $0x4e4] ss:$8 sps:$4 sm:$0xff]   ;;  %v4670_v49 = vadd.f32 %v4669_v0, %v4668_v9  ;;  %v4057_v29 = vadd.f32 %v4056_v58, %v4055_v47  ;;  %v8115_v0 = vld [vmem:[%s9505_s29 + $0x4c0] ss:$8 sps:$4 sm:$0xff]   ;;  %v8123_v47 = vld [vmem:[%s9505_s29 + $0x4b4] ss:$8 sps:$4 sm:$0xff]  }
 0x213   : > { %3730 = vmatmul.mubr.bf16.vlgmr.msra.gmra.mxu1 %v3560_v8  ;;  %3994 = vmatprep.subr.bf16.mxu0 %v8087_v10  ;;  %v8106_v10 = vld [vmem:[%s9505_s29 + $0x5a8] ss:$8 sps:$4 sm:$0xff]   ;;  %v8114_v24 = vld [vmem:[%s9505_s29 + $0x59c] ss:$8 sps:$4 sm:$0xff]  }
 0x214   : > { %4288 = vmatpush1.bf16.msra.mxu1 %v8082_v37  ;;  %7321 = vmatprep.mubr.msk.bf16.mxu1 %vm1997_vm1, %v4151_v63  ;;  %v4654_v37 = vadd.f32 %v4653_v14, %v4652_v6  ;;  %v4072_v8 = vrot.slane %v4071_v60, 2  ;;  %v4671_v28 = vrot.slane %v4670_v49, 2  ;;  %v3762_v63 = vadd.f32 %v3761_v56, %v3760_v3  ;;  %v8117_v6 = vld [vmem:[%s9505_s29 + $0x4c4] ss:$8 sps:$4 sm:$0xff]   ;;  %v8121_v58 = vld [vmem:[%s9505_s29 + $0x4b0] ss:$8 sps:$4 sm:$0xff]  }
 0x215   : > { %4289 = vmatprep.subr.bf16.mxu1 %v8090_v25  ;;  %v4058_v14 = vrot.slane %v4057_v29, 1 }
 0x216   : > { %3995 = vmatpush1.bf16.msra.mxu0 %v8085_v11  ;;  %v4655_v26 = vrot.slane %v4654_v37, 2  ;;  %v3778_v11 = vadd.f32 %v3777_v35, %v3776_v46  ;;  %v4073_v33 = vadd.f32 %v4072_v8, %v4071_v60  ;;  %v3763_v17 = vrot.slane %v3762_v63, 1  ;;  %v8118_v46 = vld [vmem:[%s9505_s29 + $0x588] ss:$8 sps:$4 sm:$0xff]  }
 0x217   : > { %3996 = vmatprep.subr.bf16.mxu0 %v8093_v31  ;;  %v4362_v60 = vrot.slane %v4361_v40, 1  ;;  %v4059_v35 = vadd.f32 %v4058_v14, %v4057_v29  ;;  %v7261_v8 = vcombine.high %v7235_v53, %v7235_v53  ;;  %v10222_v29 = vpop.permute.xlu0 %4386  ;;  %v8137_v14 = vld [vmem:[%s9505_s29 + $0x550] ss:$8 sps:$4 sm:$0xff]  }
 0x218   : > { %4290 = vmatpush1.bf16.msra.mxu1 %v8088_v62  ;;  %v8109_v62 = vld [vmem:[%s9505_s29 + $0x4d0] ss:$8 sps:$4 sm:$0xff]   ;;  %v4074_v3 = vrot.slane %v4073_v33, 1 }
 0x219   : > { %4291 = vmatprep.subr.bf16.mxu1 %v8096_v12  ;;  %v8112_v12 = vld [vmem:[%s9505_s29 + $0x598] ss:$8 sps:$4 sm:$0xff]  }
 0x21a   : > { %3997 = vmatpush1.bf16.msra.mxu0 %v8091_v21 }
 0x21b   : > { %3998 = vmatprep.subr.bf16.mxu0 %v8099_v44  ;;  %v4672_v44 = vadd.f32 %v4671_v28, %v4670_v49  ;;  %v3764_v49 = vadd.f32 %v3763_v17, %v3762_v63  ;;  %v4094_v63 = vadd.f32 %v10074_v36, %v4059_v35  ;;  %v4344_v35 = vmul.f32 %v9960_v52, %v10096_v57 }
 0x21c   : > { %4292 = vmatpush1.bf16.msra.mxu1 %v8094_v34  ;;  %v4656_v34 = vadd.f32 %v4655_v26, %v4654_v37  ;;  %v7293_v37 = vld [vmem:[%s9505_s29 + $0x638] sm:$0x33] }
 0x21d   : > { %4293 = vmatprep.subr.bf16.mxu1 %v8102_v19  ;;  %v3779_v19 = vrot.slane %v3778_v11, 1  ;;  %v7319_v22 = vcombine.high %v7293_v37, %v7293_v37  ;;  %v3799_v28 = vadd.f32 %v10067_v41, %v3764_v49  ;;  %vm4098_vm6 = vcmp.gt.f32.partialorder %v4094_v63, 1.0 }
 0x21e   : > { %3999 = vmatpush1.bf16.msra.mxu0 %v8097_v48  ;;  %v4657_v54 = vrot.slane %v4656_v34, 1  ;;  %v7265_v17 = vsel %vm4098_vm6, 1.0, %v8572_v16  ;;  %v4340_v49 = vmul.f32 %v9951_v15, %v10096_v57 }
 0x21f   : > { %4000 = vmatprep.subr.bf16.mxu0 %v8105_v51  ;;  %v8126_v51 = vld [vmem:[%s9505_s29 + $0x57c] ss:$8 sps:$4 sm:$0xff]   ;;  %v3780_v56 = vadd.f32 %v3779_v19, %v3778_v11  ;;  %vm3803_vm4 = vcmp.gt.f32.partialorder %v3799_v28, 1.0 }
 0x220   : > { %4294 = vmatpush1.bf16.msra.mxu1 %v8100_v50  ;;  %v4378_v50 = vrot.slane %v4377_v18, 1 }
 0x221   : > { %4295 = vmatprep.subr.bf16.mxu1 %v8108_v55  ;;  %v4673_v55 = vrot.slane %v4672_v44, 1 }
 0x222   : > { %4001 = vmatpush1.bf16.msra.mxu0 %v8103_v59  ;;  %v4075_v59 = vadd.f32 %v4074_v3, %v4073_v33  ;;  %v4379_v20 = vadd.f32 %v4378_v50, %v4377_v18  ;;  %v8131_v18 = vld [vmem:[%s9505_s29 + $0x560] ss:$8 sps:$4 sm:$0xff]  }
 0x223   : > { %4002 = vmatprep.subr.bf16.mxu0 %v8111_v4  ;;  %v4363_v4 = vadd.f32 %v4362_v60, %v4361_v40  ;;  %v4674_v26 = vadd.f32 %v4673_v55, %v4672_v44  ;;  %v7207_v44 = vsel %vm3803_vm4, 1.0, %v8572_v16  ;;  %v4110_v55 = vpack.c.bf16 %v7265_v17, %v7265_v17 }
 0x224   : > { %4296 = vmatpush1.bf16.msra.mxu1 %v8106_v10  ;;  %v7260_v10 = vcombine.low %v7235_v53, %v7235_v53  ;;  %v4096_v11 = vadd.f32 %v10074_v36, %v4075_v59  ;;  %v10251_v53 = vpop.permute.xlu0 %4922 }
 0x225   : > { %4297 = vmatprep.subr.bf16.mxu1 %v8114_v24  ;;  %v7318_v24 = vcombine.low %v7293_v37, %v7293_v37  ;;  %v4390_v33 = vadd.f32 %v10222_v29, %v4363_v4  ;;  %v4144_v28 = vunpack.c.l.b16 %v4110_v55 }
 0x226   : > { %4003 = vmatpush1.bf16.msra.mxu0 %v8109_v62  ;;  %v3987_v62 = vsel %vm2324_vm0, %v7260_v10, 0  ;;  %vm4100_vm7 = vcmp.gt.f32.partialorder %v4096_v11, 1.0  ;;  %v4346_v10 = vmul.f32 %v10013_v38, %v10103_v7 }
 0x227   : > { %4004 = vmatprep.subr.bf16.mxu0 %v8117_v6  ;;  %v4282_v36 = vsel %vm2324_vm0, %v7318_v24, 0  ;;  %v8136_v6 = vld [vmem:[%s9505_s29 + $0x62c] ss:$8 sps:$4 sm:$0xff]   ;;  %vm4394_vm8 = vcmp.gt.f32.partialorder %v4390_v33, 1.0  ;;  %v7267_v19 = vsel %vm4100_vm7, 1.0, %v8572_v16 }
 0x228   : > { %4298 = vmatpush1.bf16.msra.mxu1 %v8112_v12  ;;  %v4392_v12 = vadd.f32 %v10222_v29, %v4379_v20  ;;  %v4112_v37 = vpack.c.bf16 %v7267_v19, %v7267_v19  ;;  %v8151_v24 = vld [vmem:[%s9505_s29 + $0x534] ss:$8 sps:$4 sm:$0xff]   ;;  %v8149_v33 = vld [vmem:[%s9505_s29 + $0x530] ss:$8 sps:$4 sm:$0xff]  }
 0x229   : > { %4299 = vmatprep.subr.bf16.mxu1 %v8120_v42  ;;  %v8134_v42 = vld [vmem:[%s9505_s29 + $0x628] ss:$8 sps:$4 sm:$0xff]  }
 0x22a   : > { %4005 = vmatpush1.bf16.msra.mxu0 %v8115_v0  ;;  %vm4396_vm9 = vcmp.gt.f32.partialorder %v4392_v12, 1.0  ;;  %v7324_v0 = vsel %vm4394_vm8, 1.0, %v8572_v16  ;;  %v10275_v12 = vadd.f32 %v4346_v10, %v4344_v35 }
 0x22b   : > { %4006 = vmatprep.subr.bf16.mxu0 %v8123_v47  ;;  %v7326_v3 = vsel %vm4396_vm9, 1.0, %v8572_v16  ;;  %v8145_v47 = vld [vmem:[%s9505_s29 + $0x544] ss:$8 sps:$4 sm:$0xff]   ;;  %v4406_v59 = vpack.c.bf16 %v7324_v0, %v7324_v0 }
 0x22c   : > { %4300 = vmatpush1.bf16.msra.mxu1 %v8118_v46  ;;  %v8140_v46 = vld [vmem:[%s9505_s29 + $0x618] ss:$8 sps:$4 sm:$0xff]  }
 0x22d   : > { %4301 = vmatprep.subr.bf16.mxu1 %v8126_v51  ;;  %v4440_v11 = vunpack.c.l.b16 %v4406_v59 }
 0x22e   : > { %4007 = vmatpush1.bf16.msra.mxu0 %v8121_v58  ;;  %v4342_v58 = vmul.f32 %v9975_v1, %v10103_v7  ;;  %v4635_v7 = vmul.f32 %v9951_v15, %v10117_v39  ;;  %v8157_v15 = vld [vmem:[%s9505_s29 + $0x6b4] ss:$8 sps:$4 sm:$0xff]  }
 0x22f   : > { %7262 = vmatprep.subr.msk.bf16.mxu0 %vm2324_vm0, %v7261_v8  ;;  %v8143_v8 = vld [vmem:[%s9505_s29 + $0x540] ss:$8 sps:$4 sm:$0xff]  }
 0x230   : > { %v10268_v63 = vadd.f32 %v4342_v58, %v4340_v49  ;;  %v8166_v58 = vld [vmem:[%s9505_s29 + $0x76c] ss:$8 sps:$4 sm:$0xff]  }
 0x232   : > { %4015 = vmatpush2.bf16.msra.mxu0 %v3987_v62 }
 0x266   : > { %v2365_v5 = vpop.f32.mrf.mxu0 }
 0x268   : > { %v2367_v25 = vpop.f32.mrf.mxu0 }
 0x269   : > { %v2553_v27 = vpop.f32.mrf.mxu1 }
 0x26a   : > { %v10203_v31 = vadd.f32 %v2553_v27, %v2365_v5  ;;  %v2369_v32 = vpop.f32.mrf.mxu0  ;;  %v8124_v5 = vld [vmem:[%s9505_s29 + $0x578] ss:$8 sps:$4 sm:$0xff]   ;;  %v3801_v27 = vadd.f32 %v10067_v41, %v3780_v56  ;;  %v10229_v41 = vpop.permute.xlu1 %4681 }
 0x26b   : > { %v2555_v9 = vpop.f32.mrf.mxu1  ;;  %4302 = vmatpush1.bf16.msra.mxu1 %v8124_v5  ;;  %v8133_v32 = vld [vmem:[%s9505_s29 + $0x564] ss:$8 sps:$4 sm:$0xff]   ;;  %v4687_v40 = vadd.f32 %v10229_v41, %v4674_v26  ;;  %v4408_v5 = vpack.c.bf16 %v7326_v3, %v7326_v3  ;;  %v8155_v3 = vld [vmem:[%s9505_s29 + $0x6b0] ss:$8 sps:$4 sm:$0xff]  }
 0x26c   : > { %v10208_v21 = vadd.f32 %v2555_v9, %v2367_v25  ;;  %v2370_v30 = vpop.f32.mrf.mxu0  ;;  %v4658_v25 = vadd.f32 %v4657_v54, %v4656_v34  ;;  %7320 = vmatprep.subr.msk.bf16.mxu1 %vm2324_vm0, %v7319_v22  ;;  %vm3805_vm5 = vcmp.gt.f32.partialorder %v3801_v27, 1.0  ;;  %4016 = vmatprep.subr.bf16.mxu0 %v8133_v32  ;;  %v8142_v34 = vld [vmem:[%s9505_s29 + $0x61c] ss:$8 sps:$4 sm:$0xff]   ;;  %v8148_v54 = vld [vmem:[%s9505_s29 + $0x60c] ss:$8 sps:$4 sm:$0xff]   ;;  %v4146_v27 = vunpack.c.l.b16 %v4112_v37  ;;  %v10272_v32 = vpop.permute.xlu0 %5217 }
 0x26d   : > { %v2557_v13 = vpop.f32.mrf.mxu1  ;;  %v8139_v30 = vld [vmem:[%s9505_s29 + $0x554] ss:$8 sps:$4 sm:$0xff]   ;;  %vm4691_vm12 = vcmp.gt.f32.partialorder %v4687_v40, 1.0  ;;  %4017 = vmatpush2.bf16.msra.mxu0 %v8131_v18  ;;  %v8146_v22 = vld [vmem:[%s9505_s29 + $0x608] ss:$8 sps:$4 sm:$0xff]   ;;  %v4442_v62 = vunpack.c.l.b16 %v4408_v5  ;;  %v5230_v19 = vmul.f32 %v10135_v61, %v10272_v32 }
 0x26e   : > { %v4685_v9 = vadd.f32 %v10229_v41, %v4658_v25  ;;  %v7209_v13 = vsel %vm3805_vm5, 1.0, %v8572_v16  ;;  %4018 = vmatprep.subr.bf16.mxu0 %v8139_v30  ;;  %v7384_v51 = vsel %vm4691_vm12, 1.0, %v8572_v16  ;;  %v10256_v56 = vpop.permute.xlu1 %4927  ;;  %v8154_v26 = vld [vmem:[%s9505_s29 + $0x5fc] ss:$8 sps:$4 sm:$0xff]   ;;  %v8152_v18 = vld [vmem:[%s9505_s29 + $0x5f8] ss:$8 sps:$4 sm:$0xff]   ;;  %v4931_v30 = vmul.f32 %v9986_v23, %v10251_v53 }
 0x26f   : > { %v2558_v48 = vpop.f32.mrf.mxu1  ;;  %4310 = vmatpush2.bf16.msra.mxu1 %v4282_v36  ;;  %v3817_v60 = vpack.c.bf16 %v7209_v13, %v7209_v13  ;;  %v4703_v20 = vpack.c.bf16 %v7384_v51, %v7384_v51  ;;  %v4639_v36 = vmul.f32 %v9960_v52, %v10117_v39  ;;  %v8160_v39 = vld [vmem:[%s9505_s29 + $0x77c] ss:$8 sps:$4 sm:$0xff]   ;;  %v4937_v13 = vmul.f32 %v10151_v45, %v10256_v56 }
 0x270   : > { %4311 = vmatprep.subr.bf16.mxu1 %v8136_v6  ;;  %vm4689_vm11 = vcmp.gt.f32.partialorder %v4685_v9, 1.0  ;;  %v3815_v48 = vpack.c.bf16 %v7207_v44, %v7207_v44  ;;  %v4933_v44 = vmul.f32 %v10144_v43, %v10256_v56  ;;  %v4148_v17 = vsel %vm2190_vm10, %v4146_v27, %v4144_v28  ;;  %v8163_v37 = vld [vmem:[%s9505_s29 + $0x6a4] ss:$8 sps:$4 sm:$0xff]  }
 0x271   : > { %v7382_v50 = vsel %vm4689_vm11, 1.0, %v8572_v16  ;;  %4019 = vmatpush2.bf16.msra.mxu0 %v8137_v14  ;;  %v3851_v57 = vunpack.c.l.b16 %v3817_v60  ;;  %v4737_v9 = vunpack.c.l.b16 %v4703_v20  ;;  %v4945_v51 = vsel %vm1997_vm1, %v4931_v30, 0.0 }
 0x272   : > { %v4701_v4 = vpack.c.bf16 %v7382_v50, %v7382_v50  ;;  %4020 = vmatprep.subr.bf16.mxu0 %v8145_v47  ;;  %v3849_v25 = vunpack.c.l.b16 %v3815_v48  ;;  %v10279_v40 = vpop.permute.xlu1 %5222  ;;  %v4641_v47 = vmul.f32 %v10013_v38, %v10124_v2  ;;  %v8158_v48 = vld [vmem:[%s9505_s29 + $0x778] ss:$8 sps:$4 sm:$0xff]   ;;  %v4150_v55 = vpack.c.b16 %v4148_v17, %v4148_v17  ;;  %v8176_v17 = vld [vmem:[%s9505_s29 + $0x748] ss:$8 sps:$4 sm:$0xff]  }
 0x273   : > { %4312 = vmatpush2.bf16.msra.mxu1 %v8134_v42  ;;  %v4637_v42 = vmul.f32 %v9975_v1, %v10124_v2  ;;  %v5226_v1 = vmul.f32 %v9986_v23, %v10272_v32  ;;  %v5228_v14 = vmul.f32 %v10144_v43, %v10279_v40  ;;  %v5232_v0 = vmul.f32 %v10151_v45, %v10279_v40 }
 0x274   : > { %4313 = vmatprep.subr.bf16.mxu1 %v8142_v34  ;;  %v4735_v6 = vunpack.c.l.b16 %v4701_v4  ;;  %v4935_v34 = vmul.f32 %v10135_v61, %v10251_v53  ;;  %v3853_v52 = vsel %vm2190_vm10, %v3851_v57, %v3849_v25  ;;  %v4946_v49 = vsel %vm1997_vm1, %v4933_v44, 0.0  ;;  %v8161_v4 = vld [vmem:[%s9505_s29 + $0x6a0] ss:$8 sps:$4 sm:$0xff]  }
 0x275   : > { %4021 = vmatpush2.bf16.msra.mxu0 %v8143_v8  ;;  %v3855_v23 = vpack.c.b16 %v3853_v52, %v3853_v52  ;;  %v4643_v50 = vadd.f32 %v4637_v42, %v4635_v7  ;;  %v4962_v38 = vsel %vm1997_vm1, %v4937_v13, 0.0  ;;  %v5240_v2 = vsel %vm1997_vm1, %v5226_v1, 0.0  ;;  %v8178_v42 = vld [vmem:[%s9505_s29 + $0x74c] ss:$8 sps:$4 sm:$0xff]   ;;  %v8173_v13 = vld [vmem:[%s9505_s29 + $0x680] ss:$8 sps:$4 sm:$0xff]  }
 0x276   : > { %4022 = vmatprep.subr.bf16.mxu0 %v8151_v24  ;;  %v4739_v60 = vsel %vm2190_vm10, %v4737_v9, %v4735_v6  ;;  %v5256_v59 = vsel %vm1997_vm1, %v5230_v19, 0.0  ;;  %v5241_v5 = vsel %vm1997_vm1, %v5228_v14, 0.0  ;;  %v5257_v8 = vsel %vm1997_vm1, %v5232_v0, 0.0  ;;  %v8169_v24 = vld [vmem:[%s9505_s29 + $0x694] ss:$8 sps:$4 sm:$0xff]  }
 0x277   : > { %4314 = vmatpush2.bf16.msra.mxu1 %v8140_v46  ;;  %v4444_v46 = vsel %vm2190_vm10, %v4442_v62, %v4440_v11  ;;  %v4741_v10 = vpack.c.b16 %v4739_v60, %v4739_v60  ;;  %v4659_v20 = vadd.f32 %v4641_v47, %v4639_v36  ;;  %v4947_v25 = vadd.f32 %v4946_v49, %v4945_v51  ;;  %v8170_v6 = vld [vmem:[%s9505_s29 + $0x758] ss:$8 sps:$4 sm:$0xff]   ;;  %v8175_v9 = vld [vmem:[%s9505_s29 + $0x684] ss:$8 sps:$4 sm:$0xff]   ;;  %v8181_v19 = vld [vmem:[%s9505_s29 + $0x674] ss:$8 sps:$4 sm:$0xff]  }
 0x278   : > { %4315 = vmatprep.subr.bf16.mxu1 %v8148_v54  ;;  %v4961_v54 = vsel %vm1997_vm1, %v4935_v34, 0.0  ;;  %v4446_v35 = vpack.c.b16 %v4444_v46, %v4444_v46  ;;  %v5242_v28 = vadd.f32 %v5241_v5, %v5240_v2  ;;  %v5258_v27 = vadd.f32 %v5257_v8, %v5256_v59  ;;  %v8187_v51 = vld [vmem:[%s9505_s29 + $0x664] ss:$8 sps:$4 sm:$0xff]   ;;  %v8185_v59 = vld [vmem:[%s9505_s29 + $0x660] ss:$8 sps:$4 sm:$0xff]  }
 0x279   : > { %4023 = vmatpush2.bf16.msra.mxu0 %v8149_v33  ;;  %v4963_v57 = vadd.f32 %v4962_v38, %v4961_v54  ;;  %v4349_v7 = vrot.slane %v10268_v63, 4  ;;  %v4365_v11 = vrot.slane %v10275_v12, 4  ;;  %v4644_v62 = vrot.slane %v4643_v50, 4  ;;  %v8167_v33 = vld [vmem:[%s9505_s29 + $0x690] ss:$8 sps:$4 sm:$0xff]  }
 0x27a   : > { %4582 = vmatprep.subr.bf16.mxu0 %v8157_v15  ;;  %v4660_v36 = vrot.slane %v4659_v20, 4  ;;  %v5243_v30 = vrot.slane %v5242_v28, 4  ;;  %v5259_v34 = vrot.slane %v5258_v27, 4  ;;  %v8188_v8 = vld [vmem:[%s9505_s29 + $0x728] ss:$8 sps:$4 sm:$0xff]  }
 0x27b   : > { %4316 = vmatpush2.bf16.msra.mxu1 %v8146_v22  ;;  %v8164_v22 = vld [vmem:[%s9505_s29 + $0x768] ss:$8 sps:$4 sm:$0xff]   ;;  %v4964_v15 = vrot.slane %v4963_v57, 4  ;;  %v4350_v52 = vadd.f32 %v4349_v7, %v10268_v63  ;;  %v4645_v44 = vadd.f32 %v4644_v62, %v4643_v50  ;;  %v8182_v50 = vld [vmem:[%s9505_s29 + $0x738] ss:$8 sps:$4 sm:$0xff]  }
 0x27c   : > { %4317 = vmatprep.subr.bf16.mxu1 %v8154_v26  ;;  %4025 = vmatmul.mubr.bf16.vlgmr.msra.gmra.mxu0 %v3855_v23  ;;  %v8172_v26 = vld [vmem:[%s9505_s29 + $0x75c] ss:$8 sps:$4 sm:$0xff]   ;;  %v4661_v1 = vadd.f32 %v4660_v36, %v4659_v20  ;;  %v5244_v46 = vadd.f32 %v5243_v30, %v5242_v28  ;;  %v5260_v63 = vadd.f32 %v5259_v34, %v5258_v27  ;;  %v8191_v27 = vld [vmem:[%s9505_s29 + $0x650] ss:$8 sps:$4 sm:$0xff]  }
 0x27d   : > { %4583 = vmatpush1.bf16.msra.mxu0 %v8155_v3  ;;  %7379 = vmatprep.mubr.msk.bf16.mxu0 %vm1997_vm1, %v4446_v35  ;;  %v4965_v0 = vadd.f32 %v4964_v15, %v4963_v57  ;;  %v8184_v3 = vld [vmem:[%s9505_s29 + $0x73c] ss:$8 sps:$4 sm:$0xff]   ;;  %v4351_v47 = vrot.slane %v4350_v52, 2  ;;  %v4646_v23 = vrot.slane %v4645_v44, 2 }
 0x27e   : > { %4584 = vmatprep.subr.bf16.mxu0 %v8163_v37  ;;  %v4662_v60 = vrot.slane %v4661_v1, 2  ;;  %v8190_v37 = vld [vmem:[%s9505_s29 + $0x72c] ss:$8 sps:$4 sm:$0xff]   ;;  %v5245_v49 = vrot.slane %v5244_v46, 2  ;;  %v5261_v38 = vrot.slane %v5260_v63, 2 }
 0x27f   : > { %4318 = vmatpush2.bf16.msra.mxu1 %v8152_v18  ;;  %v4948_v18 = vrot.slane %v4947_v25, 4  ;;  %v4352_v2 = vadd.f32 %v4351_v47, %v4350_v52  ;;  %v8199_v62 = vld [vmem:[%s9505_s29 + $0x644] ss:$8 sps:$4 sm:$0xff]  }
 0x280   : > { %4877 = vmatprep.subr.bf16.mxu1 %v8160_v39  ;;  %v4366_v39 = vadd.f32 %v4365_v11, %v10275_v12  ;;  %v4663_v5 = vadd.f32 %v4662_v60, %v4661_v1  ;;  %v8194_v11 = vld [vmem:[%s9505_s29 + $0x718] ss:$8 sps:$4 sm:$0xff]   ;;  %v10358_v60 = vpop.permute.xlu0 %4976 }
 0x281   : > { %4585 = vmatpush1.bf16.msra.mxu0 %v8161_v4  ;;  %v4949_v14 = vadd.f32 %v4948_v18, %v4947_v25  ;;  %v5262_v25 = vadd.f32 %v5261_v38, %v5260_v63  ;;  %v4353_v57 = vrot.slane %v4352_v2, 1 }
 0x282   : > { %4320 = vmatmul.mubr.bf16.vlgmr.msra.gmra.mxu1 %v4150_v55  ;;  %4586 = vmatprep.subr.bf16.mxu0 %v8169_v24  ;;  %v4367_v12 = vrot.slane %v4366_v39, 2  ;;  %v4966_v55 = vrot.slane %v4965_v0, 2  ;;  %v5246_v24 = vadd.f32 %v5245_v49, %v5244_v46  ;;  %v4664_v7 = vrot.slane %v4663_v5, 1 }
 0x283   : > { %4878 = vmatpush1.bf16.msra.mxu1 %v8158_v48  ;;  %7437 = vmatprep.mubr.msk.bf16.mxu1 %vm1997_vm1, %v4741_v10  ;;  %v8179_v48 = vld [vmem:[%s9505_s29 + $0x670] ss:$8 sps:$4 sm:$0xff]   ;;  %v4950_v54 = vrot.slane %v4949_v14, 2  ;;  %v8193_v10 = vld [vmem:[%s9505_s29 + $0x654] ss:$8 sps:$4 sm:$0xff]   ;;  %v5263_v15 = vrot.slane %v5262_v25, 1  ;;  %v4354_v30 = vadd.f32 %v4353_v57, %v4352_v2 }
 0x284   : > { %4879 = vmatprep.subr.bf16.mxu1 %v8166_v58  ;;  %v4368_v35 = vadd.f32 %v4367_v12, %v4366_v39  ;;  %v4647_v58 = vadd.f32 %v4646_v23, %v4645_v44  ;;  %v4967_v20 = vadd.f32 %v4966_v55, %v4965_v0  ;;  %v5247_v18 = vrot.slane %v5246_v24, 1  ;;  %v8197_v39 = vld [vmem:[%s9505_s29 + $0x640] ss:$8 sps:$4 sm:$0xff]   ;;  %v8207_v2 = vld [vmem:[%s9505_s29 + $0x6f0] ss:$8 sps:$4 sm:$0xff]  }
 0x285   : > { %4587 = vmatpush1.bf16.msra.mxu0 %v8167_v33  ;;  %v4951_v4 = vadd.f32 %v4950_v54, %v4949_v14  ;;  %v4665_v44 = vadd.f32 %v4664_v7, %v4663_v5  ;;  %v5264_v63 = vadd.f32 %v5263_v15, %v5262_v25  ;;  %v4389_v47 = vadd.f32 %v10222_v29, %v4354_v30  ;;  %v8216_v25 = vld [vmem:[%s9505_s29 + $0x7a8] ss:$8 sps:$4 sm:$0xff]   ;;  %v8221_v57 = vld [vmem:[%s9505_s29 + $0x6d4] ss:$8 sps:$4 sm:$0xff]   ;;  %v10402_v15 = vld [vmem:[%s10890_s0 + $0x20] sm:$0xff] }
 0x286   : > { %4588 = vmatprep.subr.bf16.mxu0 %v8175_v9  ;;  %v4648_v28 = vrot.slane %v4647_v58, 1  ;;  %v4968_v36 = vrot.slane %v4967_v20, 1  ;;  %v7351_v9 = vld [vmem:[%s9505_s29 + $0x700] sm:$0x33]  ;;  %v5248_v46 = vadd.f32 %v5247_v18, %v5246_v24  ;;  %v10409_v30 = vld [vmem:[%s10890_s0 + $0x10] sm:$0xff] }
 0x287   : > { %4880 = vmatpush1.bf16.msra.mxu1 %v8164_v22  ;;  %v8196_v22 = vld [vmem:[%s9505_s29 + $0x71c] ss:$8 sps:$4 sm:$0xff]   ;;  %v4952_v33 = vrot.slane %v4951_v4, 1  ;;  %v7377_v1 = vcombine.high %v7351_v9, %v7351_v9  ;;  %vm4393_vm13 = vcmp.gt.f32.partialorder %v4389_v47, 1.0 }
 0x288   : > { %4881 = vmatprep.subr.bf16.mxu1 %v8172_v26  ;;  %v4369_v26 = vrot.slane %v4368_v35, 1  ;;  %v4649_v52 = vadd.f32 %v4648_v28, %v4647_v58  ;;  %v4969_v14 = vadd.f32 %v4968_v36, %v4967_v20  ;;  %v8215_v58 = vld [vmem:[%s9505_s29 + $0x6e4] ss:$8 sps:$4 sm:$0xff]   ;;  %v7323_v5 = vsel %vm4393_vm13, 1.0, %v8572_v16  ;;  %v8213_v20 = vld [vmem:[%s9505_s29 + $0x6e0] ss:$8 sps:$4 sm:$0xff]  }
 0x289   : > { %4589 = vmatpush1.bf16.msra.mxu0 %v8173_v13  ;;  %v8200_v13 = vld [vmem:[%s9505_s29 + $0x708] ss:$8 sps:$4 sm:$0xff]  }
 0x28a   : > { %4590 = vmatprep.subr.bf16.mxu0 %v8181_v19  ;;  %v4370_v34 = vadd.f32 %v4369_v26, %v4368_v35  ;;  %v4953_v19 = vadd.f32 %v4952_v33, %v4951_v4  ;;  %v4684_v23 = vadd.f32 %v10229_v41, %v4649_v52  ;;  %v4982_v55 = vadd.f32 %v10358_v60, %v4969_v14  ;;  %v8210_v35 = vld [vmem:[%s9505_s29 + $0x7b8] ss:$8 sps:$4 sm:$0xff]   ;;  %v8227_v14 = vld [vmem:[%s9505_s29 + $0x6c4] ss:$8 sps:$4 sm:$0xff]  }
 0x28b   : > { %4882 = vmatpush1.bf16.msra.mxu1 %v8170_v6  ;;  %v8202_v6 = vld [vmem:[%s9505_s29 + $0x70c] ss:$8 sps:$4 sm:$0xff]   ;;  %v4405_v26 = vpack.c.bf16 %v7323_v5, %v7323_v5 }
 0x28c   : > { %4883 = vmatprep.subr.bf16.mxu1 %v8178_v42  ;;  %v7409_v42 = vld [vmem:[%s9505_s29 + $0x7c8] sm:$0x33]  ;;  %v4391_v12 = vadd.f32 %v10222_v29, %v4370_v34  ;;  %v4980_v54 = vadd.f32 %v10358_v60, %v4953_v19  ;;  %v10365_v29 = vpop.permute.xlu1 %5271  ;;  %vm4688_vm15 = vcmp.gt.f32.partialorder %v4684_v23, 1.0  ;;  %vm4986_vm4 = vcmp.gt.f32.partialorder %v4982_v55, 1.0  ;;  %v8222_v19 = vld [vmem:[%s9505_s29 + $0x798] ss:$8 sps:$4 sm:$0xff]  }
 0x28d   : > { %4591 = vmatpush1.bf16.msra.mxu0 %v8179_v48  ;;  %v7435_v0 = vcombine.high %v7409_v42, %v7409_v42  ;;  %v4686_v48 = vadd.f32 %v10229_v41, %v4665_v44  ;;  %v5275_v49 = vadd.f32 %v10365_v29, %v5248_v46  ;;  %v5277_v38 = vadd.f32 %v10365_v29, %v5264_v63  ;;  %v8219_v44 = vld [vmem:[%s9505_s29 + $0x6d0] ss:$8 sps:$4 sm:$0xff]   ;;  %v8230_v46 = vld [vmem:[%s9505_s29 + $0x78c] ss:$8 sps:$4 sm:$0xff]  }
 0x28e   : > { %4592 = vmatprep.subr.bf16.mxu0 %v8187_v51  ;;  %v8209_v51 = vld [vmem:[%s9505_s29 + $0x6f4] ss:$8 sps:$4 sm:$0xff]   ;;  %vm4395_vm14 = vcmp.gt.f32.partialorder %v4391_v12, 1.0  ;;  %vm4984_vm3 = vcmp.gt.f32.partialorder %v4980_v54, 1.0  ;;  %v7442_v24 = vsel %vm4986_vm4, 1.0, %v8572_v16  ;;  %v4932_v34 = vmul.f32 %v10409_v30, %v10256_v56 }
 0x28f   : > { %4884 = vmatpush1.bf16.msra.mxu1 %v8176_v17  ;;  %v7376_v17 = vcombine.low %v7351_v9, %v7351_v9  ;;  %vm4690_vm2 = vcmp.gt.f32.partialorder %v4686_v48, 1.0  ;;  %vm5279_vm5 = vcmp.gt.f32.partialorder %v5275_v49, 1.0  ;;  %vm5281_vm6 = vcmp.gt.f32.partialorder %v5277_v38, 1.0  ;;  %v8228_v38 = vld [vmem:[%s9505_s29 + $0x788] ss:$8 sps:$4 sm:$0xff]  }
 0x290   : > { %4885 = vmatprep.subr.bf16.mxu1 %v8184_v3  ;;  %v7434_v3 = vcombine.low %v7409_v42, %v7409_v42  ;;  %v7383_v4 = vsel %vm4690_vm2, 1.0, %v8572_v16  ;;  %v7500_v7 = vsel %vm5281_vm6, 1.0, %v8572_v16  ;;  %v10397_v18 = vpop.permute.xlu1 %5517  ;;  %v4934_v42 = vmul.f32 %v10402_v15, %v10251_v53 }
 0x291   : > { %4593 = vmatpush1.bf16.msra.mxu0 %v8185_v59  ;;  %v8218_v59 = vld [vmem:[%s9505_s29 + $0x7ac] ss:$8 sps:$4 sm:$0xff]   ;;  %v4702_v36 = vpack.c.bf16 %v7383_v4, %v7383_v4  ;;  %v5229_v55 = vmul.f32 %v10402_v15, %v10272_v32  ;;  %v5527_v4 = vmul.f32 %v10151_v45, %v10397_v18 }
 0x292   : > { %4594 = vmatprep.subr.bf16.mxu0 %v8193_v10  ;;  %v4872_v41 = vsel %vm2324_vm0, %v7434_v3, 0  ;;  %v7381_v10 = vsel %vm4688_vm15, 1.0, %v8572_v16 }
 0x293   : > { %4886 = vmatpush1.bf16.msra.mxu1 %v8182_v50  ;;  %v4577_v50 = vsel %vm2324_vm0, %v7376_v17, 0  ;;  %v4700_v33 = vpack.c.bf16 %v7381_v10, %v7381_v10  ;;  %v5293_v17 = vpack.c.bf16 %v7500_v7, %v7500_v7  ;;  %v4736_v47 = vunpack.c.l.b16 %v4702_v36 }
 0x294   : > { %4887 = vmatprep.subr.bf16.mxu1 %v8190_v37  ;;  %v8212_v37 = vld [vmem:[%s9505_s29 + $0x7bc] ss:$8 sps:$4 sm:$0xff]   ;;  %v10435_v49 = vpop.permute.xlu1 %5812  ;;  %v5523_v10 = vmul.f32 %v10144_v43, %v10397_v18 }
 0x295   : > { %4595 = vmatpush1.bf16.msra.mxu0 %v8191_v27  ;;  %v7498_v27 = vsel %vm5279_vm5, 1.0, %v8572_v16  ;;  %v4734_v63 = vunpack.c.l.b16 %v4700_v33 }
 0x296   : > { %4596 = vmatprep.subr.bf16.mxu0 %v8199_v62  ;;  %v8224_v62 = vld [vmem:[%s9505_s29 + $0x79c] ss:$8 sps:$4 sm:$0xff]  }
 0x297   : > { %4888 = vmatpush1.bf16.msra.mxu1 %v8188_v8  ;;  %v7325_v8 = vsel %vm4395_vm14, 1.0, %v8572_v16 }
 0x298   : > { %4889 = vmatprep.subr.bf16.mxu1 %v8196_v22  ;;  %v7440_v22 = vsel %vm4984_vm3, 1.0, %v8572_v16  ;;  %v4407_v28 = vpack.c.bf16 %v7325_v8, %v7325_v8  ;;  %v8236_v8 = vld [vmem:[%s9505_s29 + $0x90c] ss:$8 sps:$4 sm:$0xff]  }
 0x299   : > { %4597 = vmatpush1.bf16.msra.mxu0 %v8197_v39  ;;  %v4996_v52 = vpack.c.bf16 %v7440_v22, %v7440_v22  ;;  %v4998_v39 = vpack.c.bf16 %v7442_v24, %v7442_v24  ;;  %v4738_v22 = vsel %vm2190_vm10, %v4736_v47, %v4734_v63  ;;  %v8248_v47 = vld [vmem:[%s9505_s29 + $0x8ec] ss:$8 sps:$4 sm:$0xff]  }
 0x29a   : > { %7378 = vmatprep.subr.msk.bf16.mxu0 %vm2324_vm0, %v7377_v1  ;;  %v5291_v1 = vpack.c.bf16 %v7498_v27, %v7498_v27  ;;  %v4441_v3 = vunpack.c.l.b16 %v4407_v28 }
 0x29b   : > { %4890 = vmatpush1.bf16.msra.mxu1 %v8194_v11  ;;  %v10387_v11 = vpop.permute.xlu0 %5512  ;;  %v5030_v23 = vunpack.c.l.b16 %v4996_v52  ;;  %v5032_v48 = vunpack.c.l.b16 %v4998_v39  ;;  %v8242_v39 = vld [vmem:[%s9505_s29 + $0x8fc] ss:$8 sps:$4 sm:$0xff]  }
 0x29c   : > { %4891 = vmatprep.subr.bf16.mxu1 %v8202_v6  ;;  %v10393_v6 = vld [vmem:[%s10890_s0] sm:$0xff] }
 0x29d   : > { %4605 = vmatpush2.bf16.msra.mxu0 %v4577_v50  ;;  %v4930_v9 = vmul.f32 %v10393_v6, %v10251_v53  ;;  %v5034_v28 = vsel %vm2190_vm10, %v5032_v48, %v5030_v23 }
 0x29e   : > { %4606 = vmatprep.subr.bf16.mxu0 %v8209_v51  ;;  %v8225_v51 = vld [vmem:[%s9505_s29 + $0x6c0] ss:$8 sps:$4 sm:$0xff]   ;;  %v5036_v52 = vpack.c.b16 %v5034_v28, %v5034_v28 }
 0x29f   : > { %4892 = vmatpush1.bf16.msra.mxu1 %v8200_v13  ;;  %v10417_v13 = vld [vmem:[%s10890_s0 + $0x30] sm:$0xff]  ;;  %v10424_v12 = vadd.f32 %v4932_v34, %v4930_v9  ;;  %v10428_v50 = vpop.permute.xlu0 %5807 }
 0x2a0   : > { %7436 = vmatprep.subr.msk.bf16.mxu1 %vm2324_vm0, %v7435_v0  ;;  %v4936_v53 = vmul.f32 %v10417_v13, %v10256_v56  ;;  %v4439_v0 = vunpack.c.l.b16 %v4405_v26  ;;  %v5225_v56 = vmul.f32 %v10393_v6, %v10272_v32  ;;  %v5820_v24 = vmul.f32 %v10135_v61, %v10428_v50  ;;  %v8231_v26 = vld [vmem:[%s9505_s29 + $0x840] ss:$8 sps:$4 sm:$0xff]   ;;  %v8239_v9 = vld [vmem:[%s9505_s29 + $0x834] ss:$8 sps:$4 sm:$0xff]  }
 0x2a1   : > { %4607 = vmatpush2.bf16.msra.mxu0 %v8207_v2  ;;  %v8233_v2 = vld [vmem:[%s9505_s29 + $0x844] ss:$8 sps:$4 sm:$0xff]   ;;  %v5231_v27 = vmul.f32 %v10417_v13, %v10279_v40 }
 0x2a2   : > { %4608 = vmatprep.subr.bf16.mxu0 %v8215_v58  ;;  %v10431_v54 = vadd.f32 %v4936_v53, %v4934_v42  ;;  %v10444_v58 = vld [vmem:[%s10890_s0 + $0x8] sm:$0xff]  ;;  %v4443_v5 = vsel %vm2190_vm10, %v4441_v3, %v4439_v0  ;;  %v5536_v42 = vsel %vm1997_vm1, %v5523_v10, 0.0  ;;  %v8240_v0 = vld [vmem:[%s9505_s29 + $0x8f8] ss:$8 sps:$4 sm:$0xff]  }
 0x2a3   : > { %4900 = vmatpush2.bf16.msra.mxu1 %v4872_v41  ;;  %v5325_v41 = vunpack.c.l.b16 %v5291_v1  ;;  %v5521_v32 = vmul.f32 %v10444_v58, %v10387_v11  ;;  %v4445_v7 = vpack.c.b16 %v4443_v5, %v4443_v5  ;;  %v8245_v3 = vld [vmem:[%s9505_s29 + $0x824] ss:$8 sps:$4 sm:$0xff]  }
 0x2a4   : > { %4901 = vmatprep.subr.bf16.mxu1 %v8212_v37  ;;  %v5327_v37 = vunpack.c.l.b16 %v5293_v17  ;;  %v4955_v23 = vrot.slane %v10431_v54, 4 }
 0x2a5   : > { %4609 = vmatpush2.bf16.msra.mxu0 %v8213_v20  ;;  %v5816_v20 = vmul.f32 %v10444_v58, %v10428_v50 }
 0x2a6   : > { %4610 = vmatprep.subr.bf16.mxu0 %v8221_v57  ;;  %v5822_v57 = vmul.f32 %v10151_v45, %v10435_v49  ;;  %v4740_v45 = vpack.c.b16 %v4738_v22, %v4738_v22  ;;  %v8249_v22 = vld [vmem:[%s9505_s29 + $0x810] ss:$8 sps:$4 sm:$0xff]  }
 0x2a7   : > { %4902 = vmatpush2.bf16.msra.mxu1 %v8210_v35  ;;  %v5227_v35 = vmul.f32 %v10409_v30, %v10279_v40  ;;  %v5552_v40 = vsel %vm1997_vm1, %v5527_v4, 0.0  ;;  %v5830_v34 = vsel %vm1997_vm1, %v5816_v20, 0.0 }
 0x2a8   : > { %4903 = vmatprep.subr.bf16.mxu1 %v8218_v59  ;;  %v5525_v59 = vmul.f32 %v10135_v61, %v10387_v11  ;;  %v5329_v61 = vsel %vm2190_vm10, %v5327_v37, %v5325_v41  ;;  %v5847_v1 = vsel %vm1997_vm1, %v5822_v57, 0.0  ;;  %v8243_v41 = vld [vmem:[%s9505_s29 + $0x820] ss:$8 sps:$4 sm:$0xff]   ;;  %v8257_v57 = vld [vmem:[%s9505_s29 + $0x804] ss:$8 sps:$4 sm:$0xff]  }
 0x2a9   : > { %4611 = vmatpush2.bf16.msra.mxu0 %v8219_v44  ;;  %v5233_v33 = vadd.f32 %v5227_v35, %v5225_v56  ;;  %v5846_v44 = vsel %vm1997_vm1, %v5820_v24, 0.0  ;;  %v5331_v17 = vpack.c.b16 %v5329_v61, %v5329_v61  ;;  %v4939_v56 = vrot.slane %v10424_v12, 4 }
 0x2aa   : > { %4612 = vmatprep.subr.bf16.mxu0 %v8227_v14  ;;  %v5551_v36 = vsel %vm1997_vm1, %v5525_v59, 0.0  ;;  %v5249_v14 = vadd.f32 %v5231_v27, %v5229_v55  ;;  %v8254_v59 = vld [vmem:[%s9505_s29 + $0x8dc] ss:$8 sps:$4 sm:$0xff]   ;;  %v8260_v27 = vld [vmem:[%s9505_s29 + $0x8cc] ss:$8 sps:$4 sm:$0xff]  }
 0x2ab   : > { %4904 = vmatpush2.bf16.msra.mxu1 %v8216_v25  ;;  %v5818_v25 = vmul.f32 %v10144_v43, %v10435_v49  ;;  %v5535_v43 = vsel %vm1997_vm1, %v5521_v32, 0.0  ;;  %v5553_v63 = vadd.f32 %v5552_v40, %v5551_v36  ;;  %v5234_v55 = vrot.slane %v5233_v33, 4  ;;  %v8258_v36 = vld [vmem:[%s9505_s29 + $0x8c8] ss:$8 sps:$4 sm:$0xff]   ;;  %v8266_v40 = vld [vmem:[%s9505_s29 + $0x8bc] ss:$8 sps:$4 sm:$0xff]  }
 0x2ac   : > { %4905 = vmatprep.subr.bf16.mxu1 %v8224_v62  ;;  %v8234_v62 = vld [vmem:[%s9505_s29 + $0x908] ss:$8 sps:$4 sm:$0xff]   ;;  %v5250_v37 = vrot.slane %v5249_v14, 4  ;;  %v4940_v5 = vadd.f32 %v4939_v56, %v10424_v12 }
 0x2ad   : > { %4613 = vmatpush2.bf16.msra.mxu0 %v8225_v51  ;;  %v5831_v53 = vsel %vm1997_vm1, %v5818_v25, 0.0  ;;  %v5848_v51 = vadd.f32 %v5847_v1, %v5846_v44  ;;  %v5554_v32 = vrot.slane %v5553_v63, 4  ;;  %v5235_v20 = vadd.f32 %v5234_v55, %v5233_v33  ;;  %v8252_v25 = vld [vmem:[%s9505_s29 + $0x8d8] ss:$8 sps:$4 sm:$0xff]  }
 0x2ae   : > { %5172 = vmatprep.subr.bf16.mxu0 %v8233_v2  ;;  %v5832_v48 = vadd.f32 %v5831_v53, %v5830_v34  ;;  %v8251_v2 = vld [vmem:[%s9505_s29 + $0x814] ss:$8 sps:$4 sm:$0xff]   ;;  %v5251_v24 = vadd.f32 %v5250_v37, %v5249_v14  ;;  %v4941_v12 = vrot.slane %v4940_v5, 2  ;;  %v8255_v33 = vld [vmem:[%s9505_s29 + $0x800] ss:$8 sps:$4 sm:$0xff]  }
 0x2af   : > { %4906 = vmatpush2.bf16.msra.mxu1 %v8222_v19  ;;  %v8237_v19 = vld [vmem:[%s9505_s29 + $0x830] ss:$8 sps:$4 sm:$0xff]   ;;  %v5849_v4 = vrot.slane %v5848_v51, 4  ;;  %v5555_v28 = vadd.f32 %v5554_v32, %v5553_v63  ;;  %v5236_v61 = vrot.slane %v5235_v20, 2  ;;  %v8269_v14 = vld [vmem:[%s9505_s29 + $0x7e4] ss:$8 sps:$4 sm:$0xff]  }
 0x2b0   : > { %4907 = vmatprep.subr.bf16.mxu1 %v8230_v46  ;;  %4615 = vmatmul.mubr.bf16.vlgmr.msra.gmra.mxu0 %v4445_v7  ;;  %v5537_v46 = vadd.f32 %v5536_v42, %v5535_v43  ;;  %v5833_v10 = vrot.slane %v5832_v48, 4  ;;  %v5252_v43 = vrot.slane %v5251_v24, 2  ;;  %v4942_v34 = vadd.f32 %v4941_v12, %v4940_v5  ;;  %v8261_v1 = vld [vmem:[%s9505_s29 + $0x7f0] ss:$8 sps:$4 sm:$0xff]   ;;  %v8275_v37 = vld [vmem:[%s9505_s29 + $0x7d4] ss:$8 sps:$4 sm:$0xff]  }
 0x2b1   : > { %5173 = vmatpush1.bf16.msra.mxu0 %v8231_v26  ;;  %7495 = vmatprep.mubr.msk.bf16.mxu0 %vm1997_vm1, %v5036_v52  ;;  %v5556_v42 = vrot.slane %v5555_v28, 2  ;;  %v5237_v53 = vadd.f32 %v5236_v61, %v5235_v20  ;;  %v7467_v32 = vld [vmem:[%s9505_s29 + $0x890] sm:$0x33] }
 0x2b2   : > { %5174 = vmatprep.subr.bf16.mxu0 %v8239_v9  ;;  %v5538_v35 = vrot.slane %v5537_v46, 4  ;;  %v5834_v7 = vadd.f32 %v5833_v10, %v5832_v48  ;;  %v4943_v63 = vrot.slane %v4942_v34, 1 }
 0x2b3   : > { %4908 = vmatpush2.bf16.msra.mxu1 %v8228_v38  ;;  %v8246_v38 = vld [vmem:[%s9505_s29 + $0x8e8] ss:$8 sps:$4 sm:$0xff]   ;;  %v5238_v48 = vrot.slane %v5237_v53, 1 }
 0x2b4   : > { %5467 = vmatprep.subr.bf16.mxu1 %v8236_v8  ;;  %v4956_v8 = vadd.f32 %v4955_v23, %v10431_v54  ;;  %v5539_v26 = vadd.f32 %v5538_v35, %v5537_v46  ;;  %v8272_v46 = vld [vmem:[%s9505_s29 + $0x8ac] ss:$8 sps:$4 sm:$0xff]   ;;  %v8278_v35 = vld [vmem:[%s9505_s29 + $0x89c] ss:$8 sps:$4 sm:$0xff]  }
 0x2b5   : > { %5175 = vmatpush1.bf16.msra.mxu0 %v8237_v19  ;;  %v8264_v19 = vld [vmem:[%s9505_s29 + $0x8b8] ss:$8 sps:$4 sm:$0xff]   ;;  %v5239_v20 = vadd.f32 %v5238_v48, %v5237_v53 }
 0x2b6   : > { %4910 = vmatmul.mubr.bf16.vlgmr.msra.gmra.mxu1 %v4740_v45  ;;  %5176 = vmatprep.subr.bf16.mxu0 %v8245_v3  ;;  %v4957_v54 = vrot.slane %v4956_v8, 2  ;;  %v8263_v45 = vld [vmem:[%s9505_s29 + $0x7f4] ss:$8 sps:$4 sm:$0xff]   ;;  %v5540_v9 = vrot.slane %v5539_v26, 2  ;;  %v5557_v3 = vadd.f32 %v5556_v42, %v5555_v28  ;;  %v8285_v42 = vld [vmem:[%s9505_s29 + $0x884] ss:$8 sps:$4 sm:$0xff]  }
 0x2b7   : > { %5468 = vmatpush1.bf16.msra.mxu1 %v8234_v62  ;;  %7553 = vmatprep.mubr.msk.bf16.mxu1 %vm1997_vm1, %v5331_v17  ;;  %v5850_v62 = vadd.f32 %v5849_v4, %v5848_v51  ;;  %v5253_v17 = vadd.f32 %v5252_v43, %v5251_v24  ;;  %v8267_v51 = vld [vmem:[%s9505_s29 + $0x7e0] ss:$8 sps:$4 sm:$0xff]   ;;  %v7525_v4 = vld [vmem:[%s9505_s29 + $0x958] sm:$0x33]  ;;  %v5274_v43 = vadd.f32 %v10365_v29, %v5239_v20 }
 0x2b8   : > { %5469 = vmatprep.subr.bf16.mxu1 %v8242_v39  ;;  %v4958_v52 = vadd.f32 %v4957_v54, %v4956_v8  ;;  %v5835_v39 = vrot.slane %v5834_v7, 2  ;;  %v7551_v12 = vcombine.high %v7525_v4, %v7525_v4  ;;  %v7550_v54 = vcombine.low %v7525_v4, %v7525_v4  ;;  %v8283_v53 = vld [vmem:[%s9505_s29 + $0x880] ss:$8 sps:$4 sm:$0xff]   ;;  %v8300_v4 = vld [vmem:[%s9505_s29 + $0x92c] ss:$8 sps:$4 sm:$0xff]  }
 0x2b9   : > { %5177 = vmatpush1.bf16.msra.mxu0 %v8243_v41  ;;  %v5851_v44 = vrot.slane %v5850_v62, 2  ;;  %v5254_v55 = vrot.slane %v5253_v17, 1  ;;  %v8270_v41 = vld [vmem:[%s9505_s29 + $0x8a8] ss:$8 sps:$4 sm:$0xff]   ;;  %vm5278_vm9 = vcmp.gt.f32.partialorder %v5274_v43, 1.0 }
 0x2ba   : > { %5178 = vmatprep.subr.bf16.mxu0 %v8251_v2  ;;  %v5836_v56 = vadd.f32 %v5835_v39, %v5834_v7  ;;  %v5558_v2 = vrot.slane %v5557_v3, 1  ;;  %v8298_v43 = vld [vmem:[%s9505_s29 + $0x928] ss:$8 sps:$4 sm:$0xff]  }
 0x2bb   : > { %5470 = vmatpush1.bf16.msra.mxu1 %v8240_v0  ;;  %v5541_v0 = vadd.f32 %v5540_v9, %v5539_v26  ;;  %v5852_v23 = vadd.f32 %v5851_v44, %v5850_v62  ;;  %v5255_v24 = vadd.f32 %v5254_v55, %v5253_v17  ;;  %v7492_v26 = vcombine.low %v7467_v32, %v7467_v32  ;;  %v8291_v17 = vld [vmem:[%s9505_s29 + $0x874] ss:$8 sps:$4 sm:$0xff]  }
 0x2bc   : > { %5471 = vmatprep.subr.bf16.mxu1 %v8248_v47  ;;  %v4959_v47 = vrot.slane %v4958_v52, 1  ;;  %v5837_v8 = vrot.slane %v5836_v56, 1 }
 0x2bd   : > { %5179 = vmatpush1.bf16.msra.mxu0 %v8249_v22  ;;  %v5853_v10 = vrot.slane %v5852_v23, 1  ;;  %v8273_v22 = vld [vmem:[%s9505_s29 + $0x7d0] ss:$8 sps:$4 sm:$0xff]   ;;  %v5167_v9 = vsel %vm2324_vm0, %v7492_v26, 0 }
 0x2be   : > { %5180 = vmatprep.subr.bf16.mxu0 %v8257_v57  ;;  %v4960_v5 = vadd.f32 %v4959_v47, %v4958_v52  ;;  %v7493_v57 = vcombine.high %v7467_v32, %v7467_v32  ;;  %v5838_v61 = vadd.f32 %v5837_v8, %v5836_v56  ;;  %v8288_v52 = vld [vmem:[%s9505_s29 + $0x94c] ss:$8 sps:$4 sm:$0xff]  }
 0x2bf   : > { %5472 = vmatpush1.bf16.msra.mxu1 %v8246_v38  ;;  %v5542_v38 = vrot.slane %v5541_v0, 1 }
 0x2c0   : > { %5473 = vmatprep.subr.bf16.mxu1 %v8254_v59  ;;  %v4944_v59 = vadd.f32 %v4943_v63, %v4942_v34  ;;  %v4981_v62 = vadd.f32 %v10358_v60, %v4960_v5  ;;  %v10526_v34 = vpop.permute.xlu1 %5861  ;;  %v7497_v63 = vsel %vm5278_vm9, 1.0, %v8572_v16 }
 0x2c1   : > { %5181 = vmatpush1.bf16.msra.mxu0 %v8255_v33  ;;  %v5543_v28 = vadd.f32 %v5542_v38, %v5541_v0  ;;  %v5854_v33 = vadd.f32 %v5853_v10, %v5852_v23  ;;  %v5865_v39 = vadd.f32 %v10526_v34, %v5838_v61  ;;  %v8294_v0 = vld [vmem:[%s9505_s29 + $0x93c] ss:$8 sps:$4 sm:$0xff]   ;;  %v8289_v23 = vld [vmem:[%s9505_s29 + $0x870] ss:$8 sps:$4 sm:$0xff]   ;;  %v5290_v20 = vpack.c.bf16 %v7497_v63, %v7497_v63 }
 0x2c2   : > { %5182 = vmatprep.subr.bf16.mxu0 %v8263_v45  ;;  %v4979_v7 = vadd.f32 %v10358_v60, %v4944_v59  ;;  %v10519_v45 = vpop.permute.xlu0 %5566  ;;  %vm4985_vm8 = vcmp.gt.f32.partialorder %v4981_v62, 1.0  ;;  %v5817_v63 = vmul.f32 %v10409_v30, %v10435_v49 }
 0x2c3   : > { %5474 = vmatpush1.bf16.msra.mxu1 %v8252_v25  ;;  %v8276_v25 = vld [vmem:[%s9505_s29 + $0x898] ss:$8 sps:$4 sm:$0xff]   ;;  %v5867_v44 = vadd.f32 %v10526_v34, %v5854_v33  ;;  %vm5869_vm14 = vcmp.gt.f32.partialorder %v5865_v39, 1.0 }
 0x2c4   : > { %5475 = vmatprep.subr.bf16.mxu1 %v8260_v27  ;;  %v5559_v27 = vadd.f32 %v5558_v2, %v5557_v3  ;;  %vm4983_vm7 = vcmp.gt.f32.partialorder %v4979_v7, 1.0  ;;  %v2846_v3 = vpop.f32.mrf.mxu0  ;;  %v8292_v2 = vld [vmem:[%s9505_s29 + $0x938] ss:$8 sps:$4 sm:$0xff]   ;;  %v7614_v32 = vsel %vm5869_vm14, 1.0, %v8572_v16  ;;  %v10555_v5 = vpop.permute.xlu1 %6107  ;;  %v5526_v7 = vmul.f32 %v10417_v13, %v10397_v18 }
 0x2c5   : > { %5183 = vmatpush1.bf16.msra.mxu0 %v8261_v1  ;;  %v8286_v1 = vld [vmem:[%s9505_s29 + $0x948] ss:$8 sps:$4 sm:$0xff]   ;;  %vm5871_vm15 = vcmp.gt.f32.partialorder %v5867_v44, 1.0  ;;  %v2853_v56 = vadd.f32 %v2846_v3, %v10203_v31  ;;  %v5881_v62 = vpack.c.bf16 %v7614_v32, %v7614_v32 }
 0x2c6   : > { %5184 = vmatprep.subr.bf16.mxu0 %v8269_v14  ;;  %v5572_v60 = vadd.f32 %v10519_v45, %v5559_v27  ;;  %v7441_v14 = vsel %vm4985_vm8, 1.0, %v8572_v16  ;;  %v7616_v31 = vsel %vm5871_vm15, 1.0, %v8572_v16  ;;  %v10553_v59 = vpop.permute.xlu0 %6102  ;;  %v8307_v32 = vld [vmem:[%s9505_s29 + $0x9d0] ss:$8 sps:$4 sm:$0xff]  }
 0x2c7   : > { %5476 = vmatpush1.bf16.msra.mxu1 %v8258_v36  ;;  %v5276_v36 = vadd.f32 %v10365_v29, %v5255_v24  ;;  %v5462_v29 = vsel %vm2324_vm0, %v7550_v54, 0  ;;  %v5520_v24 = vmul.f32 %v10393_v6, %v10387_v11  ;;  %v8295_v54 = vld [vmem:[%s9505_s29 + $0x860] ss:$8 sps:$4 sm:$0xff]   ;;  %v5883_v61 = vpack.c.bf16 %v7616_v31, %v7616_v31 }
 0x2c8   : > { %5477 = vmatprep.subr.bf16.mxu1 %v8266_v40  ;;  %v5570_v40 = vadd.f32 %v10519_v45, %v5543_v28  ;;  %vm5576_vm13 = vcmp.gt.f32.partialorder %v5572_v60, 1.0  ;;  %v5522_v28 = vmul.f32 %v10409_v30, %v10397_v18  ;;  %v5324_v60 = vunpack.c.l.b16 %v5290_v20  ;;  %v10586_v3 = vpop.permute.xlu1 %6402 }
 0x2c9   : > { %5185 = vmatpush1.bf16.msra.mxu0 %v8267_v51  ;;  %vm5280_vm11 = vcmp.gt.f32.partialorder %v5276_v36, 1.0  ;;  %v4997_v51 = vpack.c.bf16 %v7441_v14, %v7441_v14  ;;  %v8303_v36 = vld [vmem:[%s9505_s29 + $0x854] ss:$8 sps:$4 sm:$0xff]   ;;  %v5815_v18 = vmul.f32 %v10393_v6, %v10428_v50  ;;  %v5915_v14 = vunpack.c.l.b16 %v5881_v62 }
 0x2ca   : > { %5186 = vmatprep.subr.bf16.mxu0 %v8275_v37  ;;  %vm5574_vm12 = vcmp.gt.f32.partialorder %v5570_v40, 1.0  ;;  %v7499_v47 = vsel %vm5280_vm11, 1.0, %v8572_v16  ;;  %v2848_v37 = vpop.f32.mrf.mxu0  ;;  %v8306_v40 = vld [vmem:[%s9505_s29 + $0x91c] ss:$8 sps:$4 sm:$0xff]  }
 0x2cb   : > { %5478 = vmatpush1.bf16.msra.mxu1 %v8264_v19  ;;  %v7439_v19 = vsel %vm4983_vm7, 1.0, %v8572_v16  ;;  %v7556_v55 = vsel %vm5574_vm12, 1.0, %v8572_v16  ;;  %v2854_v10 = vadd.f32 %v2848_v37, %v10208_v21  ;;  %v8309_v6 = vld [vmem:[%s9505_s29 + $0x9d4] ss:$8 sps:$4 sm:$0xff]  }
 0x2cc   : > { %5479 = vmatprep.subr.bf16.mxu1 %v8272_v46  ;;  %v3141_v46 = vpop.f32.mrf.mxu1  ;;  %v4995_v48 = vpack.c.bf16 %v7439_v19, %v7439_v19  ;;  %v5586_v27 = vpack.c.bf16 %v7556_v55, %v7556_v55  ;;  %v5819_v19 = vmul.f32 %v10402_v15, %v10428_v50 }
 0x2cd   : > { %5187 = vmatpush1.bf16.msra.mxu0 %v8273_v22  ;;  %v10557_v8 = vadd.f32 %v3141_v46, %v2853_v56  ;;  %v5292_v22 = vpack.c.bf16 %v7499_v47, %v7499_v47  ;;  %v8304_v46 = vld [vmem:[%s9505_s29 + $0x918] ss:$8 sps:$4 sm:$0xff]   ;;  %v6111_v47 = vmul.f32 %v10444_v58, %v10553_v59  ;;  %v8472_v56 = vld [vmem:[%s10890_s0 + $0x28] sm:$0xff] }
 0x2ce   : > { %7494 = vmatprep.subr.msk.bf16.mxu0 %vm2324_vm0, %v7493_v57  ;;  %v3143_v38 = vpop.f32.mrf.mxu1  ;;  %v2850_v57 = vpop.f32.mrf.mxu0  ;;  %v5620_v39 = vunpack.c.l.b16 %v5586_v27 }
 0x2cf   : > { %5480 = vmatpush1.bf16.msra.mxu1 %v8270_v41  ;;  %v7558_v41 = vsel %vm5576_vm13, 1.0, %v8572_v16  ;;  %v10567_v21 = vadd.f32 %v3143_v38, %v2854_v10  ;;  %v5821_v10 = vmul.f32 %v10417_v13, %v10435_v49 }
 0x2d0   : > { %5481 = vmatprep.subr.bf16.mxu1 %v8278_v35  ;;  %v8297_v35 = vld [vmem:[%s9505_s29 + $0x864] ss:$8 sps:$4 sm:$0xff]   ;;  %v3145_v26 = vpop.f32.mrf.mxu1 }
 0x2d1   : > { %5195 = vmatpush2.bf16.msra.mxu0 %v5167_v9  ;;  %v5029_v9 = vunpack.c.l.b16 %v4995_v48  ;;  %v8473_v48 = vld [vmem:[%s10890_s0 + $0x18] sm:$0xff]  ;;  %v8315_v26 = vld [vmem:[%s9505_s29 + $0x9c4] ss:$8 sps:$4 sm:$0xff]  }
 0x2d2   : > { %5196 = vmatprep.subr.bf16.mxu0 %v8285_v42  ;;  %v3146_v33 = vpop.f32.mrf.mxu1  ;;  %v5031_v42 = vunpack.c.l.b16 %v4997_v51  ;;  %v6113_v30 = vmul.f32 %v8473_v48, %v10555_v5  ;;  %v8474_v51 = vld [vmem:[%s10890_s0 + $0x38] sm:$0xff] }
 0x2d3   : > { %5482 = vmatpush1.bf16.msra.mxu1 %v8276_v25  ;;  %v5524_v25 = vmul.f32 %v10402_v15, %v10387_v11  ;;  %v2851_v11 = vpop.f32.mrf.mxu0  ;;  %v6115_v15 = vmul.f32 %v8472_v56, %v10553_v59  ;;  %v6117_v55 = vmul.f32 %v8474_v51, %v10555_v5  ;;  %v5839_v33 = vadd.f32 %v5821_v10, %v5819_v19 }
 0x2d4   : > { %7552 = vmatprep.subr.msk.bf16.mxu1 %vm2324_vm0, %v7551_v12  ;;  %v5588_v12 = vpack.c.bf16 %v7558_v41, %v7558_v41  ;;  %v5033_v50 = vsel %vm2190_vm10, %v5031_v42, %v5029_v9  ;;  %v8313_v11 = vld [vmem:[%s9505_s29 + $0x9c0] ss:$8 sps:$4 sm:$0xff]  }
 0x2d5   : > { %5197 = vmatpush2.bf16.msra.mxu0 %v8283_v53  ;;  %v10579_v53 = vpop.permute.xlu0 %6397  ;;  %v6142_v13 = vsel %vm1997_vm1, %v6117_v55, 0.0  ;;  %v5840_v19 = vrot.slane %v5839_v33, 4  ;;  %v8333_v55 = vld [vmem:[%s9505_s29 + $0x994] ss:$8 sps:$4 sm:$0xff]  }
 0x2d6   : > { %5198 = vmatprep.subr.bf16.mxu0 %v8291_v17  ;;  %v5622_v44 = vunpack.c.l.b16 %v5588_v12  ;;  %v10582_v17 = vadd.f32 %v5526_v7, %v5524_v25  ;;  %v6406_v41 = vmul.f32 %v10444_v58, %v10579_v53  ;;  %v6410_v38 = vmul.f32 %v8472_v56, %v10579_v53  ;;  %v8310_v58 = vld [vmem:[%s9505_s29 + $0xa98] ss:$8 sps:$4 sm:$0xff]   ;;  %v8318_v12 = vld [vmem:[%s9505_s29 + $0xa8c] ss:$8 sps:$4 sm:$0xff]  }
 0x2d7   : > { %5490 = vmatpush2.bf16.msra.mxu1 %v5462_v29  ;;  %v5326_v29 = vunpack.c.l.b16 %v5292_v22  ;;  %v5823_v22 = vadd.f32 %v5817_v63, %v5815_v18  ;;  %v6141_v25 = vsel %vm1997_vm1, %v6115_v15, 0.0  ;;  %v8330_v63 = vld [vmem:[%s9505_s29 + $0xa6c] ss:$8 sps:$4 sm:$0xff]  }
 0x2d8   : > { %5491 = vmatprep.subr.bf16.mxu1 %v8288_v52  ;;  %v10575_v52 = vadd.f32 %v5522_v28, %v5520_v24  ;;  %v5624_v31 = vsel %vm2190_vm10, %v5622_v44, %v5620_v39  ;;  %v6125_v24 = vsel %vm1997_vm1, %v6111_v47, 0.0  ;;  %v6126_v28 = vsel %vm1997_vm1, %v6113_v30, 0.0 }
 0x2d9   : > { %5199 = vmatpush2.bf16.msra.mxu0 %v8289_v23  ;;  %v8312_v23 = vld [vmem:[%s9505_s29 + $0xa9c] ss:$8 sps:$4 sm:$0xff]   ;;  %v5328_v37 = vsel %vm2190_vm10, %v5326_v29, %v5324_v60  ;;  %v6420_v49 = vsel %vm1997_vm1, %v6406_v41, 0.0  ;;  %v5626_v27 = vpack.c.b16 %v5624_v31, %v5624_v31  ;;  %v6127_v9 = vadd.f32 %v6126_v28, %v6125_v24  ;;  %v8331_v31 = vld [vmem:[%s9505_s29 + $0x990] ss:$8 sps:$4 sm:$0xff]  }
 0x2da   : > { %5200 = vmatprep.subr.bf16.mxu0 %v8297_v35  ;;  %v6412_v35 = vmul.f32 %v8474_v51, %v10586_v3  ;;  %v5330_v57 = vpack.c.b16 %v5328_v37, %v5328_v37  ;;  %v6143_v42 = vadd.f32 %v6142_v13, %v6141_v25  ;;  %v5529_v60 = vrot.slane %v10575_v52, 4  ;;  %v8328_v51 = vld [vmem:[%s9505_s29 + $0xa68] ss:$8 sps:$4 sm:$0xff]   ;;  %v8342_v24 = vld [vmem:[%s9505_s29 + $0xa4c] ss:$8 sps:$4 sm:$0xff]  }
 0x2db   : > { %5492 = vmatpush2.bf16.msra.mxu1 %v8286_v1  ;;  %v8301_v1 = vld [vmem:[%s9505_s29 + $0x850] ss:$8 sps:$4 sm:$0xff]   ;;  %v5545_v29 = vrot.slane %v10582_v17, 4  ;;  %v5824_v44 = vrot.slane %v5823_v22, 4  ;;  %v5841_v30 = vadd.f32 %v5840_v19, %v5839_v33 }
 0x2dc   : > { %5493 = vmatprep.subr.bf16.mxu1 %v8294_v0  ;;  %v5917_v0 = vunpack.c.l.b16 %v5883_v61  ;;  %v6437_v62 = vsel %vm1997_vm1, %v6412_v35, 0.0  ;;  %v5530_v47 = vadd.f32 %v5529_v60, %v10575_v52  ;;  %v8346_v60 = vld [vmem:[%s9505_s29 + $0xa38] ss:$8 sps:$4 sm:$0xff]  }
 0x2dd   : > { %5201 = vmatpush2.bf16.msra.mxu0 %v8295_v54  ;;  %v6436_v54 = vsel %vm1997_vm1, %v6410_v38, 0.0  ;;  %v5546_v56 = vadd.f32 %v5545_v29, %v10582_v17  ;;  %v8336_v38 = vld [vmem:[%s9505_s29 + $0xa5c] ss:$8 sps:$4 sm:$0xff]   ;;  %v5842_v10 = vrot.slane %v5841_v30, 2 }
 0x2de   : > { %5202 = vmatprep.subr.bf16.mxu0 %v8303_v36  ;;  %v5919_v20 = vsel %vm2190_vm10, %v5917_v0, %v5915_v14  ;;  %v8321_v36 = vld [vmem:[%s9505_s29 + $0x9b4] ss:$8 sps:$4 sm:$0xff]   ;;  %v6438_v39 = vadd.f32 %v6437_v62, %v6436_v54  ;;  %v8322_v14 = vld [vmem:[%s9505_s29 + $0xa78] ss:$8 sps:$4 sm:$0xff]   ;;  %v8327_v0 = vld [vmem:[%s9505_s29 + $0x9a4] ss:$8 sps:$4 sm:$0xff]  }
 0x2df   : > { %5494 = vmatpush2.bf16.msra.mxu1 %v8292_v2  ;;  %v6408_v2 = vmul.f32 %v8473_v48, %v10586_v3  ;;  %v5921_v61 = vpack.c.b16 %v5919_v20, %v5919_v20  ;;  %v8325_v48 = vld [vmem:[%s9505_s29 + $0x9a0] ss:$8 sps:$4 sm:$0xff]   ;;  %v5531_v52 = vrot.slane %v5530_v47, 2  ;;  %v5547_v17 = vrot.slane %v5546_v56, 2  ;;  %v8345_v54 = vld [vmem:[%s9505_s29 + $0x974] ss:$8 sps:$4 sm:$0xff]  }
 0x2e0   : > { %5495 = vmatprep.subr.bf16.mxu1 %v8300_v4  ;;  %v5035_v4 = vpack.c.b16 %v5033_v50, %v5033_v50  ;;  %v6439_v50 = vrot.slane %v6438_v39, 4  ;;  %v8351_v29 = vld [vmem:[%s9505_s29 + $0x964] ss:$8 sps:$4 sm:$0xff]  }
 0x2e1   : > { %5203 = vmatpush2.bf16.msra.mxu0 %v8301_v1  ;;  %v6421_v7 = vsel %vm1997_vm1, %v6408_v2, 0.0  ;;  %v8319_v1 = vld [vmem:[%s9505_s29 + $0x9b0] ss:$8 sps:$4 sm:$0xff]   ;;  %v5532_v25 = vadd.f32 %v5531_v52, %v5530_v47  ;;  %v8349_v47 = vld [vmem:[%s9505_s29 + $0x960] ss:$8 sps:$4 sm:$0xff]  }
 0x2e2   : > { %5762 = vmatprep.subr.bf16.mxu0 %v8309_v6  ;;  %v6422_v18 = vadd.f32 %v6421_v7, %v6420_v49  ;;  %v6144_v6 = vrot.slane %v6143_v42, 4  ;;  %v6440_v35 = vadd.f32 %v6439_v50, %v6438_v39  ;;  %v8337_v49 = vld [vmem:[%s9505_s29 + $0x980] ss:$8 sps:$4 sm:$0xff]  }
 0x2e3   : > { %5496 = vmatpush2.bf16.msra.mxu1 %v8298_v43  ;;  %v8316_v43 = vld [vmem:[%s9505_s29 + $0xa88] ss:$8 sps:$4 sm:$0xff]  }
 0x2e4   : > { %5497 = vmatprep.subr.bf16.mxu1 %v8306_v40  ;;  %5205 = vmatmul.mubr.bf16.vlgmr.msra.gmra.mxu0 %v5035_v4  ;;  %v8324_v40 = vld [vmem:[%s9505_s29 + $0xa7c] ss:$8 sps:$4 sm:$0xff]   ;;  %v6423_v15 = vrot.slane %v6422_v18, 4  ;;  %v6145_v37 = vadd.f32 %v6144_v6, %v6143_v42  ;;  %v8334_v4 = vld [vmem:[%s9505_s29 + $0xa58] ss:$8 sps:$4 sm:$0xff]   ;;  %v6441_v28 = vrot.slane %v6440_v35, 2 }
 0x2e5   : > { %5763 = vmatpush1.bf16.msra.mxu0 %v8307_v32  ;;  %7611 = vmatprep.mubr.msk.bf16.mxu0 %vm1997_vm1, %v5626_v27  ;;  %v5843_v27 = vadd.f32 %v5842_v10, %v5841_v30  ;;  %v8343_v42 = vld [vmem:[%s9505_s29 + $0x970] ss:$8 sps:$4 sm:$0xff]   ;;  %v7641_v6 = vld [vmem:[%s9505_s29 + $0xae8] sm:$0x33] }
 0x2e6   : > { %5764 = vmatprep.subr.bf16.mxu0 %v8315_v26  ;;  %v6424_v2 = vadd.f32 %v6423_v15, %v6422_v18  ;;  %v8352_v15 = vld [vmem:[%s9505_s29 + $0xa28] ss:$8 sps:$4 sm:$0xff]  }
 0x2e7   : > { %5498 = vmatpush2.bf16.msra.mxu1 %v8304_v46  ;;  %v6128_v46 = vrot.slane %v6127_v9, 4 }
 0x2e8   : > { %6057 = vmatprep.subr.bf16.mxu1 %v8312_v23  ;;  %v5825_v23 = vadd.f32 %v5824_v44, %v5823_v22  ;;  %v6146_v22 = vrot.slane %v6145_v37, 2  ;;  %v6425_v26 = vrot.slane %v6424_v2, 2  ;;  %v8354_v44 = vld [vmem:[%s9505_s29 + $0xa2c] ss:$8 sps:$4 sm:$0xff]  }
 0x2e9   : > { %5765 = vmatpush1.bf16.msra.mxu0 %v8313_v11  ;;  %v6129_v41 = vadd.f32 %v6128_v46, %v6127_v9  ;;  %v5533_v11 = vrot.slane %v5532_v25, 1 }
 0x2ea   : > { %5500 = vmatmul.mubr.bf16.vlgmr.msra.gmra.mxu1 %v5330_v57  ;;  %5766 = vmatprep.subr.bf16.mxu0 %v8321_v36  ;;  %v5826_v32 = vrot.slane %v5825_v23, 2  ;;  %v5548_v57 = vadd.f32 %v5547_v17, %v5546_v56  ;;  %v6147_v62 = vadd.f32 %v6146_v22, %v6145_v37  ;;  %v6442_v36 = vadd.f32 %v6441_v28, %v6440_v35  ;;  %v10668_v35 = vpop.permute.xlu0 %6156 }
 0x2eb   : > { %6058 = vmatpush1.bf16.msra.mxu1 %v8310_v58  ;;  %7669 = vmatprep.mubr.msk.bf16.mxu1 %vm1997_vm1, %v5921_v61  ;;  %v8339_v58 = vld [vmem:[%s9505_s29 + $0x984] ss:$8 sps:$4 sm:$0xff]   ;;  %v6130_v20 = vrot.slane %v6129_v41, 2  ;;  %v5534_v19 = vadd.f32 %v5533_v11, %v5532_v25  ;;  %v8362_v25 = vld [vmem:[%s9505_s29 + $0xad8] ss:$8 sps:$4 sm:$0xff]  }
 0x2ec   : > { %6059 = vmatprep.subr.bf16.mxu1 %v8318_v12  ;;  %v5827_v13 = vadd.f32 %v5826_v32, %v5825_v23  ;;  %v8340_v12 = vld [vmem:[%s9505_s29 + $0xa48] ss:$8 sps:$4 sm:$0xff]   ;;  %v8348_v61 = vld [vmem:[%s9505_s29 + $0xa3c] ss:$8 sps:$4 sm:$0xff]   ;;  %v5549_v33 = vrot.slane %v5548_v57, 1  ;;  %v6148_v39 = vrot.slane %v6147_v62, 1 }
 0x2ed   : > { %5767 = vmatpush1.bf16.msra.mxu0 %v8319_v1  ;;  %v6131_v7 = vadd.f32 %v6130_v20, %v6129_v41  ;;  %v7583_v1 = vld [vmem:[%s9505_s29 + $0xa20] sm:$0x33]  ;;  %v6443_v46 = vrot.slane %v6442_v36, 1  ;;  %v5569_v41 = vadd.f32 %v10519_v45, %v5534_v19 }
 0x2ee   : > { %5768 = vmatprep.subr.bf16.mxu0 %v8327_v0  ;;  %v5828_v9 = vrot.slane %v5827_v13, 1  ;;  %v7609_v50 = vcombine.high %v7583_v1, %v7583_v1  ;;  %v7608_v23 = vcombine.low %v7583_v1, %v7583_v1  ;;  %v6149_v30 = vadd.f32 %v6148_v39, %v6147_v62  ;;  %v8365_v62 = vld [vmem:[%s9505_s29 + $0xa00] ss:$8 sps:$4 sm:$0xff]   ;;  %v8376_v39 = vld [vmem:[%s9505_s29 + $0xabc] ss:$8 sps:$4 sm:$0xff]  }
 0x2ef   : > { %6060 = vmatpush1.bf16.msra.mxu1 %v8316_v43  ;;  %v6426_v43 = vadd.f32 %v6425_v26, %v6424_v2  ;;  %v6132_v18 = vrot.slane %v6131_v7, 1  ;;  %v6444_v52 = vadd.f32 %v6443_v46, %v6442_v36  ;;  %vm5573_vm2 = vcmp.gt.f32.partialorder %v5569_v41, 1.0 }
 0x2f0   : > { %6061 = vmatprep.subr.bf16.mxu1 %v8324_v40  ;;  %v5844_v40 = vrot.slane %v5843_v27, 1  ;;  %v5757_v32 = vsel %vm2324_vm0, %v7608_v23, 0  ;;  %v7555_v26 = vsel %vm5573_vm2, 1.0, %v8572_v16 }
 0x2f1   : > { %5769 = vmatpush1.bf16.msra.mxu0 %v8325_v48  ;;  %v6427_v0 = vrot.slane %v6426_v43, 1  ;;  %v6133_v48 = vadd.f32 %v6132_v18, %v6131_v7  ;;  %v3731_v7 = vpop.f32.mrf.mxu1 }
 0x2f2   : > { %5770 = vmatprep.subr.bf16.mxu0 %v8333_v55  ;;  %v5845_v56 = vadd.f32 %v5844_v40, %v5843_v27  ;;  %v7666_v55 = vcombine.low %v7641_v6, %v7641_v6 }
 0x2f3   : > { %6062 = vmatpush1.bf16.msra.mxu1 %v8322_v14  ;;  %v5550_v14 = vadd.f32 %v5549_v33, %v5548_v57  ;;  %v6160_v10 = vadd.f32 %v10668_v35, %v6133_v48  ;;  %v8367_v57 = vld [vmem:[%s9505_s29 + $0xa04] ss:$8 sps:$4 sm:$0xff]   ;;  %v3733_v18 = vpop.f32.mrf.mxu1 }
 0x2f4   : > { %6063 = vmatprep.subr.bf16.mxu1 %v8330_v63  ;;  %v5829_v63 = vadd.f32 %v5828_v9, %v5827_v13  ;;  %v5866_v2 = vadd.f32 %v10526_v34, %v5845_v56  ;;  %v8370_v13 = vld [vmem:[%s9505_s29 + $0xacc] ss:$8 sps:$4 sm:$0xff]   ;;  %v8368_v9 = vld [vmem:[%s9505_s29 + $0xac8] ss:$8 sps:$4 sm:$0xff]  }
 0x2f5   : > { %5771 = vmatpush1.bf16.msra.mxu0 %v8331_v31  ;;  %v5571_v37 = vadd.f32 %v10519_v45, %v5550_v14  ;;  %v8361_v31 = vld [vmem:[%s9505_s29 + $0xa14] ss:$8 sps:$4 sm:$0xff]   ;;  %v6162_v45 = vadd.f32 %v10668_v35, %v6149_v30  ;;  %vm6164_vm6 = vcmp.gt.f32.partialorder %v6160_v10, 1.0  ;;  %v8475_v10 = vld [vmem:[%s10890_s0] sm:$0xff] }
 0x2f6   : > { %5772 = vmatprep.subr.bf16.mxu0 %v8339_v58  ;;  %v5864_v17 = vadd.f32 %v10526_v34, %v5829_v63  ;;  %v6052_v34 = vsel %vm2324_vm0, %v7666_v55, 0  ;;  %v8364_v58 = vld [vmem:[%s9505_s29 + $0xadc] ss:$8 sps:$4 sm:$0xff]   ;;  %vm5870_vm5 = vcmp.gt.f32.partialorder %v5866_v2, 1.0  ;;  %v7672_v33 = vsel %vm6164_vm6, 1.0, %v8572_v16 }
 0x2f7   : > { %6064 = vmatpush1.bf16.msra.mxu1 %v8328_v51  ;;  %v7667_v51 = vcombine.high %v7641_v6, %v7641_v6  ;;  %vm5575_vm3 = vcmp.gt.f32.partialorder %v5571_v37, 1.0  ;;  %vm6166_vm7 = vcmp.gt.f32.partialorder %v6162_v45, 1.0  ;;  %v6176_v14 = vpack.c.bf16 %v7672_v33, %v7672_v33  ;;  %v3735_v6 = vpop.f32.mrf.mxu1  ;;  %v8371_v63 = vld [vmem:[%s9505_s29 + $0x9f0] ss:$8 sps:$4 sm:$0xff]  }
 0x2f8   : > { %6065 = vmatprep.subr.bf16.mxu1 %v8336_v38  ;;  %v6428_v38 = vadd.f32 %v6427_v0, %v6426_v43  ;;  %vm5868_vm4 = vcmp.gt.f32.partialorder %v5864_v17, 1.0  ;;  %v7557_v28 = vsel %vm5575_vm3, 1.0, %v8572_v16  ;;  %v7674_v43 = vsel %vm6166_vm7, 1.0, %v8572_v16  ;;  %v8403_v6 = vld [vmem:[%s9505_s29 + $0xb34] ss:$8 sps:$4 sm:$0xff]  }
 0x2f9   : > { %5773 = vmatpush1.bf16.msra.mxu0 %v8337_v49  ;;  %v3436_v49 = vpop.f32.mrf.mxu0  ;;  %v7613_v27 = vsel %vm5868_vm4, 1.0, %v8572_v16  ;;  %v5587_v11 = vpack.c.bf16 %v7557_v28, %v7557_v28  ;;  %v6178_v0 = vpack.c.bf16 %v7674_v43, %v7674_v43  ;;  %v3736_v30 = vpop.f32.mrf.mxu1  ;;  %v6210_v37 = vunpack.c.l.b16 %v6176_v14  ;;  %v8394_v43 = vld [vmem:[%s9505_s29 + $0xc1c] ss:$8 sps:$4 sm:$0xff]  }
 0x2fa   : > { %5774 = vmatprep.subr.bf16.mxu0 %v8345_v54  ;;  %v3443_v54 = vadd.f32 %v3436_v49, %v10557_v8  ;;  %v6110_v45 = vmul.f32 %v8475_v10, %v10553_v59  ;;  %v8412_v30 = vld [vmem:[%s9505_s29 + $0xbec] ss:$8 sps:$4 sm:$0xff]  }
 0x2fb   : > { %6066 = vmatpush1.bf16.msra.mxu1 %v8334_v4  ;;  %v10675_v4 = vpop.permute.xlu1 %6451  ;;  %v3438_v36 = vpop.f32.mrf.mxu0  ;;  %v5621_v48 = vunpack.c.l.b16 %v5587_v11 }
 0x2fc   : > { %6067 = vmatprep.subr.bf16.mxu1 %v8342_v24  ;;  %v6455_v20 = vadd.f32 %v10675_v4, %v6428_v38  ;;  %v6457_v22 = vadd.f32 %v10675_v4, %v6444_v52  ;;  %v8359_v24 = vld [vmem:[%s9505_s29 + $0xa10] ss:$8 sps:$4 sm:$0xff]   ;;  %v6212_v38 = vunpack.c.l.b16 %v6178_v0  ;;  %v8377_v52 = vld [vmem:[%s9505_s29 + $0x9e0] ss:$8 sps:$4 sm:$0xff]  }
 0x2fd   : > { %5775 = vmatpush1.bf16.msra.mxu0 %v8343_v42  ;;  %v8373_v42 = vld [vmem:[%s9505_s29 + $0x9f4] ss:$8 sps:$4 sm:$0xff]   ;;  %v3440_v19 = vpop.f32.mrf.mxu0  ;;  %v8398_v0 = vld [vmem:[%s9505_s29 + $0xc08] ss:$8 sps:$4 sm:$0xff]  }
 0x2fe   : > { %5776 = vmatprep.subr.bf16.mxu0 %v8351_v29  ;;  %vm6459_vm8 = vcmp.gt.f32.partialorder %v6455_v20, 1.0  ;;  %vm6461_vm9 = vcmp.gt.f32.partialorder %v6457_v22, 1.0  ;;  %v3444_v29 = vadd.f32 %v3438_v36, %v10567_v21  ;;  %v8476_v20 = vld [vmem:[%s10890_s0 + $0x20] sm:$0xff] }
 0x2ff   : > { %6068 = vmatpush1.bf16.msra.mxu1 %v8340_v12  ;;  %v7615_v12 = vsel %vm5870_vm5, 1.0, %v8572_v16  ;;  %v7730_v40 = vsel %vm6459_vm8, 1.0, %v8572_v16  ;;  %v7732_v8 = vsel %vm6461_vm9, 1.0, %v8572_v16  ;;  %v3441_v21 = vpop.f32.mrf.mxu0  ;;  %v6114_v22 = vmul.f32 %v8476_v20, %v10553_v59  ;;  %v8395_v19 = vld [vmem:[%s9505_s29 + $0xb40] ss:$8 sps:$4 sm:$0xff]  }
 0x300   : > { %6069 = vmatprep.subr.bf16.mxu1 %v8348_v61  ;;  %v5585_v61 = vpack.c.bf16 %v7555_v26, %v7555_v26  ;;  %v5882_v1 = vpack.c.bf16 %v7615_v12, %v7615_v12  ;;  %v10704_v46 = vadd.f32 %v3733_v18, %v3444_v29  ;;  %v6473_v56 = vpack.c.bf16 %v7732_v8, %v7732_v8  ;;  %v8392_v8 = vld [vmem:[%s9505_s29 + $0xc18] ss:$8 sps:$4 sm:$0xff]   ;;  %v8397_v29 = vld [vmem:[%s9505_s29 + $0xb44] ss:$8 sps:$4 sm:$0xff]  }
 0x301   : > { %5777 = vmatpush1.bf16.msra.mxu0 %v8349_v47  ;;  %v6471_v47 = vpack.c.bf16 %v7730_v40, %v7730_v40  ;;  %v6409_v59 = vmul.f32 %v8476_v20, %v10579_v53  ;;  %v6214_v12 = vsel %vm2190_vm10, %v6212_v38, %v6210_v37  ;;  %v8400_v18 = vld [vmem:[%s9505_s29 + $0xc0c] ss:$8 sps:$4 sm:$0xff]   ;;  %v8407_v37 = vld [vmem:[%s9505_s29 + $0xb20] ss:$8 sps:$4 sm:$0xff]  }
 0x302   : > { %7610 = vmatprep.subr.msk.bf16.mxu0 %vm2324_vm0, %v7609_v50  ;;  %v8379_v50 = vld [vmem:[%s9505_s29 + $0x9e4] ss:$8 sps:$4 sm:$0xff]   ;;  %v5619_v23 = vunpack.c.l.b16 %v5585_v61  ;;  %v5916_v41 = vunpack.c.l.b16 %v5882_v1  ;;  %v6507_v2 = vunpack.c.l.b16 %v6473_v56  ;;  %v6216_v33 = vpack.c.b16 %v6214_v12, %v6214_v12  ;;  %v7757_v12 = vld [vmem:[%s9505_s29 + $0xc78] sm:$0x33] }
 0x303   : > { %6070 = vmatpush1.bf16.msra.mxu1 %v8346_v60  ;;  %v10700_v60 = vadd.f32 %v3731_v7, %v3443_v54  ;;  %v6505_v17 = vunpack.c.l.b16 %v6471_v47  ;;  %v8421_v20 = vld [vmem:[%s9505_s29 + $0xb04] ss:$8 sps:$4 sm:$0xff]  }
 0x304   : > { %6071 = vmatprep.subr.bf16.mxu1 %v8354_v44  ;;  %v5880_v44 = vpack.c.bf16 %v7613_v27, %v7613_v27  ;;  %v8383_v27 = vld [vmem:[%s9505_s29 + $0xb60] ss:$8 sps:$4 sm:$0xff]  }
 0x305   : > { %5785 = vmatpush2.bf16.msra.mxu0 %v5757_v32  ;;  %v8380_v32 = vld [vmem:[%s9505_s29 + $0xaa8] ss:$8 sps:$4 sm:$0xff]  }
 0x306   : > { %5786 = vmatprep.subr.bf16.mxu0 %v8361_v31  ;;  %v5914_v55 = vunpack.c.l.b16 %v5880_v44  ;;  %v8385_v31 = vld [vmem:[%s9505_s29 + $0xb64] ss:$8 sps:$4 sm:$0xff]  }
 0x307   : > { %6072 = vmatpush1.bf16.msra.mxu1 %v8352_v15  ;;  %v8374_v15 = vld [vmem:[%s9505_s29 + $0xab8] ss:$8 sps:$4 sm:$0xff]  }
 0x308   : > { %7668 = vmatprep.subr.msk.bf16.mxu1 %vm2324_vm0, %v7667_v51  ;;  %v8382_v51 = vld [vmem:[%s9505_s29 + $0xaac] ss:$8 sps:$4 sm:$0xff]   ;;  %v5918_v28 = vsel %vm2190_vm10, %v5916_v41, %v5914_v55 }
 0x309   : > { %5787 = vmatpush2.bf16.msra.mxu0 %v8359_v24  ;;  %v8477_v24 = vld [vmem:[%s10890_s0 + $0x10] sm:$0xff]  ;;  %v5920_v61 = vpack.c.b16 %v5918_v28, %v5918_v28 }
 0x30a   : > { %5788 = vmatprep.subr.bf16.mxu0 %v8367_v57  ;;  %v8478_v57 = vld [vmem:[%s10890_s0 + $0x30] sm:$0xff]  ;;  %v6407_v49 = vmul.f32 %v8477_v24, %v10586_v3 }
 0x30b   : > { %6080 = vmatpush2.bf16.msra.mxu1 %v6052_v34  ;;  %v5623_v34 = vsel %vm2190_vm10, %v5621_v48, %v5619_v23  ;;  %v6116_v26 = vmul.f32 %v8478_v57, %v10555_v5  ;;  %v6411_v54 = vmul.f32 %v8478_v57, %v10586_v3  ;;  %v8404_v23 = vld [vmem:[%s9505_s29 + $0xbf8] ss:$8 sps:$4 sm:$0xff]   ;;  %v8409_v48 = vld [vmem:[%s9505_s29 + $0xb24] ss:$8 sps:$4 sm:$0xff]  }
 0x30c   : > { %6081 = vmatprep.subr.bf16.mxu1 %v8364_v58  ;;  %v8388_v58 = vld [vmem:[%s9505_s29 + $0xc2c] ss:$8 sps:$4 sm:$0xff]   ;;  %v5625_v7 = vpack.c.b16 %v5623_v34, %v5623_v34 }
 0x30d   : > { %5789 = vmatpush2.bf16.msra.mxu0 %v8365_v62  ;;  %v6509_v62 = vsel %vm2190_vm10, %v6507_v2, %v6505_v17  ;;  %v6134_v36 = vadd.f32 %v6116_v26, %v6114_v22  ;;  %v6429_v40 = vadd.f32 %v6411_v54, %v6409_v59  ;;  %v8415_v17 = vld [vmem:[%s9505_s29 + $0xb14] ss:$8 sps:$4 sm:$0xff]   ;;  %v8419_v26 = vld [vmem:[%s9505_s29 + $0xb00] ss:$8 sps:$4 sm:$0xff]  }
 0x30e   : > { %5790 = vmatprep.subr.bf16.mxu0 %v8373_v42  ;;  %v6511_v3 = vpack.c.b16 %v6509_v62, %v6509_v62  ;;  %v8389_v42 = vld [vmem:[%s9505_s29 + $0xb50] ss:$8 sps:$4 sm:$0xff]   ;;  %v8418_v2 = vld [vmem:[%s9505_s29 + $0xbdc] ss:$8 sps:$4 sm:$0xff]   ;;  %v8424_v22 = vld [vmem:[%s9505_s29 + $0xbcc] ss:$8 sps:$4 sm:$0xff]  }
 0x30f   : > { %6082 = vmatpush2.bf16.msra.mxu1 %v8362_v25  ;;  %v6112_v25 = vmul.f32 %v8477_v24, %v10555_v5  ;;  %v8386_v5 = vld [vmem:[%s9505_s29 + $0xc28] ss:$8 sps:$4 sm:$0xff]   ;;  %v6135_v44 = vrot.slane %v6134_v36, 4  ;;  %v6430_v14 = vrot.slane %v6429_v40, 4  ;;  %v8427_v59 = vld [vmem:[%s9505_s29 + $0xaf4] ss:$8 sps:$4 sm:$0xff]  }
 0x310   : > { %6083 = vmatprep.subr.bf16.mxu1 %v8370_v13  ;;  %v6405_v13 = vmul.f32 %v8475_v10, %v10579_v53  ;;  %v8391_v53 = vld [vmem:[%s9505_s29 + $0xb54] ss:$8 sps:$4 sm:$0xff]   ;;  %v8425_v62 = vld [vmem:[%s9505_s29 + $0xaf0] ss:$8 sps:$4 sm:$0xff]  }
 0x311   : > { %5791 = vmatpush2.bf16.msra.mxu0 %v8371_v63  ;;  %v6118_v11 = vadd.f32 %v6112_v25, %v6110_v45  ;;  %v8406_v63 = vld [vmem:[%s9505_s29 + $0xbfc] ss:$8 sps:$4 sm:$0xff]   ;;  %v6136_v56 = vadd.f32 %v6135_v44, %v6134_v36  ;;  %v8413_v45 = vld [vmem:[%s9505_s29 + $0xb10] ss:$8 sps:$4 sm:$0xff]   ;;  %v7782_v36 = vcombine.low %v7757_v12, %v7757_v12 }
 0x312   : > { %5792 = vmatprep.subr.bf16.mxu0 %v8379_v50  ;;  %v6431_v50 = vadd.f32 %v6430_v14, %v6429_v40  ;;  %v8443_v44 = vld [vmem:[%s9505_s29 + $0xb94] ss:$8 sps:$4 sm:$0xff]  }
 0x313   : > { %6084 = vmatpush2.bf16.msra.mxu1 %v8368_v9  ;;  %v6413_v9 = vadd.f32 %v6407_v49, %v6405_v13  ;;  %v6137_v55 = vrot.slane %v6136_v56, 2  ;;  %v8422_v13 = vld [vmem:[%s9505_s29 + $0xbc8] ss:$8 sps:$4 sm:$0xff]   ;;  %v8430_v49 = vld [vmem:[%s9505_s29 + $0xbbc] ss:$8 sps:$4 sm:$0xff]  }
 0x314   : > { %6085 = vmatprep.subr.bf16.mxu1 %v8376_v39  ;;  %v6119_v39 = vrot.slane %v6118_v11, 4  ;;  %v6432_v38 = vrot.slane %v6431_v50, 2 }
 0x315   : > { %5793 = vmatpush2.bf16.msra.mxu0 %v8377_v52  ;;  %v6414_v1 = vrot.slane %v6413_v9, 4  ;;  %v8410_v52 = vld [vmem:[%s9505_s29 + $0xbe8] ss:$8 sps:$4 sm:$0xff]  }
 0x316   : > { %6352 = vmatprep.subr.bf16.mxu0 %v8385_v31  ;;  %v6120_v47 = vadd.f32 %v6119_v39, %v6118_v11  ;;  %v6138_v31 = vadd.f32 %v6137_v55, %v6136_v56  ;;  %v6433_v34 = vadd.f32 %v6432_v38, %v6431_v50  ;;  %v8440_v39 = vld [vmem:[%s9505_s29 + $0xc6c] ss:$8 sps:$4 sm:$0xff]   ;;  %v8444_v50 = vld [vmem:[%s9505_s29 + $0xc58] ss:$8 sps:$4 sm:$0xff]  }
 0x317   : > { %6086 = vmatpush2.bf16.msra.mxu1 %v8374_v15  ;;  %v6415_v21 = vadd.f32 %v6414_v1, %v6413_v9  ;;  %v8401_v15 = vld [vmem:[%s9505_s29 + $0xb30] ss:$8 sps:$4 sm:$0xff]   ;;  %v8446_v1 = vld [vmem:[%s9505_s29 + $0xc5c] ss:$8 sps:$4 sm:$0xff]  }
 0x318   : > { %6087 = vmatprep.subr.bf16.mxu1 %v8382_v51  ;;  %5795 = vmatmul.mubr.bf16.vlgmr.msra.gmra.mxu0 %v5625_v7  ;;  %v6121_v51 = vrot.slane %v6120_v47, 2  ;;  %v6139_v25 = vrot.slane %v6138_v31, 1  ;;  %v6434_v28 = vrot.slane %v6433_v34, 1 }
 0x319   : > { %6353 = vmatpush1.bf16.msra.mxu0 %v8383_v27  ;;  %7727 = vmatprep.mubr.msk.bf16.mxu0 %vm1997_vm1, %v6216_v33  ;;  %v6416_v41 = vrot.slane %v6415_v21, 2  ;;  %v7699_v27 = vld [vmem:[%s9505_s29 + $0xbb0] sm:$0x33] }
 0x31a   : > { %6354 = vmatprep.subr.bf16.mxu0 %v8391_v53  ;;  %v6140_v7 = vadd.f32 %v6139_v25, %v6138_v31  ;;  %v8428_v53 = vld [vmem:[%s9505_s29 + $0xbb8] ss:$8 sps:$4 sm:$0xff]   ;;  %v7725_v11 = vcombine.high %v7699_v27, %v7699_v27  ;;  %v7724_v33 = vcombine.low %v7699_v27, %v7699_v27 }
 0x31b   : > { %6088 = vmatpush2.bf16.msra.mxu1 %v8380_v32  ;;  %v6122_v32 = vadd.f32 %v6121_v51, %v6120_v47  ;;  %v6417_v10 = vadd.f32 %v6416_v41, %v6415_v21  ;;  %v8441_v21 = vld [vmem:[%s9505_s29 + $0xb90] ss:$8 sps:$4 sm:$0xff]  }
 0x31c   : > { %6647 = vmatprep.subr.bf16.mxu1 %v8388_v58  ;;  %v8416_v58 = vld [vmem:[%s9505_s29 + $0xbd8] ss:$8 sps:$4 sm:$0xff]  }
 0x31d   : > { %6355 = vmatpush1.bf16.msra.mxu0 %v8389_v42  ;;  %v6123_v24 = vrot.slane %v6122_v32, 1  ;;  %v6418_v57 = vrot.slane %v6417_v10, 1  ;;  %v8453_v25 = vld [vmem:[%s9505_s29 + $0xb70] ss:$8 sps:$4 sm:$0xff]  }
 0x31e   : > { %6090 = vmatmul.mubr.bf16.vlgmr.msra.gmra.mxu1 %v5920_v61  ;;  %6356 = vmatprep.subr.bf16.mxu0 %v8397_v29  ;;  %v6435_v61 = vadd.f32 %v6434_v28, %v6433_v34  ;;  %v8437_v29 = vld [vmem:[%s9505_s29 + $0xba4] ss:$8 sps:$4 sm:$0xff]  }
 0x31f   : > { %6648 = vmatpush1.bf16.msra.mxu1 %v8386_v5  ;;  %7785 = vmatprep.mubr.msk.bf16.mxu1 %vm1997_vm1, %v6511_v3  ;;  %v6124_v54 = vadd.f32 %v6123_v24, %v6122_v32  ;;  %v6419_v5 = vadd.f32 %v6418_v57, %v6417_v10  ;;  %v6161_v3 = vadd.f32 %v10668_v35, %v6140_v7  ;;  %v8447_v32 = vld [vmem:[%s9505_s29 + $0xb80] ss:$8 sps:$4 sm:$0xff]  }
 0x320   : > { %6649 = vmatprep.subr.bf16.mxu1 %v8394_v43  ;;  %v7783_v43 = vcombine.high %v7757_v12, %v7757_v12  ;;  %v6456_v40 = vadd.f32 %v10675_v4, %v6435_v61  ;;  %v8450_v10 = vld [vmem:[%s9505_s29 + $0xc48] ss:$8 sps:$4 sm:$0xff]   ;;  %v8456_v57 = vld [vmem:[%s9505_s29 + $0xc38] ss:$8 sps:$4 sm:$0xff]  }
 0x321   : > { %6357 = vmatpush1.bf16.msra.mxu0 %v8395_v19  ;;  %v6159_v9 = vadd.f32 %v10668_v35, %v6124_v54  ;;  %v6454_v42 = vadd.f32 %v10675_v4, %v6419_v5  ;;  %vm6165_vm11 = vcmp.gt.f32.partialorder %v6161_v3, 1.0  ;;  %v8435_v35 = vld [vmem:[%s9505_s29 + $0xba0] ss:$8 sps:$4 sm:$0xff]  }
 0x322   : > { %6358 = vmatprep.subr.bf16.mxu0 %v8403_v6  ;;  %vm6460_vm13 = vcmp.gt.f32.partialorder %v6456_v40, 1.0  ;;  %v8438_v4 = vld [vmem:[%s9505_s29 + $0xc68] ss:$8 sps:$4 sm:$0xff]   ;;  %v7673_v14 = vsel %vm6165_vm11, 1.0, %v8572_v16 }
 0x323   : > { %6650 = vmatpush1.bf16.msra.mxu1 %v8392_v8  ;;  %v6347_v8 = vsel %vm2324_vm0, %v7724_v33, 0  ;;  %vm6163_vm1 = vcmp.gt.f32.partialorder %v6159_v9, 1.0  ;;  %vm6458_vm12 = vcmp.gt.f32.partialorder %v6454_v42, 1.0 }
 0x324   : > { %6651 = vmatprep.subr.bf16.mxu1 %v8400_v18  ;;  %v6642_v18 = vsel %vm2324_vm0, %v7782_v36, 0  ;;  %v7671_v19 = vsel %vm6163_vm1, 1.0, %v8572_v16  ;;  %v7729_v6 = vsel %vm6458_vm12, 1.0, %v8572_v16 }
 0x325   : > { %6359 = vmatpush1.bf16.msra.mxu0 %v8401_v15 }
 0x326   : > { %6360 = vmatprep.subr.bf16.mxu0 %v8409_v48  ;;  %v6175_v48 = vpack.c.bf16 %v7671_v19, %v7671_v19 }
 0x327   : > { %6652 = vmatpush1.bf16.msra.mxu1 %v8398_v0 }
 0x328   : > { %6653 = vmatprep.subr.bf16.mxu1 %v8406_v63  ;;  %v7731_v63 = vsel %vm6460_vm13, 1.0, %v8572_v16  ;;  %v6209_v34 = vunpack.c.l.b16 %v6175_v48 }
 0x329   : > { %6361 = vmatpush1.bf16.msra.mxu0 %v8407_v37  ;;  %v8452_v37 = vld [vmem:[%s9505_s29 + $0xc4c] ss:$8 sps:$4 sm:$0xff]   ;;  %v6472_v38 = vpack.c.bf16 %v7731_v63, %v7731_v63 }
 0x32a   : > { %6362 = vmatprep.subr.bf16.mxu0 %v8415_v17 }
 0x32b   : > { %6654 = vmatpush1.bf16.msra.mxu1 %v8404_v23  ;;  %v8449_v23 = vld [vmem:[%s9505_s29 + $0xb84] ss:$8 sps:$4 sm:$0xff]   ;;  %v6506_v24 = vunpack.c.l.b16 %v6472_v38 }
 0x32c   : > { %6655 = vmatprep.subr.bf16.mxu1 %v8412_v30  ;;  %v6177_v30 = vpack.c.bf16 %v7673_v14, %v7673_v14 }
 0x32d   : > { %6363 = vmatpush1.bf16.msra.mxu0 %v8413_v45  ;;  %v8455_v45 = vld [vmem:[%s9505_s29 + $0xb74] ss:$8 sps:$4 sm:$0xff]  }
 0x32e   : > { %6364 = vmatprep.subr.bf16.mxu0 %v8421_v20  ;;  %v8458_v20 = vld [vmem:[%s9505_s29 + $0xc3c] ss:$8 sps:$4 sm:$0xff]   ;;  %s6882_s29 = sshll.u32 %s8631_s25, 1 }
 0x32f   : > { %6656 = vmatpush1.bf16.msra.mxu1 %v8410_v52  ;;  %p1909_p13 = scmp.lt.s32.totalorder %s6882_s29, 3 }
 0x330   : > { %6657 = vmatprep.subr.bf16.mxu1 %v8418_v2 }
 0x331   : > { %6365 = vmatpush1.bf16.msra.mxu0 %v8419_v26  ;;  %s10904_s29 = smov (!%p1909_p13, %s6882_s29), 3 }
 0x332   : > { %6366 = vmatprep.subr.bf16.mxu0 %v8427_v59  ;;  %s1911_s14 = scalar_lea.vmem %s10894_s4, %s10904_s29  ;;  %s10825_s29 = scalar_lea.hbm %s10895_s5, %s7799_s16 }
 0x333   : > { %6658 = vmatpush1.bf16.msra.mxu1 %v8416_v58 }
 0x334   : > { %6659 = vmatprep.subr.bf16.mxu1 %v8424_v22 }
 0x335   : > { %6367 = vmatpush1.bf16.msra.mxu0 %v8425_v62 }
 0x336   : > { %7726 = vmatprep.subr.msk.bf16.mxu0 %vm2324_vm0, %v7725_v11 }
 0x337   : > { %6660 = vmatpush1.bf16.msra.mxu1 %v8422_v13 }
 0x338   : > { %6661 = vmatprep.subr.bf16.mxu1 %v8430_v49 }
 0x339   : > { %6375 = vmatpush2.bf16.msra.mxu0 %v6347_v8 }
 0x33a   : > { %6376 = vmatprep.subr.bf16.mxu0 %v8437_v29 }
 0x33b   : > { %6662 = vmatpush1.bf16.msra.mxu1 %v8428_v53 }
 0x33c   : > { %7784 = vmatprep.subr.msk.bf16.mxu1 %vm2324_vm0, %v7783_v43  ;;  %v4026_v0 = vpop.f32.mrf.mxu0 }
 0x33d   : > { %v4033_v47 = vadd.f32 %v4026_v0, %v10700_v60  ;;  %6377 = vmatpush2.bf16.msra.mxu0 %v8435_v35  ;;  %v6470_v60 = vpack.c.bf16 %v7729_v6, %v7729_v6 }
 0x33e   : > { %v4028_v15 = vpop.f32.mrf.mxu0  ;;  %6378 = vmatprep.subr.bf16.mxu0 %v8443_v44 }
 0x33f   : > { %6670 = vmatpush2.bf16.msra.mxu1 %v6642_v18  ;;  %v4034_v55 = vadd.f32 %v4028_v15, %v10704_v46  ;;  %v6211_v46 = vunpack.c.l.b16 %v6177_v30  ;;  %v6504_v22 = vunpack.c.l.b16 %v6470_v60  ;;  %v6690_v30 = vld [vmem:[%s1911_s14] sm:$0x3]  ;;  %s8573_s14 = smov [#allocation5]  }
 0x340   : > { %6671 = vmatprep.subr.bf16.mxu1 %v8440_v39  ;;  %v4030_v52 = vpop.f32.mrf.mxu0  ;;  %s8483_s15 = sshll.u32 %s8573_s14, 4  ;;  %s8484_s15 = int_to_ptr.vmem [resolvable:$false] %s8483_s15 }
 0x341   : > { %6379 = vmatpush2.bf16.msra.mxu0 %v8441_v21  ;;  %v6213_v26 = vsel %vm2190_vm10, %v6211_v46, %v6209_v34  ;;  %v6508_v28 = vsel %vm2190_vm10, %v6506_v24, %v6504_v22  ;;  %v6692_v21 = vlaneseq  ;;  %s8485_s26 = scalar_lea.vmem %s8484_s15, 128  ;;  %p8486_p3 = scmp.lt.s32.totalorder %s10818_s18, %s8484_s15 }
 0x342   : > { %v4321_v56 = vpop.f32.mrf.mxu1  ;;  %v4031_v31 = vpop.f32.mrf.mxu0  ;;  %6380 = vmatprep.subr.bf16.mxu0 %v8449_v23  ;;  %v6215_v13 = vpack.c.b16 %v6213_v26, %v6213_v26  ;;  %v6510_v59 = vpack.c.b16 %v6508_v28, %v6508_v28  ;;  %p8487_p4 = scmp.lt.s32.totalorder %s8485_s26, %s8479_s13 }
 0x343   : > { %6672 = vmatpush2.bf16.msra.mxu1 %v8438_v4  ;;  %v4328_v51 = vadd.f32 %v4321_v56, %v4033_v47  ;;  %v6693_v15 = vshrl.u32 %v6692_v21, 7 }
 0x344   : > { %v4323_v41 = vpop.f32.mrf.mxu1  ;;  %6673 = vmatprep.subr.bf16.mxu1 %v8446_v1  ;;  %p8488_p5 = por %p8487_p4, %p8486_p3 }
 0x345   : > { %v4329_v17 = vadd.f32 %v4323_v41, %v4034_v55  ;;  %6381 = vmatpush2.bf16.msra.mxu0 %v8447_v32  ;;  %v6694_v48 = vsub.s32 0, %v6693_v15  ;;  %v6698_v55 = vsub.s32 1, %v6693_v15 }
 0x346   : > { %v4325_v2 = vpop.f32.mrf.mxu1  ;;  %6382 = vmatprep.subr.bf16.mxu0 %v8455_v45  ;;  %p8489_p7 = pnand %p8488_p5, %p8482_p2 }
 0x347   : > { %6674 = vmatpush2.bf16.msra.mxu1 %v8444_v50  ;;  %v6695_v52 = vrot.slane %v6690_v30, %v6694_v48 }
 0x348   : > { %v4326_v58 = vpop.f32.mrf.mxu1  ;;  %6675 = vmatprep.subr.bf16.mxu1 %v8452_v37 }
 0x349   : > { %6383 = vmatpush2.bf16.msra.mxu0 %v8453_v25 }
 0x34b   : > { %6676 = vmatpush2.bf16.msra.mxu1 %v8450_v10  ;;  %v6699_v10 = vrot.slane %v6690_v30, %v6698_v55 }
 0x34c   : > { %6677 = vmatprep.subr.bf16.mxu1 %v8458_v20  ;;  %6385 = vmatmul.mubr.bf16.vlgmr.msra.gmra.mxu0 %v6215_v13 }
 0x34f   : > { %6678 = vmatpush2.bf16.msra.mxu1 %v8456_v57 }
 0x352   : > { %6680 = vmatmul.mubr.bf16.vlgmr.msra.gmra.mxu1 %v6510_v59 }
 0x370   : > { %v4616_v49 = vpop.f32.mrf.mxu0 }
 0x371   : > { %v4623_v27 = vadd.f32 %v4616_v49, %v4328_v51 }
 0x372   : > { %v4618_v54 = vpop.f32.mrf.mxu0 }
 0x373   : > { %v4624_v5 = vadd.f32 %v4618_v54, %v4329_v17 }
 0x374   : > { %v4620_v61 = vpop.f32.mrf.mxu0 }
 0x376   : > { %v4911_v12 = vpop.f32.mrf.mxu1  ;;  %v4621_v33 = vpop.f32.mrf.mxu0 }
 0x377   : > { %v4918_v7 = vadd.f32 %v4911_v12, %v4623_v27 }
 0x378   : > { %v4913_v62 = vpop.f32.mrf.mxu1 }
 0x379   : > { %v4919_v53 = vadd.f32 %v4913_v62, %v4624_v5 }
 0x37a   : > { %v4915_v11 = vpop.f32.mrf.mxu1 }
 0x37c   : > { %v4916_v43 = vpop.f32.mrf.mxu1 }
 0x3a4   : > { %v5206_v36 = vpop.f32.mrf.mxu0 }
 0x3a5   : > { %v5213_v9 = vadd.f32 %v5206_v36, %v4918_v7 }
 0x3a6   : > { %v5208_v42 = vpop.f32.mrf.mxu0 }
 0x3a7   : > { %v5214_v8 = vadd.f32 %v5208_v42, %v4919_v53 }
 0x3a8   : > { %v5210_v18 = vpop.f32.mrf.mxu0 }
 0x3aa   : > { %v5501_v3 = vpop.f32.mrf.mxu1  ;;  %v5211_v4 = vpop.f32.mrf.mxu0 }
 0x3ab   : > { %v5508_v40 = vadd.f32 %v5501_v3, %v5213_v9 }
 0x3ac   : > { %v5503_v29 = vpop.f32.mrf.mxu1 }
 0x3ad   : > { %v5509_v39 = vadd.f32 %v5503_v29, %v5214_v8 }
 0x3ae   : > { %v5505_v35 = vpop.f32.mrf.mxu1 }
 0x3b0   : > { %v5506_v44 = vpop.f32.mrf.mxu1 }
 0x3d8   : > { %v5796_v1 = vpop.f32.mrf.mxu0 }
 0x3d9   : > { %v5803_v50 = vadd.f32 %v5796_v1, %v5508_v40 }
 0x3da   : > { %v5798_v14 = vpop.f32.mrf.mxu0 }
 0x3db   : > { %v5804_v23 = vadd.f32 %v5798_v14, %v5509_v39 }
 0x3dc   : > { %v5800_v6 = vpop.f32.mrf.mxu0 }
 0x3de   : > { %v6091_v19 = vpop.f32.mrf.mxu1  ;;  %v5801_v47 = vpop.f32.mrf.mxu0 }
 0x3df   : > { %v6098_v51 = vadd.f32 %v6091_v19, %v5803_v50 }
 0x3e0   : > { %v6093_v0 = vpop.f32.mrf.mxu1 }
 0x3e1   : > { %v6099_v37 = vadd.f32 %v6093_v0, %v5804_v23 }
 0x3e2   : > { %v6095_v63 = vpop.f32.mrf.mxu1 }
 0x3e4   : > { %v6096_v56 = vpop.f32.mrf.mxu1 }
 0x40c   : > { %v6386_v41 = vpop.f32.mrf.mxu0 }
 0x40d   : > { %v6393_v60 = vadd.f32 %v6386_v41, %v6098_v51 }
 0x40e   : > { %v6388_v17 = vpop.f32.mrf.mxu0 }
 0x40f   : > { %v6394_v32 = vadd.f32 %v6388_v17, %v6099_v37 }
 0x410   : > { %v6390_v45 = vpop.f32.mrf.mxu0 }
 0x412   : > { %v6681_v38 = vpop.f32.mrf.mxu1  ;;  %v6391_v20 = vpop.f32.mrf.mxu0 }
 0x413   : > { %v6688_v2 = vadd.f32 %v6681_v38, %v6393_v60 }
 0x414   : > { %v6683_v31 = vpop.f32.mrf.mxu1 }
 0x415   : > { %v6702_v34 = vadd.f32 %v6695_v52, %v6688_v2  ;;  %v6689_v46 = vadd.f32 %v6683_v31, %v6394_v32 }
 0x416   : > { %v6685_v58 = vpop.f32.mrf.mxu1 }
 0x417   : > { %vm6716_vm0 = vcmp.gt.f32.partialorder %v6702_v34, 1.0  ;;  %v6703_v22 = vadd.f32 %v6699_v10, %v6689_v46 }
 0x418   : > { %v6686_v24 = vpop.f32.mrf.mxu1  ;;  %v7787_v57 = vsel %vm6716_vm0, 1.0, %v8572_v16 }
 0x419   : > { %v6706_v25 = vcombine.low %v6702_v34, %v6703_v22  ;;  %vm6717_vm10 = vcmp.gt.f32.partialorder %v6703_v22, 1.0 }
 0x41a   : > { %v7788_v26 = vsel %vm6717_vm10, 1.0, %v8572_v16 }
 0x41b   : > { %v6724_v28 = vcombine.low %v7787_v57, %v7788_v26  ;;  %7786 = vst.sshfl [vmem:[%s1906_s17] sm:$0x33 pattern:$0x76325410] %v6706_v25 }
 0x41c   : > { %8492 = shalt.err (!%p8489_p7)
}
 0x41d   : > { %s8493_s16 = scalar_lea.hbm %s10816_s10, 64  ;;  %s8497_s25 = scalar_lea.hbm %s10896_s6, 128 }
 0x41e   : > { %p8494_p10 = scmp.ne.s32.totalorder %s10816_s10, %s8493_s16  ;;  %p8498_p13 = scmp.lt.s32.totalorder %s10816_s10, %s10896_s6 }
 0x41f   : > { %p8499_p0 = scmp.lt.s32.totalorder %s8497_s25, %s8493_s16 }
 0x420   : > { %p8495_p11 = pnand %p8494_p10, %p8649_p6 }
 0x421   : > { %p8500_p1 = por %p8499_p0, %p8498_p13 }
 0x422   : > { %p8496_p12 = pneg %p8495_p11 }
 0x424   : > { %p8501_p2 = pnand %p8500_p1, %p8496_p12 }
 0x426   : > { %8504 = shalt.err (!%p8501_p2)
}
 0x427   : > { %7804 = dma.vmem_to_hbm [thread:$0]  (%p8649_p6), %s10818_s18, 64, %s10816_s10, %s6740_s12   ;;  %7789 = vst.sshfl [vmem:[%s10810_s19] sm:$0x33 pattern:$0x76325410] %v6724_v28 }
 0x428   : > { %s6735_s13 = scalar_lea.sflag [#allocation4], %s9484_s9  ;;  %s8505_s15 = scalar_lea.vmem %s10827_s20, 64 }
 0x429   : > { %p8506_p3 = scmp.ne.s32.totalorder %s10827_s20, %s8505_s15  ;;  %s8574_s26 = smov [#allocation3]  }
 0x42a   : > { %s8509_s16 = sshll.u32 %s8574_s26, 4  ;;  %s8510_s16 = int_to_ptr.vmem [resolvable:$false] %s8509_s16 }
 0x42b   : > { %p8507_p4 = pnand %p8506_p3, %p8649_p6  ;;  %s8511_s17 = scalar_lea.vmem %s8510_s16, 128 }
 0x42c   : > { %p8512_p7 = scmp.lt.s32.totalorder %s10827_s20, %s8510_s16  ;;  %p8513_p10 = scmp.lt.s32.totalorder %s8511_s17, %s8505_s15 }
 0x42d   : > { %p8508_p5 = pneg %p8507_p4 }
 0x42e   : > { %p8514_p11 = por %p8513_p10, %p8512_p7 }
 0x430   : > { %p8515_p12 = pnand %p8514_p11, %p8508_p5 }
 0x432   : > { %8518 = shalt.err (!%p8515_p12)
}
 0x433   : > { %s8519_s18 = scalar_lea.hbm %s10825_s29, 64  ;;  %s8523_s10 = scalar_lea.hbm %s10895_s5, 128 }
 0x434   : > { %p8520_p13 = scmp.ne.s32.totalorder %s10825_s29, %s8519_s18  ;;  %p8524_p2 = scmp.lt.s32.totalorder %s10825_s29, %s10895_s5 }
 0x435   : > { %p8525_p3 = scmp.lt.s32.totalorder %s8523_s10, %s8519_s18 }
 0x436   : > { %p8521_p0 = pnand %p8520_p13, %p8649_p6 }
 0x437   : > { %p8526_p4 = por %p8525_p3, %p8524_p2 }
 0x438   : > { %p8522_p1 = pneg %p8521_p0 }
 0x43a   : > { %p8527_p5 = pnand %p8526_p4, %p8522_p1 }
 0x43c   : > { %8530 = shalt.err (!%p8527_p5)
}
 0x43d   : > { %7803 = dma.vmem_to_hbm [thread:$0]  (%p8649_p6), %s10827_s20, 64, %s10825_s29, %s6735_s13  }
 0x43e PF: > { %s6780_s25 = sand.u32 1, %s8557_s21   ;;  %p7808_p7 = pnand %p6876_p9, %p8653_p8 }
 0x43f   : > { %s6781_s11 = scalar_lea.sflag [#allocation4], %s6780_s25 }
 0x440   : > { %p7809_p10 = pneg %p7808_p7 }
 0x442   : > { %8548 = dma.done.wait (%p7809_p10), %s6781_s11, 64  }
 0x443   : > { %8550 = vsyncadd (%p7809_p10), %s6781_s11, 4294967232  ;;  %s6790_s14 = scalar_lea.sflag [#allocation6], %s6780_s25 }
 0x444   : > { %8552 = dma.done.wait (%p7809_p10), %s6790_s14, 64  }
 0x445   : > { %8554 = vsyncadd (%p7809_p10), %s6790_s14, 4294967232  ;;  %p20_p6 = scmp.ge.s32.totalorder %s8635_s27, 4   ;;  %s10899_s21 = smov %s8561_s22 }
 0x446   : > { %s10900_s22 = smov %s8565_s23  ;;  %s10901_s23 = smov %s8647_s30 }
 0x447   : > { %s10902_s24 = smov %s8635_s27  ;;  %22 = sbr.rel (!%p20_p6) target bundleno = 5 (0x5), region = 153 }
 0x44c   :  { %6795 = vsyncpa [#allocation4], 1 }
 0x44d   :  { %6797 = vsyncpa [#allocation4 + $0x1], 1 }
 0x44e   :  { %6798 = vsyncpa [#allocation6], 1 }
 0x44f   :  { %6800 = vsyncpa [#allocation6 + $0x1], 1 }

</bundles_post_ra>
